<compile_context>
chip_gen: v5e
topology: v5e:2x2
jax: 0.10.0
libtpu: 0.0.40
codegen_flags: <defaults>
</compile_context>

<pallas_src>
import functools

import numpy as np
import jax
import jax.numpy as jnp
from jax.experimental import pallas as pl
from jax.experimental.pallas import tpu as pltpu

EPS = 1e-5
STRIDE = 2


# ---------------------------------------------------------------------------
# Fused per-layer kernel: BN affine + ReLU -> matmul -> col2im -> (bias/tanh |
# BN partial statistics)
# ---------------------------------------------------------------------------
def _gen_block_kernel(x_ref, s_ref, t_ref, w_ref, b_ref, out_ref, st_ref, *,
                      k, relu_in, final):
    """One transposed-conv block for a single image (one grid step).

    x_ref  : (1, Hin, Win*Ci)   f32   raw (pre-BN) input activation
    s_ref  : (1, Win*Ci)        f32   previous BN scale (ones for layer 0)
    t_ref  : (1, Win*Ci)        f32   previous BN shift (zeros for layer 0)
    w_ref  : (Win*Ci, k*Wo*Co)  bf16  weight with width-scatter folded in
    b_ref  : (1, Wo*Co)         f32   conv bias tiled over wo (zeros for BN layers)
    out_ref: (1, 2, Hin+1, Wo*Co) f32 output rows in (row-parity, i) order
    st_ref : (1, 2, Wo*Co)      f32   per-image [sum, sum of squares] over rows
    """
    # Prologue: previous layer's BatchNorm affine (+ ReLU), fused, in f32.
    x = x_ref[0]
    x = x * s_ref[...] + t_ref[...]
    if relu_in:
        x = jnp.maximum(x, 0.0)

    # One bf16 MXU matmul per image: r[h, (dh, wo, co)] is the contribution of
    # input row h to output row 2h+dh over the full output width.
    r = jnp.dot(x.astype(jnp.bfloat16), w_ref[...],
                preferred_element_type=jnp.float32)

    h_in = r.shape[0]
    l1 = r.shape[1] // k
    taps = [r[:, i * l1:(i + 1) * l1] for i in range(k)]
    z = jnp.zeros((1, l1), jnp.float32)

    # Height overlap-add (stride 2), parity decomposed, entirely in VMEM/vregs:
    #   out[2i]   = taps[0][i] + taps[2][i-1]
    #   out[2i+1] = taps[1][i] (+ taps[3][i-1] when k == 4)
    even = (jnp.concatenate([taps[0], z], axis=0)
            + jnp.concatenate([z, taps[2]], axis=0))
    if k == 4:
        odd = (jnp.concatenate([taps[1], z], axis=0)
               + jnp.concatenate([z, taps[3]], axis=0))
    else:
        odd = jnp.concatenate([taps[1], z], axis=0)   # last row is zero padding

    even = even + b_ref[...]
    odd = odd + b_ref[...]
    if final:                                          # Tanh fused in-kernel
        even = jnp.tanh(even)
        odd = jnp.tanh(odd)

    out_ref[0, 0, :, :] = even
    out_ref[0, 1, :, :] = odd

    # Epilogue: per-image BatchNorm partial sums (row reduction happens here,
    # only a (2, Wo*Co)-per-image finalize is left to XLA).
    s1 = jnp.sum(even, axis=0, keepdims=True) + jnp.sum(odd, axis=0, keepdims=True)
    s2 = (jnp.sum(even * even, axis=0, keepdims=True)
          + jnp.sum(odd * odd, axis=0, keepdims=True))
    st_ref[0, :, :] = jnp.concatenate([s1, s2], axis=0)


def gen_block(x, scale, shift, wbig, bias_row, *, k, relu_in, final):
    """x: (N, Hin, Win*Ci) -> ((N, 2, Hin+1, Wo*Co) parity rows, (N, 2, Wo*Co) stats)."""
    n, h_in, kdim = x.shape
    l1 = bias_row.shape[1]
    assert wbig.shape == (kdim, k * l1), (wbig.shape, kdim, k, l1)
    hh = h_in + 1

    kernel = functools.partial(_gen_block_kernel, k=k, relu_in=relu_in, final=final)
    out, stats = pl.pallas_call(
        kernel,
        out_shape=(jax.ShapeDtypeStruct((n, 2, hh, l1), jnp.float32),
                   jax.ShapeDtypeStruct((n, 2, l1), jnp.float32)),
        grid=(n,),
        in_specs=[
            pl.BlockSpec((1, h_in, kdim), lambda i: (i, 0, 0)),
            pl.BlockSpec((1, kdim), lambda i: (0, 0)),
            pl.BlockSpec((1, kdim), lambda i: (0, 0)),
            pl.BlockSpec((kdim, k * l1), lambda i: (0, 0)),
            pl.BlockSpec((1, l1), lambda i: (0, 0)),
        ],
        out_specs=(pl.BlockSpec((1, 2, hh, l1), lambda i: (i, 0, 0, 0)),
                   pl.BlockSpec((1, 2, l1), lambda i: (i, 0, 0))),
        compiler_params=pltpu.CompilerParams(
            dimension_semantics=("parallel",),
            vmem_limit_bytes=32 * 1024 * 1024),
    )(x, scale, shift, wbig, bias_row)
    return out, stats


# ---------------------------------------------------------------------------
# Parameters (PyTorch layout) + one-time packing of matmul-ready weights
# ---------------------------------------------------------------------------
def init_generator_params(key, z_dim, im_chan, hidden_dim):
    layer_dims = [
        (z_dim, hidden_dim * 8, 3),
        (hidden_dim * 8, hidden_dim * 4, 3),
        (hidden_dim * 4, hidden_dim * 2, 3),
        (hidden_dim * 2, hidden_dim, 3),
        (hidden_dim, im_chan, 4),            # final block: kernel_size=4
    ]
    params = []
    for i, (ci, co, k) in enumerate(layer_dims):
        key, kw, kb = jax.random.split(key, 3)
        p = {"w": jax.random.normal(kw, (ci, co, k, k), jnp.float32) * 0.05,
             "b": jax.random.normal(kb, (co,), jnp.float32) * 0.01}
        if i < len(layer_dims) - 1:          # BatchNorm2d affine (PyTorch default init)
            p["gamma"] = jnp.ones((co,), jnp.float32)
            p["beta"] = jnp.zeros((co,), jnp.float32)
        params.append(p)
    return params


def _build_scatter_weight(w_pt, win, k, stride=STRIDE):
    """Wbig[(w, ci), (dh, wo, co)] = w_pt[ci, co, dh, wo - stride*w] (0<=wo-s*w<k)."""
    ci, co = int(w_pt.shape[0]), int(w_pt.shape[1])
    wo_dim = (win - 1) * stride + k
    w_np = np.asarray(w_pt)                                    # (ci, co, kh, kw)
    big = np.zeros((win * ci, k * wo_dim * co), np.float32)
    for w in range(win):
        for dw in range(k):
            wo = stride * w + dw
            for dh in range(k):
                col = (dh * wo_dim + wo) * co
                big[w * ci:(w + 1) * ci, col:col + co] = w_np[:, :, dh, dw]
    return jnp.asarray(big, jnp.bfloat16)


def prepare_params(params):
    prepped = []
    h = w = 1
    n = len(params)
    for i, p in enumerate(params):
        ci, co, k, _ = p["w"].shape
        final = (i == n - 1)
        ho, wo = (h - 1) * STRIDE + k, (w - 1) * STRIDE + k
        q = {"wbig": _build_scatter_weight(p["w"], w, k),
             "k": int(k), "ci": int(ci), "co": int(co),
             "hin": h, "win": w, "ho": ho, "wo": wo, "final": final}
        if final:
            # bias folded into the kernel epilogue, tiled to the (wo, co) lane layout
            q["bias_row"] = jnp.tile(p["b"].astype(jnp.float32), wo).reshape(1, wo * co)
        else:
            # conv bias before BatchNorm is exactly cancelled by mean subtraction
            q["bias_row"] = jnp.zeros((1, wo * co), jnp.float32)
            q["gamma"] = p["gamma"].astype(jnp.float32)
            q["beta"] = p["beta"].astype(jnp.float32)
        prepped.append(q)
        h, w = ho, wo
    return prepped


# ---------------------------------------------------------------------------
# Generator forward (matches nn.Module forward; returns NCHW)
# ---------------------------------------------------------------------------
def generator_forward(noise, prepped, z_dim):
    n = noise.shape[0]
    # PyTorch: noise.view(N, z_dim, 1, 1)  ->  rows = h(=1), lanes = (w=1, c=z_dim)
    x = noise.reshape(n, 1, z_dim).astype(jnp.float32)
    scale = jnp.ones((1, z_dim), jnp.float32)
    shift = jnp.zeros((1, z_dim), jnp.float32)
    relu_in = False

    # TODO(synk): the first two/three tiny layers could be merged into a single
    # pallas_call (whole batch + BN stats in VMEM) to cut launch overhead further.
    for p in prepped:
        out_par, stats = gen_block(x, scale, shift, p["wbig"], p["bias_row"],
                                   k=p["k"], relu_in=relu_in, final=p["final"])
        ho, wo, co = p["ho"], p["wo"], p["co"]
        hh = p["hin"] + 1

        # Interleave the two row-parity planes into spatial row order
        # (one tiny XLA transpose per layer; all heavy work stayed in-kernel).
        rows = out_par.transpose(0, 2, 1, 3).reshape(n, 2 * hh, wo * co)[:, :ho, :]

        if p["final"]:
            img = rows.reshape(n, ho, wo, co)
            return jnp.transpose(img, (0, 3, 1, 2))            # NHWC -> NCHW

        # Finalize training-mode BatchNorm2d statistics (biased variance, f32 sums).
        m = n * ho * wo
        s1 = stats[:, 0, :].reshape(n, wo, co).sum(axis=(0, 1))
        s2 = stats[:, 1, :].reshape(n, wo, co).sum(axis=(0, 1))
        mean = s1 / m
        var = jnp.maximum(s2 / m - mean * mean, 0.0)
        bn_scale = p["gamma"] * jax.lax.rsqrt(var + EPS)
        bn_shift = p["beta"] - mean * bn_scale
        # Hand the affine (+ReLU) to the next layer's kernel prologue, tiled to
        # the next layer's (w-major, c-minor) lane layout.
        scale = jnp.tile(bn_scale, wo).reshape(1, wo * co)
        shift = jnp.tile(bn_shift, wo).reshape(1, wo * co)
        x = rows
        relu_in = True

    return None  # unreachable


if __name__ == "__main__":
    # Small config consistent with the module: z_dim=8, im_chan=3, hidden_dim=8
    Z_DIM, IM_CHAN, HIDDEN, BATCH = 8, 3, 8, 2

    key = jax.random.PRNGKey(0)
    k_noise, k_params = jax.random.split(key)
    noise = jax.random.normal(k_noise, (BATCH, Z_DIM), jnp.float32)
    prepped = prepare_params(init_generator_params(k_params, Z_DIM, IM_CHAN, HIDDEN))

    fwd = jax.jit(lambda z: generator_forward(z, prepped, Z_DIM))
    out = fwd(noise)
    jax.block_until_ready(out)

    # spatial chain: 1 -> 3 -> 7 -> 15 -> 31 -> 64
    assert out.shape == (BATCH, IM_CHAN, 64, 64), out.shape
    assert bool(jnp.all(jnp.isfinite(out)))
    assert bool(jnp.all(jnp.abs(out) <= 1.0 + 1e-6))   # tanh output range
    print("KERNEL_OK")
</pallas_src>

<mosaic_0001>
module attributes {stable_mosaic.version = 11 : i64} {
  func.func @_gen_block_kernel(%arg0: i32, %arg1: memref<1x1x8xf32, #tpu.memory_space<vmem>>, %arg2: memref<1x8xf32, #tpu.memory_space<vmem>>, %arg3: memref<1x8xf32, #tpu.memory_space<vmem>>, %arg4: memref<8x576xbf16, #tpu.memory_space<vmem>>, %arg5: memref<1x192xf32, #tpu.memory_space<vmem>>, %arg6: memref<1x2x2x192xf32, #tpu.memory_space<vmem>>, %arg7: memref<1x2x192xf32, #tpu.memory_space<vmem>>) attributes {dimension_semantics = [#tpu.dimension_semantics<parallel>], iteration_bounds = array<i64: 2>, scalar_prefetch = 0 : i64, scratch_operands = 0 : i64, tpu.core_type = #tpu.core_type<tc>, window_params = [{transform_indices = @transform_0, window_bounds = array<i64: 1, 1, 8>}, {pipeline_mode = #tpu.pipeline_mode<synchronous>, transform_indices = @transform_1, window_bounds = array<i64: 1, 8>}, {pipeline_mode = #tpu.pipeline_mode<synchronous>, transform_indices = @transform_2, window_bounds = array<i64: 1, 8>}, {pipeline_mode = #tpu.pipeline_mode<synchronous>, transform_indices = @transform_3, window_bounds = array<i64: 8, 576>}, {pipeline_mode = #tpu.pipeline_mode<synchronous>, transform_indices = @transform_4, window_bounds = array<i64: 1, 192>}, {transform_indices = @transform_5, window_bounds = array<i64: 1, 2, 2, 192>}, {transform_indices = @transform_6, window_bounds = array<i64: 1, 2, 192>}]} {
    %c0 = arith.constant 0 : index
    %c0_0 = arith.constant 0 : index
    %c0_1 = arith.constant 0 : index
    %0 = vector.load %arg1[%c0, %c0_0, %c0_1] : memref<1x1x8xf32, #tpu.memory_space<vmem>>, vector<1x1x8xf32>
    %1 = vector.shape_cast %0 : vector<1x1x8xf32> to vector<1x8xf32>
    %c0_2 = arith.constant 0 : index
    %c0_3 = arith.constant 0 : index
    %2 = vector.load %arg2[%c0_2, %c0_3] : memref<1x8xf32, #tpu.memory_space<vmem>>, vector<1x8xf32>
    %3 = arith.mulf %1, %2 : vector<1x8xf32>
    %c0_4 = arith.constant 0 : index
    %c0_5 = arith.constant 0 : index
    %4 = vector.load %arg3[%c0_4, %c0_5] : memref<1x8xf32, #tpu.memory_space<vmem>>, vector<1x8xf32>
    %5 = arith.addf %3, %4 : vector<1x8xf32>
    %6 = arith.truncf %5 : vector<1x8xf32> to vector<1x8xbf16>
    %c0_6 = arith.constant 0 : index
    %c0_7 = arith.constant 0 : index
    %7 = vector.load %arg4[%c0_6, %c0_7] : memref<8x576xbf16, #tpu.memory_space<vmem>>, vector<8x576xbf16>
    %cst = arith.constant dense<0.000000e+00> : vector<1x576xf32>
    %8 = tpu.matmul %6, %7, %cst {dimension_numbers = #tpu.dot_dimension_numbers<[1], [0], [0], [1], [0, 0, 1, 1], [], []>} : vector<1x8xbf16>, vector<8x576xbf16>, vector<1x576xf32> -> vector<1x576xf32>
    %9 = vector.extract_strided_slice %8 {offsets = [0, 0], sizes = [1, 192], strides = [1, 1]} : vector<1x576xf32> to vector<1x192xf32>
    %10 = vector.extract_strided_slice %8 {offsets = [0, 192], sizes = [1, 192], strides = [1, 1]} : vector<1x576xf32> to vector<1x192xf32>
    %11 = vector.extract_strided_slice %8 {offsets = [0, 384], sizes = [1, 192], strides = [1, 1]} : vector<1x576xf32> to vector<1x192xf32>
    %cst_8 = arith.constant 0.000000e+00 : f32
    %12 = vector.broadcast %cst_8 : f32 to vector<1x192xf32>
    %13 = tpu.concatenate %9, %12 in 0 : vector<1x192xf32>, vector<1x192xf32> -> vector<2x192xf32>
    %14 = tpu.concatenate %12, %11 in 0 : vector<1x192xf32>, vector<1x192xf32> -> vector<2x192xf32>
    %15 = arith.addf %13, %14 : vector<2x192xf32>
    %16 = tpu.concatenate %10, %12 in 0 : vector<1x192xf32>, vector<1x192xf32> -> vector<2x192xf32>
    %c0_9 = arith.constant 0 : index
    %c0_10 = arith.constant 0 : index
    %17 = vector.load %arg5[%c0_9, %c0_10] : memref<1x192xf32, #tpu.memory_space<vmem>>, vector<1x192xf32>
    %18 = vector.broadcast %17 : vector<1x192xf32> to vector<2x192xf32>
    %19 = arith.addf %15, %18 : vector<2x192xf32>
    %c0_11 = arith.constant 0 : index
    %c0_12 = arith.constant 0 : index
    %20 = vector.load %arg5[%c0_11, %c0_12] : memref<1x192xf32, #tpu.memory_space<vmem>>, vector<1x192xf32>
    %21 = vector.broadcast %20 : vector<1x192xf32> to vector<2x192xf32>
    %22 = arith.addf %16, %21 : vector<2x192xf32>
    %c0_13 = arith.constant 0 : index
    %c0_14 = arith.constant 0 : index
    %c0_15 = arith.constant 0 : index
    %c0_16 = arith.constant 0 : index
    %23 = vector.load %arg6[%c0_13, %c0_14, %c0_15, %c0_16] : memref<1x2x2x192xf32, #tpu.memory_space<vmem>>, vector<1x1x2x192xf32>
    %24 = vector.shape_cast %23 : vector<1x1x2x192xf32> to vector<2x192xf32>
    %25 = vector.shape_cast %19 : vector<2x192xf32> to vector<1x1x2x192xf32>
    tpu.vector_store %arg6[%c0_13, %c0_14, %c0_15, %c0_16], %25 {strides = array<i32>} : memref<1x2x2x192xf32, #tpu.memory_space<vmem>>, vector<1x1x2x192xf32>,
    %c0_17 = arith.constant 0 : index
    %c1 = arith.constant 1 : index
    %c0_18 = arith.constant 0 : index
    %c0_19 = arith.constant 0 : index
    %26 = vector.load %arg6[%c0_17, %c1, %c0_18, %c0_19] : memref<1x2x2x192xf32, #tpu.memory_space<vmem>>, vector<1x1x2x192xf32>
    %27 = vector.shape_cast %26 : vector<1x1x2x192xf32> to vector<2x192xf32>
    %28 = vector.shape_cast %22 : vector<2x192xf32> to vector<1x1x2x192xf32>
    tpu.vector_store %arg6[%c0_17, %c1, %c0_18, %c0_19], %28 {strides = array<i32>} : memref<1x2x2x192xf32, #tpu.memory_space<vmem>>, vector<1x1x2x192xf32>,
    %cst_20 = arith.constant dense<0.000000e+00> : vector<192xf32>
    %29 = vector.multi_reduction <add>, %19, %cst_20 [0] : vector<2x192xf32> to vector<192xf32>
    %30 = vector.shape_cast %29 : vector<192xf32> to vector<1x192xf32>
    %cst_21 = arith.constant dense<0.000000e+00> : vector<192xf32>
    %31 = vector.multi_reduction <add>, %22, %cst_21 [0] : vector<2x192xf32> to vector<192xf32>
    %32 = vector.shape_cast %31 : vector<192xf32> to vector<1x192xf32>
    %33 = arith.addf %30, %32 : vector<1x192xf32>
    %34 = arith.mulf %19, %19 : vector<2x192xf32>
    %cst_22 = arith.constant dense<0.000000e+00> : vector<192xf32>
    %35 = vector.multi_reduction <add>, %34, %cst_22 [0] : vector<2x192xf32> to vector<192xf32>
    %36 = vector.shape_cast %35 : vector<192xf32> to vector<1x192xf32>
    %37 = arith.mulf %22, %22 : vector<2x192xf32>
    %cst_23 = arith.constant dense<0.000000e+00> : vector<192xf32>
    %38 = vector.multi_reduction <add>, %37, %cst_23 [0] : vector<2x192xf32> to vector<192xf32>
    %39 = vector.shape_cast %38 : vector<192xf32> to vector<1x192xf32>
    %40 = arith.addf %36, %39 : vector<1x192xf32>
    %41 = tpu.concatenate %33, %40 in 0 : vector<1x192xf32>, vector<1x192xf32> -> vector<2x192xf32>
    %c0_24 = arith.constant 0 : index
    %c0_25 = arith.constant 0 : index
    %c0_26 = arith.constant 0 : index
    %42 = vector.load %arg7[%c0_24, %c0_25, %c0_26] : memref<1x2x192xf32, #tpu.memory_space<vmem>>, vector<1x2x192xf32>
    %43 = vector.shape_cast %42 : vector<1x2x192xf32> to vector<2x192xf32>
    %44 = vector.shape_cast %41 : vector<2x192xf32> to vector<1x2x192xf32>
    tpu.vector_store %arg7[%c0_24, %c0_25, %c0_26], %44 {strides = array<i32>} : memref<1x2x192xf32, #tpu.memory_space<vmem>>, vector<1x2x192xf32>,
    return
  }
  func.func @transform_0(%arg0: i32) -> (i32, i32, i32) {
    %c0_i32 = arith.constant 0 : i32
    %c0_i32_0 = arith.constant 0 : i32
    %c0_i32_1 = arith.constant 0 : i32
    return %arg0, %c0_i32, %c0_i32_0 : i32, i32, i32
  }
  func.func @transform_1(%arg0: i32) -> (i32, i32) {
    %c0_i32 = arith.constant 0 : i32
    %c0_i32_0 = arith.constant 0 : i32
    %c0_i32_1 = arith.constant 0 : i32
    return %c0_i32, %c0_i32_0 : i32, i32
  }
  func.func @transform_2(%arg0: i32) -> (i32, i32) {
    %c0_i32 = arith.constant 0 : i32
    %c0_i32_0 = arith.constant 0 : i32
    %c0_i32_1 = arith.constant 0 : i32
    return %c0_i32, %c0_i32_0 : i32, i32
  }
  func.func @transform_3(%arg0: i32) -> (i32, i32) {
    %c0_i32 = arith.constant 0 : i32
    %c0_i32_0 = arith.constant 0 : i32
    %c0_i32_1 = arith.constant 0 : i32
    return %c0_i32, %c0_i32_0 : i32, i32
  }
  func.func @transform_4(%arg0: i32) -> (i32, i32) {
    %c0_i32 = arith.constant 0 : i32
    %c0_i32_0 = arith.constant 0 : i32
    %c0_i32_1 = arith.constant 0 : i32
    return %c0_i32, %c0_i32_0 : i32, i32
  }
  func.func @transform_5(%arg0: i32) -> (i32, i32, i32, i32) {
    %c0_i32 = arith.constant 0 : i32
    %c0_i32_0 = arith.constant 0 : i32
    %c0_i32_1 = arith.constant 0 : i32
    %c0_i32_2 = arith.constant 0 : i32
    return %arg0, %c0_i32, %c0_i32_0, %c0_i32_1 : i32, i32, i32, i32
  }
  func.func @transform_6(%arg0: i32) -> (i32, i32, i32) {
    %c0_i32 = arith.constant 0 : i32
    %c0_i32_0 = arith.constant 0 : i32
    %c0_i32_1 = arith.constant 0 : i32
    return %arg0, %c0_i32, %c0_i32_0 : i32, i32, i32
  }
}

module attributes {stable_mosaic.version = 11 : i64} {
  func.func @_gen_block_kernel(%arg0: i32, %arg1: memref<1x3x192xf32, #tpu.memory_space<vmem>>, %arg2: memref<1x192xf32, #tpu.memory_space<vmem>>, %arg3: memref<1x192xf32, #tpu.memory_space<vmem>>, %arg4: memref<192x672xbf16, #tpu.memory_space<vmem>>, %arg5: memref<1x224xf32, #tpu.memory_space<vmem>>, %arg6: memref<1x2x4x224xf32, #tpu.memory_space<vmem>>, %arg7: memref<1x2x224xf32, #tpu.memory_space<vmem>>) attributes {dimension_semantics = [#tpu.dimension_semantics<parallel>], iteration_bounds = array<i64: 2>, scalar_prefetch = 0 : i64, scratch_operands = 0 : i64, tpu.core_type = #tpu.core_type<tc>, window_params = [{transform_indices = @transform_0, window_bounds = array<i64: 1, 3, 192>}, {pipeline_mode = #tpu.pipeline_mode<synchronous>, transform_indices = @transform_1, window_bounds = array<i64: 1, 192>}, {pipeline_mode = #tpu.pipeline_mode<synchronous>, transform_indices = @transform_2, window_bounds = array<i64: 1, 192>}, {pipeline_mode = #tpu.pipeline_mode<synchronous>, transform_indices = @transform_3, window_bounds = array<i64: 192, 672>}, {pipeline_mode = #tpu.pipeline_mode<synchronous>, transform_indices = @transform_4, window_bounds = array<i64: 1, 224>}, {transform_indices = @transform_5, window_bounds = array<i64: 1, 2, 4, 224>}, {transform_indices = @transform_6, window_bounds = array<i64: 1, 2, 224>}]} {
    %c0 = arith.constant 0 : index
    %c0_0 = arith.constant 0 : index
    %c0_1 = arith.constant 0 : index
    %0 = vector.load %arg1[%c0, %c0_0, %c0_1] : memref<1x3x192xf32, #tpu.memory_space<vmem>>, vector<1x3x192xf32>
    %1 = vector.shape_cast %0 : vector<1x3x192xf32> to vector<3x192xf32>
    %c0_2 = arith.constant 0 : index
    %c0_3 = arith.constant 0 : index
    %2 = vector.load %arg2[%c0_2, %c0_3] : memref<1x192xf32, #tpu.memory_space<vmem>>, vector<1x192xf32>
    %3 = vector.broadcast %2 : vector<1x192xf32> to vector<3x192xf32>
    %4 = arith.mulf %1, %3 : vector<3x192xf32>
    %c0_4 = arith.constant 0 : index
    %c0_5 = arith.constant 0 : index
    %5 = vector.load %arg3[%c0_4, %c0_5] : memref<1x192xf32, #tpu.memory_space<vmem>>, vector<1x192xf32>
    %6 = vector.broadcast %5 : vector<1x192xf32> to vector<3x192xf32>
    %7 = arith.addf %4, %6 : vector<3x192xf32>
    %cst = arith.constant 0.000000e+00 : f32
    %8 = vector.broadcast %cst : f32 to vector<3x192xf32>
    %9 = arith.maximumf %7, %8 : vector<3x192xf32>
    %10 = arith.truncf %9 : vector<3x192xf32> to vector<3x192xbf16>
    %c0_6 = arith.constant 0 : index
    %c0_7 = arith.constant 0 : index
    %11 = vector.load %arg4[%c0_6, %c0_7] : memref<192x672xbf16, #tpu.memory_space<vmem>>, vector<192x672xbf16>
    %cst_8 = arith.constant dense<0.000000e+00> : vector<3x672xf32>
    %12 = tpu.matmul %10, %11, %cst_8 {dimension_numbers = #tpu.dot_dimension_numbers<[1], [0], [0], [1], [0, 0, 1, 1], [], []>} : vector<3x192xbf16>, vector<192x672xbf16>, vector<3x672xf32> -> vector<3x672xf32>
    %13 = vector.extract_strided_slice %12 {offsets = [0, 0], sizes = [3, 224], strides = [1, 1]} : vector<3x672xf32> to vector<3x224xf32>
    %14 = vector.extract_strided_slice %12 {offsets = [0, 224], sizes = [3, 224], strides = [1, 1]} : vector<3x672xf32> to vector<3x224xf32>
    %15 = vector.extract_strided_slice %12 {offsets = [0, 448], sizes = [3, 224], strides = [1, 1]} : vector<3x672xf32> to vector<3x224xf32>
    %cst_9 = arith.constant 0.000000e+00 : f32
    %16 = vector.broadcast %cst_9 : f32 to vector<1x224xf32>
    %17 = tpu.concatenate %13, %16 in 0 : vector<3x224xf32>, vector<1x224xf32> -> vector<4x224xf32>
    %18 = tpu.concatenate %16, %15 in 0 : vector<1x224xf32>, vector<3x224xf32> -> vector<4x224xf32>
    %19 = arith.addf %17, %18 : vector<4x224xf32>
    %20 = tpu.concatenate %14, %16 in 0 : vector<3x224xf32>, vector<1x224xf32> -> vector<4x224xf32>
    %c0_10 = arith.constant 0 : index
    %c0_11 = arith.constant 0 : index
    %21 = vector.load %arg5[%c0_10, %c0_11] : memref<1x224xf32, #tpu.memory_space<vmem>>, vector<1x224xf32>
    %22 = vector.broadcast %21 : vector<1x224xf32> to vector<4x224xf32>
    %23 = arith.addf %19, %22 : vector<4x224xf32>
    %c0_12 = arith.constant 0 : index
    %c0_13 = arith.constant 0 : index
    %24 = vector.load %arg5[%c0_12, %c0_13] : memref<1x224xf32, #tpu.memory_space<vmem>>, vector<1x224xf32>
    %25 = vector.broadcast %24 : vector<1x224xf32> to vector<4x224xf32>
    %26 = arith.addf %20, %25 : vector<4x224xf32>
    %c0_14 = arith.constant 0 : index
    %c0_15 = arith.constant 0 : index
    %c0_16 = arith.constant 0 : index
    %c0_17 = arith.constant 0 : index
    %27 = vector.load %arg6[%c0_14, %c0_15, %c0_16, %c0_17] : memref<1x2x4x224xf32, #tpu.memory_space<vmem>>, vector<1x1x4x224xf32>
    %28 = vector.shape_cast %27 : vector<1x1x4x224xf32> to vector<4x224xf32>
    %29 = vector.shape_cast %23 : vector<4x224xf32> to vector<1x1x4x224xf32>
    tpu.vector_store %arg6[%c0_14, %c0_15, %c0_16, %c0_17], %29 {strides = array<i32>} : memref<1x2x4x224xf32, #tpu.memory_space<vmem>>, vector<1x1x4x224xf32>,
    %c0_18 = arith.constant 0 : index
    %c1 = arith.constant 1 : index
    %c0_19 = arith.constant 0 : index
    %c0_20 = arith.constant 0 : index
    %30 = vector.load %arg6[%c0_18, %c1, %c0_19, %c0_20] : memref<1x2x4x224xf32, #tpu.memory_space<vmem>>, vector<1x1x4x224xf32>
    %31 = vector.shape_cast %30 : vector<1x1x4x224xf32> to vector<4x224xf32>
    %32 = vector.shape_cast %26 : vector<4x224xf32> to vector<1x1x4x224xf32>
    tpu.vector_store %arg6[%c0_18, %c1, %c0_19, %c0_20], %32 {strides = array<i32>} : memref<1x2x4x224xf32, #tpu.memory_space<vmem>>, vector<1x1x4x224xf32>,
    %cst_21 = arith.constant dense<0.000000e+00> : vector<224xf32>
    %33 = vector.multi_reduction <add>, %23, %cst_21 [0] : vector<4x224xf32> to vector<224xf32>
    %34 = vector.shape_cast %33 : vector<224xf32> to vector<1x224xf32>
    %cst_22 = arith.constant dense<0.000000e+00> : vector<224xf32>
    %35 = vector.multi_reduction <add>, %26, %cst_22 [0] : vector<4x224xf32> to vector<224xf32>
    %36 = vector.shape_cast %35 : vector<224xf32> to vector<1x224xf32>
    %37 = arith.addf %34, %36 : vector<1x224xf32>
    %38 = arith.mulf %23, %23 : vector<4x224xf32>
    %cst_23 = arith.constant dense<0.000000e+00> : vector<224xf32>
    %39 = vector.multi_reduction <add>, %38, %cst_23 [0] : vector<4x224xf32> to vector<224xf32>
    %40 = vector.shape_cast %39 : vector<224xf32> to vector<1x224xf32>
    %41 = arith.mulf %26, %26 : vector<4x224xf32>
    %cst_24 = arith.constant dense<0.000000e+00> : vector<224xf32>
    %42 = vector.multi_reduction <add>, %41, %cst_24 [0] : vector<4x224xf32> to vector<224xf32>
    %43 = vector.shape_cast %42 : vector<224xf32> to vector<1x224xf32>
    %44 = arith.addf %40, %43 : vector<1x224xf32>
    %45 = tpu.concatenate %37, %44 in 0 : vector<1x224xf32>, vector<1x224xf32> -> vector<2x224xf32>
    %c0_25 = arith.constant 0 : index
    %c0_26 = arith.constant 0 : index
    %c0_27 = arith.constant 0 : index
    %46 = vector.load %arg7[%c0_25, %c0_26, %c0_27] : memref<1x2x224xf32, #tpu.memory_space<vmem>>, vector<1x2x224xf32>
    %47 = vector.shape_cast %46 : vector<1x2x224xf32> to vector<2x224xf32>
    %48 = vector.shape_cast %45 : vector<2x224xf32> to vector<1x2x224xf32>
    tpu.vector_store %arg7[%c0_25, %c0_26, %c0_27], %48 {strides = array<i32>} : memref<1x2x224xf32, #tpu.memory_space<vmem>>, vector<1x2x224xf32>,
    return
  }
  func.func @transform_0(%arg0: i32) -> (i32, i32, i32) {
    %c0_i32 = arith.constant 0 : i32
    %c0_i32_0 = arith.constant 0 : i32
    %c0_i32_1 = arith.constant 0 : i32
    return %arg0, %c0_i32, %c0_i32_0 : i32, i32, i32
  }
  func.func @transform_1(%arg0: i32) -> (i32, i32) {
    %c0_i32 = arith.constant 0 : i32
    %c0_i32_0 = arith.constant 0 : i32
    %c0_i32_1 = arith.constant 0 : i32
    return %c0_i32, %c0_i32_0 : i32, i32
  }
  func.func @transform_2(%arg0: i32) -> (i32, i32) {
    %c0_i32 = arith.constant 0 : i32
    %c0_i32_0 = arith.constant 0 : i32
    %c0_i32_1 = arith.constant 0 : i32
    return %c0_i32, %c0_i32_0 : i32, i32
  }
  func.func @transform_3(%arg0: i32) -> (i32, i32) {
    %c0_i32 = arith.constant 0 : i32
    %c0_i32_0 = arith.constant 0 : i32
    %c0_i32_1 = arith.constant 0 : i32
    return %c0_i32, %c0_i32_0 : i32, i32
  }
  func.func @transform_4(%arg0: i32) -> (i32, i32) {
    %c0_i32 = arith.constant 0 : i32
    %c0_i32_0 = arith.constant 0 : i32
    %c0_i32_1 = arith.constant 0 : i32
    return %c0_i32, %c0_i32_0 : i32, i32
  }
  func.func @transform_5(%arg0: i32) -> (i32, i32, i32, i32) {
    %c0_i32 = arith.constant 0 : i32
    %c0_i32_0 = arith.constant 0 : i32
    %c0_i32_1 = arith.constant 0 : i32
    %c0_i32_2 = arith.constant 0 : i32
    return %arg0, %c0_i32, %c0_i32_0, %c0_i32_1 : i32, i32, i32, i32
  }
  func.func @transform_6(%arg0: i32) -> (i32, i32, i32) {
    %c0_i32 = arith.constant 0 : i32
    %c0_i32_0 = arith.constant 0 : i32
    %c0_i32_1 = arith.constant 0 : i32
    return %arg0, %c0_i32, %c0_i32_0 : i32, i32, i32
  }
}

module attributes {stable_mosaic.version = 11 : i64} {
  func.func @_gen_block_kernel(%arg0: i32, %arg1: memref<1x7x224xf32, #tpu.memory_space<vmem>>, %arg2: memref<1x224xf32, #tpu.memory_space<vmem>>, %arg3: memref<1x224xf32, #tpu.memory_space<vmem>>, %arg4: memref<224x720xbf16, #tpu.memory_space<vmem>>, %arg5: memref<1x240xf32, #tpu.memory_space<vmem>>, %arg6: memref<1x2x8x240xf32, #tpu.memory_space<vmem>>, %arg7: memref<1x2x240xf32, #tpu.memory_space<vmem>>) attributes {dimension_semantics = [#tpu.dimension_semantics<parallel>], iteration_bounds = array<i64: 2>, scalar_prefetch = 0 : i64, scratch_operands = 0 : i64, tpu.core_type = #tpu.core_type<tc>, window_params = [{transform_indices = @transform_0, window_bounds = array<i64: 1, 7, 224>}, {pipeline_mode = #tpu.pipeline_mode<synchronous>, transform_indices = @transform_1, window_bounds = array<i64: 1, 224>}, {pipeline_mode = #tpu.pipeline_mode<synchronous>, transform_indices = @transform_2, window_bounds = array<i64: 1, 224>}, {pipeline_mode = #tpu.pipeline_mode<synchronous>, transform_indices = @transform_3, window_bounds = array<i64: 224, 720>}, {pipeline_mode = #tpu.pipeline_mode<synchronous>, transform_indices = @transform_4, window_bounds = array<i64: 1, 240>}, {transform_indices = @transform_5, window_bounds = array<i64: 1, 2, 8, 240>}, {transform_indices = @transform_6, window_bounds = array<i64: 1, 2, 240>}]} {
    %c0 = arith.constant 0 : index
    %c0_0 = arith.constant 0 : index
    %c0_1 = arith.constant 0 : index
    %0 = vector.load %arg1[%c0, %c0_0, %c0_1] : memref<1x7x224xf32, #tpu.memory_space<vmem>>, vector<1x7x224xf32>
    %1 = vector.shape_cast %0 : vector<1x7x224xf32> to vector<7x224xf32>
    %c0_2 = arith.constant 0 : index
    %c0_3 = arith.constant 0 : index
    %2 = vector.load %arg2[%c0_2, %c0_3] : memref<1x224xf32, #tpu.memory_space<vmem>>, vector<1x224xf32>
    %3 = vector.broadcast %2 : vector<1x224xf32> to vector<7x224xf32>
    %4 = arith.mulf %1, %3 : vector<7x224xf32>
    %c0_4 = arith.constant 0 : index
    %c0_5 = arith.constant 0 : index
    %5 = vector.load %arg3[%c0_4, %c0_5] : memref<1x224xf32, #tpu.memory_space<vmem>>, vector<1x224xf32>
    %6 = vector.broadcast %5 : vector<1x224xf32> to vector<7x224xf32>
    %7 = arith.addf %4, %6 : vector<7x224xf32>
    %cst = arith.constant 0.000000e+00 : f32
    %8 = vector.broadcast %cst : f32 to vector<7x224xf32>
    %9 = arith.maximumf %7, %8 : vector<7x224xf32>
    %10 = arith.truncf %9 : vector<7x224xf32> to vector<7x224xbf16>
    %c0_6 = arith.constant 0 : index
    %c0_7 = arith.constant 0 : index
    %11 = vector.load %arg4[%c0_6, %c0_7] : memref<224x720xbf16, #tpu.memory_space<vmem>>, vector<224x720xbf16>
    %cst_8 = arith.constant dense<0.000000e+00> : vector<7x720xf32>
    %12 = tpu.matmul %10, %11, %cst_8 {dimension_numbers = #tpu.dot_dimension_numbers<[1], [0], [0], [1], [0, 0, 1, 1], [], []>} : vector<7x224xbf16>, vector<224x720xbf16>, vector<7x720xf32> -> vector<7x720xf32>
    %13 = vector.extract_strided_slice %12 {offsets = [0, 0], sizes = [7, 240], strides = [1, 1]} : vector<7x720xf32> to vector<7x240xf32>
    %14 = vector.extract_strided_slice %12 {offsets = [0, 240], sizes = [7, 240], strides = [1, 1]} : vector<7x720xf32> to vector<7x240xf32>
    %15 = vector.extract_strided_slice %12 {offsets = [0, 480], sizes = [7, 240], strides = [1, 1]} : vector<7x720xf32> to vector<7x240xf32>
    %cst_9 = arith.constant 0.000000e+00 : f32
    %16 = vector.broadcast %cst_9 : f32 to vector<1x240xf32>
    %17 = tpu.concatenate %13, %16 in 0 : vector<7x240xf32>, vector<1x240xf32> -> vector<8x240xf32>
    %18 = tpu.concatenate %16, %15 in 0 : vector<1x240xf32>, vector<7x240xf32> -> vector<8x240xf32>
    %19 = arith.addf %17, %18 : vector<8x240xf32>
    %20 = tpu.concatenate %14, %16 in 0 : vector<7x240xf32>, vector<1x240xf32> -> vector<8x240xf32>
    %c0_10 = arith.constant 0 : index
    %c0_11 = arith.constant 0 : index
    %21 = vector.load %arg5[%c0_10, %c0_11] : memref<1x240xf32, #tpu.memory_space<vmem>>, vector<1x240xf32>
    %22 = vector.broadcast %21 : vector<1x240xf32> to vector<8x240xf32>
    %23 = arith.addf %19, %22 : vector<8x240xf32>
    %c0_12 = arith.constant 0 : index
    %c0_13 = arith.constant 0 : index
    %24 = vector.load %arg5[%c0_12, %c0_13] : memref<1x240xf32, #tpu.memory_space<vmem>>, vector<1x240xf32>
    %25 = vector.broadcast %24 : vector<1x240xf32> to vector<8x240xf32>
    %26 = arith.addf %20, %25 : vector<8x240xf32>
    %c0_14 = arith.constant 0 : index
    %c0_15 = arith.constant 0 : index
    %c0_16 = arith.constant 0 : index
    %c0_17 = arith.constant 0 : index
    %27 = vector.load %arg6[%c0_14, %c0_15, %c0_16, %c0_17] : memref<1x2x8x240xf32, #tpu.memory_space<vmem>>, vector<1x1x8x240xf32>
    %28 = vector.shape_cast %27 : vector<1x1x8x240xf32> to vector<8x240xf32>
    %29 = vector.shape_cast %23 : vector<8x240xf32> to vector<1x1x8x240xf32>
    tpu.vector_store %arg6[%c0_14, %c0_15, %c0_16, %c0_17], %29 {strides = array<i32>} : memref<1x2x8x240xf32, #tpu.memory_space<vmem>>, vector<1x1x8x240xf32>,
    %c0_18 = arith.constant 0 : index
    %c1 = arith.constant 1 : index
    %c0_19 = arith.constant 0 : index
    %c0_20 = arith.constant 0 : index
    %30 = vector.load %arg6[%c0_18, %c1, %c0_19, %c0_20] : memref<1x2x8x240xf32, #tpu.memory_space<vmem>>, vector<1x1x8x240xf32>
    %31 = vector.shape_cast %30 : vector<1x1x8x240xf32> to vector<8x240xf32>
    %32 = vector.shape_cast %26 : vector<8x240xf32> to vector<1x1x8x240xf32>
    tpu.vector_store %arg6[%c0_18, %c1, %c0_19, %c0_20], %32 {strides = array<i32>} : memref<1x2x8x240xf32, #tpu.memory_space<vmem>>, vector<1x1x8x240xf32>,
    %cst_21 = arith.constant dense<0.000000e+00> : vector<240xf32>
    %33 = vector.multi_reduction <add>, %23, %cst_21 [0] : vector<8x240xf32> to vector<240xf32>
    %34 = vector.shape_cast %33 : vector<240xf32> to vector<1x240xf32>
    %cst_22 = arith.constant dense<0.000000e+00> : vector<240xf32>
    %35 = vector.multi_reduction <add>, %26, %cst_22 [0] : vector<8x240xf32> to vector<240xf32>
    %36 = vector.shape_cast %35 : vector<240xf32> to vector<1x240xf32>
    %37 = arith.addf %34, %36 : vector<1x240xf32>
    %38 = arith.mulf %23, %23 : vector<8x240xf32>
    %cst_23 = arith.constant dense<0.000000e+00> : vector<240xf32>
    %39 = vector.multi_reduction <add>, %38, %cst_23 [0] : vector<8x240xf32> to vector<240xf32>
    %40 = vector.shape_cast %39 : vector<240xf32> to vector<1x240xf32>
    %41 = arith.mulf %26, %26 : vector<8x240xf32>
    %cst_24 = arith.constant dense<0.000000e+00> : vector<240xf32>
    %42 = vector.multi_reduction <add>, %41, %cst_24 [0] : vector<8x240xf32> to vector<240xf32>
    %43 = vector.shape_cast %42 : vector<240xf32> to vector<1x240xf32>
    %44 = arith.addf %40, %43 : vector<1x240xf32>
    %45 = tpu.concatenate %37, %44 in 0 : vector<1x240xf32>, vector<1x240xf32> -> vector<2x240xf32>
    %c0_25 = arith.constant 0 : index
    %c0_26 = arith.constant 0 : index
    %c0_27 = arith.constant 0 : index
    %46 = vector.load %arg7[%c0_25, %c0_26, %c0_27] : memref<1x2x240xf32, #tpu.memory_space<vmem>>, vector<1x2x240xf32>
    %47 = vector.shape_cast %46 : vector<1x2x240xf32> to vector<2x240xf32>
    %48 = vector.shape_cast %45 : vector<2x240xf32> to vector<1x2x240xf32>
    tpu.vector_store %arg7[%c0_25, %c0_26, %c0_27], %48 {strides = array<i32>} : memref<1x2x240xf32, #tpu.memory_space<vmem>>, vector<1x2x240xf32>,
    return
  }
  func.func @transform_0(%arg0: i32) -> (i32, i32, i32) {
    %c0_i32 = arith.constant 0 : i32
    %c0_i32_0 = arith.constant 0 : i32
    %c0_i32_1 = arith.constant 0 : i32
    return %arg0, %c0_i32, %c0_i32_0 : i32, i32, i32
  }
  func.func @transform_1(%arg0: i32) -> (i32, i32) {
    %c0_i32 = arith.constant 0 : i32
    %c0_i32_0 = arith.constant 0 : i32
    %c0_i32_1 = arith.constant 0 : i32
    return %c0_i32, %c0_i32_0 : i32, i32
  }
  func.func @transform_2(%arg0: i32) -> (i32, i32) {
    %c0_i32 = arith.constant 0 : i32
    %c0_i32_0 = arith.constant 0 : i32
    %c0_i32_1 = arith.constant 0 : i32
    return %c0_i32, %c0_i32_0 : i32, i32
  }
  func.func @transform_3(%arg0: i32) -> (i32, i32) {
    %c0_i32 = arith.constant 0 : i32
    %c0_i32_0 = arith.constant 0 : i32
    %c0_i32_1 = arith.constant 0 : i32
    return %c0_i32, %c0_i32_0 : i32, i32
  }
  func.func @transform_4(%arg0: i32) -> (i32, i32) {
    %c0_i32 = arith.constant 0 : i32
    %c0_i32_0 = arith.constant 0 : i32
    %c0_i32_1 = arith.constant 0 : i32
    return %c0_i32, %c0_i32_0 : i32, i32
  }
  func.func @transform_5(%arg0: i32) -> (i32, i32, i32, i32) {
    %c0_i32 = arith.constant 0 : i32
    %c0_i32_0 = arith.constant 0 : i32
    %c0_i32_1 = arith.constant 0 : i32
    %c0_i32_2 = arith.constant 0 : i32
    return %arg0, %c0_i32, %c0_i32_0, %c0_i32_1 : i32, i32, i32, i32
  }
  func.func @transform_6(%arg0: i32) -> (i32, i32, i32) {
    %c0_i32 = arith.constant 0 : i32
    %c0_i32_0 = arith.constant 0 : i32
    %c0_i32_1 = arith.constant 0 : i32
    return %arg0, %c0_i32, %c0_i32_0 : i32, i32, i32
  }
}

module attributes {stable_mosaic.version = 11 : i64} {
  func.func @_gen_block_kernel(%arg0: i32, %arg1: memref<1x15x240xf32, #tpu.memory_space<vmem>>, %arg2: memref<1x240xf32, #tpu.memory_space<vmem>>, %arg3: memref<1x240xf32, #tpu.memory_space<vmem>>, %arg4: memref<240x744xbf16, #tpu.memory_space<vmem>>, %arg5: memref<1x248xf32, #tpu.memory_space<vmem>>, %arg6: memref<1x2x16x248xf32, #tpu.memory_space<vmem>>, %arg7: memref<1x2x248xf32, #tpu.memory_space<vmem>>) attributes {dimension_semantics = [#tpu.dimension_semantics<parallel>], iteration_bounds = array<i64: 2>, scalar_prefetch = 0 : i64, scratch_operands = 0 : i64, tpu.core_type = #tpu.core_type<tc>, window_params = [{transform_indices = @transform_0, window_bounds = array<i64: 1, 15, 240>}, {pipeline_mode = #tpu.pipeline_mode<synchronous>, transform_indices = @transform_1, window_bounds = array<i64: 1, 240>}, {pipeline_mode = #tpu.pipeline_mode<synchronous>, transform_indices = @transform_2, window_bounds = array<i64: 1, 240>}, {pipeline_mode = #tpu.pipeline_mode<synchronous>, transform_indices = @transform_3, window_bounds = array<i64: 240, 744>}, {pipeline_mode = #tpu.pipeline_mode<synchronous>, transform_indices = @transform_4, window_bounds = array<i64: 1, 248>}, {transform_indices = @transform_5, window_bounds = array<i64: 1, 2, 16, 248>}, {transform_indices = @transform_6, window_bounds = array<i64: 1, 2, 248>}]} {
    %c0 = arith.constant 0 : index
    %c0_0 = arith.constant 0 : index
    %c0_1 = arith.constant 0 : index
    %0 = vector.load %arg1[%c0, %c0_0, %c0_1] : memref<1x15x240xf32, #tpu.memory_space<vmem>>, vector<1x15x240xf32>
    %1 = vector.shape_cast %0 : vector<1x15x240xf32> to vector<15x240xf32>
    %c0_2 = arith.constant 0 : index
    %c0_3 = arith.constant 0 : index
    %2 = vector.load %arg2[%c0_2, %c0_3] : memref<1x240xf32, #tpu.memory_space<vmem>>, vector<1x240xf32>
    %3 = vector.broadcast %2 : vector<1x240xf32> to vector<15x240xf32>
    %4 = arith.mulf %1, %3 : vector<15x240xf32>
    %c0_4 = arith.constant 0 : index
    %c0_5 = arith.constant 0 : index
    %5 = vector.load %arg3[%c0_4, %c0_5] : memref<1x240xf32, #tpu.memory_space<vmem>>, vector<1x240xf32>
    %6 = vector.broadcast %5 : vector<1x240xf32> to vector<15x240xf32>
    %7 = arith.addf %4, %6 : vector<15x240xf32>
    %cst = arith.constant 0.000000e+00 : f32
    %8 = vector.broadcast %cst : f32 to vector<15x240xf32>
    %9 = arith.maximumf %7, %8 : vector<15x240xf32>
    %10 = arith.truncf %9 : vector<15x240xf32> to vector<15x240xbf16>
    %c0_6 = arith.constant 0 : index
    %c0_7 = arith.constant 0 : index
    %11 = vector.load %arg4[%c0_6, %c0_7] : memref<240x744xbf16, #tpu.memory_space<vmem>>, vector<240x744xbf16>
    %cst_8 = arith.constant dense<0.000000e+00> : vector<15x744xf32>
    %12 = tpu.matmul %10, %11, %cst_8 {dimension_numbers = #tpu.dot_dimension_numbers<[1], [0], [0], [1], [0, 0, 1, 1], [], []>} : vector<15x240xbf16>, vector<240x744xbf16>, vector<15x744xf32> -> vector<15x744xf32>
    %13 = vector.extract_strided_slice %12 {offsets = [0, 0], sizes = [15, 248], strides = [1, 1]} : vector<15x744xf32> to vector<15x248xf32>
    %14 = vector.extract_strided_slice %12 {offsets = [0, 248], sizes = [15, 248], strides = [1, 1]} : vector<15x744xf32> to vector<15x248xf32>
    %15 = vector.extract_strided_slice %12 {offsets = [0, 496], sizes = [15, 248], strides = [1, 1]} : vector<15x744xf32> to vector<15x248xf32>
    %cst_9 = arith.constant 0.000000e+00 : f32
    %16 = vector.broadcast %cst_9 : f32 to vector<1x248xf32>
    %17 = tpu.concatenate %13, %16 in 0 : vector<15x248xf32>, vector<1x248xf32> -> vector<16x248xf32>
    %18 = tpu.concatenate %16, %15 in 0 : vector<1x248xf32>, vector<15x248xf32> -> vector<16x248xf32>
    %19 = arith.addf %17, %18 : vector<16x248xf32>
    %20 = tpu.concatenate %14, %16 in 0 : vector<15x248xf32>, vector<1x248xf32> -> vector<16x248xf32>
    %c0_10 = arith.constant 0 : index
    %c0_11 = arith.constant 0 : index
    %21 = vector.load %arg5[%c0_10, %c0_11] : memref<1x248xf32, #tpu.memory_space<vmem>>, vector<1x248xf32>
    %22 = vector.broadcast %21 : vector<1x248xf32> to vector<16x248xf32>
    %23 = arith.addf %19, %22 : vector<16x248xf32>
    %c0_12 = arith.constant 0 : index
    %c0_13 = arith.constant 0 : index
    %24 = vector.load %arg5[%c0_12, %c0_13] : memref<1x248xf32, #tpu.memory_space<vmem>>, vector<1x248xf32>
    %25 = vector.broadcast %24 : vector<1x248xf32> to vector<16x248xf32>
    %26 = arith.addf %20, %25 : vector<16x248xf32>
    %c0_14 = arith.constant 0 : index
    %c0_15 = arith.constant 0 : index
    %c0_16 = arith.constant 0 : index
    %c0_17 = arith.constant 0 : index
    %27 = vector.load %arg6[%c0_14, %c0_15, %c0_16, %c0_17] : memref<1x2x16x248xf32, #tpu.memory_space<vmem>>, vector<1x1x16x248xf32>
    %28 = vector.shape_cast %27 : vector<1x1x16x248xf32> to vector<16x248xf32>
    %29 = vector.shape_cast %23 : vector<16x248xf32> to vector<1x1x16x248xf32>
    tpu.vector_store %arg6[%c0_14, %c0_15, %c0_16, %c0_17], %29 {strides = array<i32>} : memref<1x2x16x248xf32, #tpu.memory_space<vmem>>, vector<1x1x16x248xf32>,
    %c0_18 = arith.constant 0 : index
    %c1 = arith.constant 1 : index
    %c0_19 = arith.constant 0 : index
    %c0_20 = arith.constant 0 : index
    %30 = vector.load %arg6[%c0_18, %c1, %c0_19, %c0_20] : memref<1x2x16x248xf32, #tpu.memory_space<vmem>>, vector<1x1x16x248xf32>
    %31 = vector.shape_cast %30 : vector<1x1x16x248xf32> to vector<16x248xf32>
    %32 = vector.shape_cast %26 : vector<16x248xf32> to vector<1x1x16x248xf32>
    tpu.vector_store %arg6[%c0_18, %c1, %c0_19, %c0_20], %32 {strides = array<i32>} : memref<1x2x16x248xf32, #tpu.memory_space<vmem>>, vector<1x1x16x248xf32>,
    %cst_21 = arith.constant dense<0.000000e+00> : vector<248xf32>
    %33 = vector.multi_reduction <add>, %23, %cst_21 [0] : vector<16x248xf32> to vector<248xf32>
    %34 = vector.shape_cast %33 : vector<248xf32> to vector<1x248xf32>
    %cst_22 = arith.constant dense<0.000000e+00> : vector<248xf32>
    %35 = vector.multi_reduction <add>, %26, %cst_22 [0] : vector<16x248xf32> to vector<248xf32>
    %36 = vector.shape_cast %35 : vector<248xf32> to vector<1x248xf32>
    %37 = arith.addf %34, %36 : vector<1x248xf32>
    %38 = arith.mulf %23, %23 : vector<16x248xf32>
    %cst_23 = arith.constant dense<0.000000e+00> : vector<248xf32>
    %39 = vector.multi_reduction <add>, %38, %cst_23 [0] : vector<16x248xf32> to vector<248xf32>
    %40 = vector.shape_cast %39 : vector<248xf32> to vector<1x248xf32>
    %41 = arith.mulf %26, %26 : vector<16x248xf32>
    %cst_24 = arith.constant dense<0.000000e+00> : vector<248xf32>
    %42 = vector.multi_reduction <add>, %41, %cst_24 [0] : vector<16x248xf32> to vector<248xf32>
    %43 = vector.shape_cast %42 : vector<248xf32> to vector<1x248xf32>
    %44 = arith.addf %40, %43 : vector<1x248xf32>
    %45 = tpu.concatenate %37, %44 in 0 : vector<1x248xf32>, vector<1x248xf32> -> vector<2x248xf32>
    %c0_25 = arith.constant 0 : index
    %c0_26 = arith.constant 0 : index
    %c0_27 = arith.constant 0 : index
    %46 = vector.load %arg7[%c0_25, %c0_26, %c0_27] : memref<1x2x248xf32, #tpu.memory_space<vmem>>, vector<1x2x248xf32>
    %47 = vector.shape_cast %46 : vector<1x2x248xf32> to vector<2x248xf32>
    %48 = vector.shape_cast %45 : vector<2x248xf32> to vector<1x2x248xf32>
    tpu.vector_store %arg7[%c0_25, %c0_26, %c0_27], %48 {strides = array<i32>} : memref<1x2x248xf32, #tpu.memory_space<vmem>>, vector<1x2x248xf32>,
    return
  }
  func.func @transform_0(%arg0: i32) -> (i32, i32, i32) {
    %c0_i32 = arith.constant 0 : i32
    %c0_i32_0 = arith.constant 0 : i32
    %c0_i32_1 = arith.constant 0 : i32
    return %arg0, %c0_i32, %c0_i32_0 : i32, i32, i32
  }
  func.func @transform_1(%arg0: i32) -> (i32, i32) {
    %c0_i32 = arith.constant 0 : i32
    %c0_i32_0 = arith.constant 0 : i32
    %c0_i32_1 = arith.constant 0 : i32
    return %c0_i32, %c0_i32_0 : i32, i32
  }
  func.func @transform_2(%arg0: i32) -> (i32, i32) {
    %c0_i32 = arith.constant 0 : i32
    %c0_i32_0 = arith.constant 0 : i32
    %c0_i32_1 = arith.constant 0 : i32
    return %c0_i32, %c0_i32_0 : i32, i32
  }
  func.func @transform_3(%arg0: i32) -> (i32, i32) {
    %c0_i32 = arith.constant 0 : i32
    %c0_i32_0 = arith.constant 0 : i32
    %c0_i32_1 = arith.constant 0 : i32
    return %c0_i32, %c0_i32_0 : i32, i32
  }
  func.func @transform_4(%arg0: i32) -> (i32, i32) {
    %c0_i32 = arith.constant 0 : i32
    %c0_i32_0 = arith.constant 0 : i32
    %c0_i32_1 = arith.constant 0 : i32
    return %c0_i32, %c0_i32_0 : i32, i32
  }
  func.func @transform_5(%arg0: i32) -> (i32, i32, i32, i32) {
    %c0_i32 = arith.constant 0 : i32
    %c0_i32_0 = arith.constant 0 : i32
    %c0_i32_1 = arith.constant 0 : i32
    %c0_i32_2 = arith.constant 0 : i32
    return %arg0, %c0_i32, %c0_i32_0, %c0_i32_1 : i32, i32, i32, i32
  }
  func.func @transform_6(%arg0: i32) -> (i32, i32, i32) {
    %c0_i32 = arith.constant 0 : i32
    %c0_i32_0 = arith.constant 0 : i32
    %c0_i32_1 = arith.constant 0 : i32
    return %arg0, %c0_i32, %c0_i32_0 : i32, i32, i32
  }
}

module attributes {stable_mosaic.version = 11 : i64} {
  func.func @_gen_block_kernel(%arg0: i32, %arg1: memref<1x31x248xf32, #tpu.memory_space<vmem>>, %arg2: memref<1x248xf32, #tpu.memory_space<vmem>>, %arg3: memref<1x248xf32, #tpu.memory_space<vmem>>, %arg4: memref<248x768xbf16, #tpu.memory_space<vmem>>, %arg5: memref<1x192xf32, #tpu.memory_space<vmem>>, %arg6: memref<1x2x32x192xf32, #tpu.memory_space<vmem>>, %arg7: memref<1x2x192xf32, #tpu.memory_space<vmem>>) attributes {dimension_semantics = [#tpu.dimension_semantics<parallel>], iteration_bounds = array<i64: 2>, scalar_prefetch = 0 : i64, scratch_operands = 0 : i64, tpu.core_type = #tpu.core_type<tc>, window_params = [{transform_indices = @transform_0, window_bounds = array<i64: 1, 31, 248>}, {pipeline_mode = #tpu.pipeline_mode<synchronous>, transform_indices = @transform_1, window_bounds = array<i64: 1, 248>}, {pipeline_mode = #tpu.pipeline_mode<synchronous>, transform_indices = @transform_2, window_bounds = array<i64: 1, 248>}, {pipeline_mode = #tpu.pipeline_mode<synchronous>, transform_indices = @transform_3, window_bounds = array<i64: 248, 768>}, {pipeline_mode = #tpu.pipeline_mode<synchronous>, transform_indices = @transform_4, window_bounds = array<i64: 1, 192>}, {transform_indices = @transform_5, window_bounds = array<i64: 1, 2, 32, 192>}, {transform_indices = @transform_6, window_bounds = array<i64: 1, 2, 192>}]} {
    %c0 = arith.constant 0 : index
    %c0_0 = arith.constant 0 : index
    %c0_1 = arith.constant 0 : index
    %0 = vector.load %arg1[%c0, %c0_0, %c0_1] : memref<1x31x248xf32, #tpu.memory_space<vmem>>, vector<1x31x248xf32>
    %1 = vector.shape_cast %0 : vector<1x31x248xf32> to vector<31x248xf32>
    %c0_2 = arith.constant 0 : index
    %c0_3 = arith.constant 0 : index
    %2 = vector.load %arg2[%c0_2, %c0_3] : memref<1x248xf32, #tpu.memory_space<vmem>>, vector<1x248xf32>
    %3 = vector.broadcast %2 : vector<1x248xf32> to vector<31x248xf32>
    %4 = arith.mulf %1, %3 : vector<31x248xf32>
    %c0_4 = arith.constant 0 : index
    %c0_5 = arith.constant 0 : index
    %5 = vector.load %arg3[%c0_4, %c0_5] : memref<1x248xf32, #tpu.memory_space<vmem>>, vector<1x248xf32>
    %6 = vector.broadcast %5 : vector<1x248xf32> to vector<31x248xf32>
    %7 = arith.addf %4, %6 : vector<31x248xf32>
    %cst = arith.constant 0.000000e+00 : f32
    %8 = vector.broadcast %cst : f32 to vector<31x248xf32>
    %9 = arith.maximumf %7, %8 : vector<31x248xf32>
    %10 = arith.truncf %9 : vector<31x248xf32> to vector<31x248xbf16>
    %c0_6 = arith.constant 0 : index
    %c0_7 = arith.constant 0 : index
    %11 = vector.load %arg4[%c0_6, %c0_7] : memref<248x768xbf16, #tpu.memory_space<vmem>>, vector<248x768xbf16>
    %cst_8 = arith.constant dense<0.000000e+00> : vector<31x768xf32>
    %12 = tpu.matmul %10, %11, %cst_8 {dimension_numbers = #tpu.dot_dimension_numbers<[1], [0], [0], [1], [0, 0, 1, 1], [], []>} : vector<31x248xbf16>, vector<248x768xbf16>, vector<31x768xf32> -> vector<31x768xf32>
    %13 = vector.extract_strided_slice %12 {offsets = [0, 0], sizes = [31, 192], strides = [1, 1]} : vector<31x768xf32> to vector<31x192xf32>
    %14 = vector.extract_strided_slice %12 {offsets = [0, 192], sizes = [31, 192], strides = [1, 1]} : vector<31x768xf32> to vector<31x192xf32>
    %15 = vector.extract_strided_slice %12 {offsets = [0, 384], sizes = [31, 192], strides = [1, 1]} : vector<31x768xf32> to vector<31x192xf32>
    %16 = vector.extract_strided_slice %12 {offsets = [0, 576], sizes = [31, 192], strides = [1, 1]} : vector<31x768xf32> to vector<31x192xf32>
    %cst_9 = arith.constant 0.000000e+00 : f32
    %17 = vector.broadcast %cst_9 : f32 to vector<1x192xf32>
    %18 = tpu.concatenate %13, %17 in 0 : vector<31x192xf32>, vector<1x192xf32> -> vector<32x192xf32>
    %19 = tpu.concatenate %17, %15 in 0 : vector<1x192xf32>, vector<31x192xf32> -> vector<32x192xf32>
    %20 = arith.addf %18, %19 : vector<32x192xf32>
    %21 = tpu.concatenate %14, %17 in 0 : vector<31x192xf32>, vector<1x192xf32> -> vector<32x192xf32>
    %22 = tpu.concatenate %17, %16 in 0 : vector<1x192xf32>, vector<31x192xf32> -> vector<32x192xf32>
    %23 = arith.addf %21, %22 : vector<32x192xf32>
    %c0_10 = arith.constant 0 : index
    %c0_11 = arith.constant 0 : index
    %24 = vector.load %arg5[%c0_10, %c0_11] : memref<1x192xf32, #tpu.memory_space<vmem>>, vector<1x192xf32>
    %25 = vector.broadcast %24 : vector<1x192xf32> to vector<32x192xf32>
    %26 = arith.addf %20, %25 : vector<32x192xf32>
    %c0_12 = arith.constant 0 : index
    %c0_13 = arith.constant 0 : index
    %27 = vector.load %arg5[%c0_12, %c0_13] : memref<1x192xf32, #tpu.memory_space<vmem>>, vector<1x192xf32>
    %28 = vector.broadcast %27 : vector<1x192xf32> to vector<32x192xf32>
    %29 = arith.addf %23, %28 : vector<32x192xf32>
    %30 = math.tanh %26 : vector<32x192xf32>
    %31 = math.tanh %29 : vector<32x192xf32>
    %c0_14 = arith.constant 0 : index
    %c0_15 = arith.constant 0 : index
    %c0_16 = arith.constant 0 : index
    %c0_17 = arith.constant 0 : index
    %32 = vector.load %arg6[%c0_14, %c0_15, %c0_16, %c0_17] : memref<1x2x32x192xf32, #tpu.memory_space<vmem>>, vector<1x1x32x192xf32>
    %33 = vector.shape_cast %32 : vector<1x1x32x192xf32> to vector<32x192xf32>
    %34 = vector.shape_cast %30 : vector<32x192xf32> to vector<1x1x32x192xf32>
    tpu.vector_store %arg6[%c0_14, %c0_15, %c0_16, %c0_17], %34 {strides = array<i32>} : memref<1x2x32x192xf32, #tpu.memory_space<vmem>>, vector<1x1x32x192xf32>,
    %c0_18 = arith.constant 0 : index
    %c1 = arith.constant 1 : index
    %c0_19 = arith.constant 0 : index
    %c0_20 = arith.constant 0 : index
    %35 = vector.load %arg6[%c0_18, %c1, %c0_19, %c0_20] : memref<1x2x32x192xf32, #tpu.memory_space<vmem>>, vector<1x1x32x192xf32>
    %36 = vector.shape_cast %35 : vector<1x1x32x192xf32> to vector<32x192xf32>
    %37 = vector.shape_cast %31 : vector<32x192xf32> to vector<1x1x32x192xf32>
    tpu.vector_store %arg6[%c0_18, %c1, %c0_19, %c0_20], %37 {strides = array<i32>} : memref<1x2x32x192xf32, #tpu.memory_space<vmem>>, vector<1x1x32x192xf32>,
    %cst_21 = arith.constant dense<0.000000e+00> : vector<192xf32>
    %38 = vector.multi_reduction <add>, %30, %cst_21 [0] : vector<32x192xf32> to vector<192xf32>
    %39 = vector.shape_cast %38 : vector<192xf32> to vector<1x192xf32>
    %cst_22 = arith.constant dense<0.000000e+00> : vector<192xf32>
    %40 = vector.multi_reduction <add>, %31, %cst_22 [0] : vector<32x192xf32> to vector<192xf32>
    %41 = vector.shape_cast %40 : vector<192xf32> to vector<1x192xf32>
    %42 = arith.addf %39, %41 : vector<1x192xf32>
    %43 = arith.mulf %30, %30 : vector<32x192xf32>
    %cst_23 = arith.constant dense<0.000000e+00> : vector<192xf32>
    %44 = vector.multi_reduction <add>, %43, %cst_23 [0] : vector<32x192xf32> to vector<192xf32>
    %45 = vector.shape_cast %44 : vector<192xf32> to vector<1x192xf32>
    %46 = arith.mulf %31, %31 : vector<32x192xf32>
    %cst_24 = arith.constant dense<0.000000e+00> : vector<192xf32>
    %47 = vector.multi_reduction <add>, %46, %cst_24 [0] : vector<32x192xf32> to vector<192xf32>
    %48 = vector.shape_cast %47 : vector<192xf32> to vector<1x192xf32>
    %49 = arith.addf %45, %48 : vector<1x192xf32>
    %50 = tpu.concatenate %42, %49 in 0 : vector<1x192xf32>, vector<1x192xf32> -> vector<2x192xf32>
    %c0_25 = arith.constant 0 : index
    %c0_26 = arith.constant 0 : index
    %c0_27 = arith.constant 0 : index
    %51 = vector.load %arg7[%c0_25, %c0_26, %c0_27] : memref<1x2x192xf32, #tpu.memory_space<vmem>>, vector<1x2x192xf32>
    %52 = vector.shape_cast %51 : vector<1x2x192xf32> to vector<2x192xf32>
    %53 = vector.shape_cast %50 : vector<2x192xf32> to vector<1x2x192xf32>
    tpu.vector_store %arg7[%c0_25, %c0_26, %c0_27], %53 {strides = array<i32>} : memref<1x2x192xf32, #tpu.memory_space<vmem>>, vector<1x2x192xf32>,
    return
  }
  func.func @transform_0(%arg0: i32) -> (i32, i32, i32) {
    %c0_i32 = arith.constant 0 : i32
    %c0_i32_0 = arith.constant 0 : i32
    %c0_i32_1 = arith.constant 0 : i32
    return %arg0, %c0_i32, %c0_i32_0 : i32, i32, i32
  }
  func.func @transform_1(%arg0: i32) -> (i32, i32) {
    %c0_i32 = arith.constant 0 : i32
    %c0_i32_0 = arith.constant 0 : i32
    %c0_i32_1 = arith.constant 0 : i32
    return %c0_i32, %c0_i32_0 : i32, i32
  }
  func.func @transform_2(%arg0: i32) -> (i32, i32) {
    %c0_i32 = arith.constant 0 : i32
    %c0_i32_0 = arith.constant 0 : i32
    %c0_i32_1 = arith.constant 0 : i32
    return %c0_i32, %c0_i32_0 : i32, i32
  }
  func.func @transform_3(%arg0: i32) -> (i32, i32) {
    %c0_i32 = arith.constant 0 : i32
    %c0_i32_0 = arith.constant 0 : i32
    %c0_i32_1 = arith.constant 0 : i32
    return %c0_i32, %c0_i32_0 : i32, i32
  }
  func.func @transform_4(%arg0: i32) -> (i32, i32) {
    %c0_i32 = arith.constant 0 : i32
    %c0_i32_0 = arith.constant 0 : i32
    %c0_i32_1 = arith.constant 0 : i32
    return %c0_i32, %c0_i32_0 : i32, i32
  }
  func.func @transform_5(%arg0: i32) -> (i32, i32, i32, i32) {
    %c0_i32 = arith.constant 0 : i32
    %c0_i32_0 = arith.constant 0 : i32
    %c0_i32_1 = arith.constant 0 : i32
    %c0_i32_2 = arith.constant 0 : i32
    return %arg0, %c0_i32, %c0_i32_0, %c0_i32_1 : i32, i32, i32, i32
  }
  func.func @transform_6(%arg0: i32) -> (i32, i32, i32) {
    %c0_i32 = arith.constant 0 : i32
    %c0_i32_0 = arith.constant 0 : i32
    %c0_i32_1 = arith.constant 0 : i32
    return %arg0, %c0_i32, %c0_i32_0 : i32, i32, i32
  }
}

</mosaic_0001>

<bundles_post_ra>
// kernel: tile.49
= control target key start
LH: loop header
LB: loop body
LE: loop exit
PB: predicated region body
PF: predicated region fallthrough
CT: control target
= control target key end

     0   :  { %vm8_vm0 = vcmask 523264   ;;  %s30_s8 = smov 64   ;;  %vm14_vm1 = vcmask 1048064   ;;  %s50_s0 = inlined_call_operand.vmem [shape: f32[3,64], index: 0, kind: input, shape index: {}]   ;;  %s51_s1 = inlined_call_operand.vmem [shape: f32[1,192], index: 1, kind: output, shape index: {}]  }
   0x1   :  { %v4_v0 = vld [vmem:[%s50_s0] sm:$0xf]  ;;  %s6_s0 = smov 3 }
   0x2   :  { %5 = vst [vmem:[#allocation1] sm:$0xf] %v4_v0 }
   0x9   :  { %v11_v1 = vld [vmem:[#allocation1 + $0x1] sm:$0x1]   ;;  %v7_v2 = vld [vmem:[#allocation1] ss:$2 sm:%s6_s0]  }
   0xa   :  { %12 = vrot.lane.b32.xlu0 %v11_v1, %s30_s8  ;;  %9 = vst.msk [vmem:[#allocation0] ss:$8 sm:$0x3] %vm8_vm0, %v7_v2  }
  0x11   :  { %v23_v3 = vld [vmem:[#allocation0 + $0x8] sm:$0x1] }
  0x12   :  { %28 = vst [vmem:[%s51_s1 + $0x1] sm:$0x1] %v23_v3 }
  0x7c   :  { %v13_v4 = vpop.permute.xlu0 %12  }
  0x7d   :  { %15 = vst.msk [vmem:[#allocation0] sm:$0x1] %vm14_vm1, %v13_v4  }
  0x84   :  { %v18_v5 = vld [vmem:[#allocation0] sm:$0x1] }
  0x85   :  { %21 = vst [vmem:[%s51_s1] sm:$0x1] %v18_v5 }

// kernel: tile.48
= control target key start
LH: loop header
LB: loop body
LE: loop exit
PB: predicated region body
PF: predicated region fallthrough
CT: control target
= control target key end

     0   :  { %s22_s0 = inlined_call_operand.vmem [shape: f32[64], index: 0, kind: input, shape index: {}]   ;;  %s23_s1 = inlined_call_operand.vmem [shape: f32[3,64], index: 1, kind: output, shape index: {}]  }
   0x1   :  { %v4_v0 = vld [vmem:[%s22_s0] ss:$0 sm:$0xff] }
   0x2   :  { %5 = vst [vmem:[%s23_s1] sm:$0xf] %v4_v0 }

// kernel: tile.58
= control target key start
LH: loop header
LB: loop body
LE: loop exit
PB: predicated region body
PF: predicated region fallthrough
CT: control target
= control target key end

     0   :  { %s22_s0 = inlined_call_operand.vmem [shape: f32[32], index: 0, kind: input, shape index: {}]   ;;  %s23_s1 = inlined_call_operand.vmem [shape: f32[7,32], index: 1, kind: output, shape index: {}]  }
   0x1   :  { %v4_v0 = vld [vmem:[%s22_s0] ss:$0 sm:$0xff] }
   0x2   :  { %5 = vst [vmem:[%s23_s1] sm:$0xff] %v4_v0 }

// kernel: tile.59
= control target key start
LH: loop header
LB: loop body
LE: loop exit
PB: predicated region body
PF: predicated region fallthrough
CT: control target
= control target key end

     0   :  { %s45_s8 = smov 96   ;;  %s20_s9 = smov 3  ;;  %vm4_vm0 = vcmask 261120   ;;  %vm10_vm1 = vcmask 1048320   ;;  %vm17_vm2 = vcmask 785920   ;;  %vm24_vm3 = vcmask 523520   ;;  %s76_s0 = inlined_call_operand.vmem [shape: f32[7,32], index: 0, kind: input, shape index: {}]   ;;  %s77_s1 = inlined_call_operand.vmem [shape: f32[1,224], index: 1, kind: output, shape index: {}]  }
   0x1   :  { %v38_v0 = vld [vmem:[%s76_s0 + $0x3] sm:$0x1]   ;;  %v40_v1 = vld [vmem:[%s76_s0 + $0x1] ss:$4 sm:%s20_s9]   ;;  %s13_s12 = smov 3  ;;  %s46_s13 = smov 32  }
   0x2   :  { %8 = vrot.lane.b32.xlu0 %v38_v0, %s45_s8  ;;  %22 = vrot.lane.b32.xlu1 %v40_v1, %s46_s13  ;;  %v39_v2 = vld [vmem:[%s76_s0 + $0x2] ss:$4 sm:%s13_s12]   ;;  %s47_s16 = smov 64   ;;  %s2_s17 = smov 3 }
   0x3   :  { %v3_v3 = vld [vmem:[%s76_s0] ss:$4 sm:%s2_s17]  }
   0x4   :  { %5 = vst.msk [vmem:[#allocation0] ss:$8 sm:$0x3] %vm4_vm0, %v3_v3  }
   0xa   :  { %15 = vrot.lane.b32.xlu0 %v39_v2, %s47_s16 }
  0x74   :  { %v9_v4 = vpop.permute.xlu0 %8   ;;  %v23_v5 = vpop.permute.xlu1 %22  }
  0x75   :  { %11 = vst.msk [vmem:[#allocation0] sm:$0x1] %vm10_vm1, %v9_v4  }
  0x7c   :  { %v16_v6 = vpop.permute.xlu0 %15  }
  0x7d   :  { %18 = vst.msk [vmem:[#allocation0] ss:$8 sm:$0x3] %vm17_vm2, %v16_v6  }
  0x7e   :  { %25 = vst.msk [vmem:[#allocation0] ss:$8 sm:$0x3] %vm24_vm3, %v23_v5  }
  0x85   :  { %v28_v7 = vld [vmem:[#allocation0] sm:$0x1]  ;;  %v33_v8 = vld [vmem:[#allocation0 + $0x8] sm:$0x1] }
  0x86   :  { %31 = vst [vmem:[%s77_s1] sm:$0x1] %v28_v7 }
  0x87   :  { %41 = vst [vmem:[%s77_s1 + $0x1] sm:$0x1] %v33_v8 }

// kernel: tile.68
= control target key start
LH: loop header
LB: loop body
LE: loop exit
PB: predicated region body
PF: predicated region fallthrough
CT: control target
= control target key end

     0   :  { %s28_s0 = inlined_call_operand.vmem [shape: f32[16], index: 0, kind: input, shape index: {}]   ;;  %s29_s1 = inlined_call_operand.vmem [shape: f32[15,16], index: 1, kind: output, shape index: {}]  }
   0x1   :  { %v4_v0 = vld [vmem:[%s28_s0] ss:$0 sm:$0xff] }
   0x2   :  { %5 = vst [vmem:[%s29_s1] sm:$0xff] %v4_v0 }
   0x3   :  { %8 = vst [vmem:[%s29_s1 + $0x8] sm:$0xff] %v4_v0 }

// kernel: _lambda_.5
= control target key start
LH: loop header
LB: loop body
LE: loop exit
PB: predicated region body
PF: predicated region fallthrough
CT: control target
= control target key end

     0   :  { %12 = vsyncpa [#allocation3], 0  ;;  %s1041_s0 = inlined_call_operand.hbm [shape: f32[2,1,8], index: 0, kind: input, shape index: {}]   ;;  %s1042_s1 = inlined_call_operand.vmem [shape: f32[1,8], index: 1, kind: input, shape index: {}]   ;;  %s1043_s2 = inlined_call_operand.vmem [shape: f32[1,8], index: 2, kind: input, shape index: {}]   ;;  %s1044_s3 = inlined_call_operand.hbm [shape: bf16[8,576], index: 3, kind: input, shape index: {}]   ;;  %s1045_s4 = inlined_call_operand.vmem [shape: f32[1,192], index: 4, kind: input, shape index: {}]   ;;  %s1046_s5 = inlined_call_operand.vmem [shape: f32[2,2,2,192], index: 5, kind: output, shape index: {0}]   ;;  %s1047_s6 = inlined_call_operand.vmem [shape: f32[2,2,192], index: 6, kind: output, shape index: {1}]  }
   0x1   :  { %14 = vsyncpa [#allocation3 + $0x1], 0 }
   0x2   :  { %15 = vsyncpa [#allocation5], 0  ;;  %s867_s21 = smov 0   ;;  %s869_s22 = smov 0  }
   0x3   :  { %s871_s23 = smov 0   ;;  %s873_s24 = smov 0  }
   0x4 LB: > { %s886_s25 = sadd.s32 4294967295, %s828_s24   ;;  %p41_p0 = scmp.ne.s32.totalorder %s820_s22, %s816_s21  ;;  %s828_s24 = sphi %s873_s24, %s1056_s24   ;;  %s824_s23 = sphi %s871_s23, %s1055_s23   ;;  %s820_s22 = sphi %s869_s22, %s1054_s22   ;;  %s816_s21 = sphi %s867_s21, %s1053_s21  }
   0x5   : > { %p42_p1 = scmp.eq.s32.totalorder %s886_s25, 0  ;;  %p660_p2 = scmp.ge.s32.totalorder %s828_s24, 1 }
   0x6   : > { %p188_p3 = scmp.lt.s32.totalorder %s828_s24, 3  ;;  %s206_s29 = sshll.u32 %s1044_s3, 4  ;;  %s207_s29 = int_to_ptr.hbm [resolvable:$true] %s206_s29 }
   0x7   : > { %p894_p4 = por %p42_p1, %p41_p0  ;;  %s830_s7 = smov [#allocation4]  }
   0x8   : > { %p901_p5 = pnand %p660_p2, %p188_p3  ;;  %s208_s8 = sshll.u32 %s830_s7, 4  ;;  %s209_s8 = int_to_ptr.vmem [resolvable:$true] %s208_s8 }
   0x9   : > { %s910_s9 = sadd.s32 1, %s828_s24   ;;  %s28_s10 = sadd.s32 1, %s824_s23 }
   0xa   : > { %p685_p6 = pneg %p901_p5  ;;  %s25_s11 = ssub.s32 %s828_s24, %s910_s9 }
   0xb   : > { %p26_p8 = scmp.eq.s32.totalorder %s25_s11, 0  ;;  %p35_p9 = scmp.ne.s32.totalorder %s824_s23, %s820_s22 }
   0xc   : > { %p686_p7 = pnand %p685_p6, %p42_p1  ;;  %p36_p10 = scmp.eq.s32.totalorder %s828_s24, 0 }
   0xd   : > { %p694_p11 = scmp.lt.s32.totalorder %s828_s24, 2  ;;  %s222_s13 = sand.u32 1, %s824_s23  }
   0xe   : > { %688 = dma.hbm_to_vmem [thread:$0]  (!%p686_p7), %s207_s29, 320, %s209_s8, [#allocation5]  }
   0xf   : > { %s920_s12 = scalar_select %p26_p8, %s824_s23, %s28_s10  }
  0x10   : > { %p37_p12 = por %p36_p10, %p35_p9  ;;  %s228_s16 = scalar_lea.hbm %s1041_s0, %s828_s24 }
  0x11   : > { %s225_s17 = scalar_lea.vmem [#allocation2], %s222_s13  ;;  %s230_s19 = sshll.u32 %s228_s16, 4  ;;  %s231_s19 = int_to_ptr.hbm [resolvable:$true] %s230_s19 }
  0x12   : > { %s232_s18 = sshll.u32 %s225_s17, 4  ;;  %p927_p13 = pnand %p694_p11, %p37_p12  ;;  %s233_s18 = int_to_ptr.vmem [resolvable:$true] %s232_s18 }
  0x13   : > { %s223_s21 = scalar_lea.sflag [#allocation3], %s222_s13  ;;  %s760_s27 = sshra.s32 %s231_s19, 4  ;;  %s761_s27 = int_to_ptr.hbm [resolvable:$true] %s760_s27 }
  0x14   : > { %s762_s28 = scalar_lea.hbm %s761_s27, 1  ;;  %p764_p2 = pneg %p927_p13 }
  0x15   : > { %p763_p0 = scmp.ne.s32.totalorder %s761_s27, %s762_s28  ;;  %s767_s7 = scalar_lea.hbm %s1041_s0, 2 }
  0x16   : > { %p768_p7 = scmp.lt.s32.totalorder %s761_s27, %s1041_s0  ;;  %p769_p8 = scmp.lt.s32.totalorder %s767_s7, %s762_s28 }
  0x17   : > { %p765_p3 = pnand %p764_p2, %p763_p0 }
  0x18   : > { %p770_p9 = por %p769_p8, %p768_p7 }
  0x19   : > { %p766_p6 = pneg %p765_p3 }
  0x1b   : > { %p771_p10 = pnand %p770_p9, %p766_p6 }
  0x1d   : > { %774 = shalt.err (!%p771_p10)
}
  0x1e   : > { %692 = dma.hbm_to_vmem [thread:$0]  (!%p927_p13), %s231_s19, 16, %s233_s18, %s223_s21  }
  0x1f   : > { %241 = sbr.rel (%p901_p5) target bundleno = 330 (0x14a), region = 40  ;;  %s243_s11 = sand.u32 (!%p901_p5), 1, %s820_s22  }
  0x20   : > { %s244_s13 = scalar_lea.sflag (!%p901_p5), [#allocation3], %s243_s11  ;;  %s246_s14 = scalar_lea.vmem (!%p901_p5), [#allocation2], %s243_s11 }
  0x24   : > { %807 = dma.done.wait (%p894_p4), %s244_s13, 16  }
  0x25   : > { %809 = vsyncadd (%p894_p4), %s244_s13, 4294967280 }
  0x26   : > { %811 = dma.done.wait (%p42_p1), [#allocation5], 320  }
  0x27   : > { %813 = vsyncadd (%p42_p1), [#allocation5], 4294966976  ;;  %v302_v0 = vld [vmem:[#allocation4] sm:$0xff]  ;;  %v303_v1 = vld [vmem:[#allocation4 + $0x8] sm:$0xff]  ;;  %vm322_vm0 = vcmask 1043456   ;;  %s831_s19 = smov 64  }
  0x28   : > { %v296_v2 = vld [vmem:[%s246_s14] sm:$0x1]  ;;  %v308_v3 = vunpack.c.l.b16 %v302_v0  ;;  %v309_v4 = vunpack.c.h.b16 %v302_v0  ;;  %v310_v5 = vunpack.c.l.b16 %v303_v1  ;;  %v311_v9 = vunpack.c.h.b16 %v303_v1  ;;  %v304_v12 = vld [vmem:[#allocation4 + $0x10] sm:$0xf]  ;;  %p285_p1 = scmp.lt.s32.totalorder %s886_s25, 1 }
  0x29   : > { %v297_v6 = vld [vmem:[%s1042_s1] sm:$0x1]  ;;  %v312_v18 = vunpack.c.l.b16 %v304_v12  ;;  %vm318_vm1 = vcmask 64512   ;;  %vm403_vm2 = vcmask 1040384   ;;  %vm470_vm3 = vcmask 1041920  }
  0x2a   : > { %v299_v7 = vld [vmem:[%s1043_s2] sm:$0x1]  ;;  %v298_v10 = vmul.f32 %v297_v6, %v296_v2  ;;  %v313_v13 = vpack.c.b16 %v308_v3, %v308_v3  ;;  %v314_v14 = vpack.c.b16 %v309_v4, %v309_v4  ;;  %v315_v15 = vpack.c.b16 %v310_v5, %v310_v5  ;;  %s1058_s25 = smov (!%p285_p1, %s886_s25), 1 }
  0x2b   : > { %v961_v8 = vld [vmem:[%s1045_s4] sm:$0x3]  ;;  %v316_v16 = vpack.c.b16 %v311_v9, %v311_v9  ;;  %v317_v24 = vpack.c.b16 %v312_v18, %v312_v18  ;;  %vm429_vm4 = vcmask 523264   ;;  %vm438_vm5 = vcmask 1041408   ;;  %s677_s20 = sshll.u32 %s1058_s25, 3  ;;  %s678_s24 = sshll.u32 %s1058_s25, 2 }
  0x2c   : > { %v419_v11 = vperm.slane %v961_v8, 0  ;;  %v300_v17 = vadd.f32 %v299_v7, %v298_v10  ;;  %v324_v19 = vsel %vm322_vm0, %v313_v13, 0  ;;  %v327_v20 = vsel %vm322_vm0, %v314_v14, 0  ;;  %s289_s28 = scalar_lea.vmem %s1046_s5, %s677_s20  ;;  %s294_s8 = scalar_lea.vmem %s1047_s6, %s678_s24 }
  0x2d   : > { %v330_v21 = vsel %vm322_vm0, %v315_v15, 0  ;;  %v333_v22 = vsel %vm322_vm0, %v316_v16, 0  ;;  %345 = vmatpush.bf16.msra.mxu0 %v324_v19  ;;  %358 = vmatpush.bf16.msra.mxu1 %v327_v20  ;;  %v420_v25 = vperm.slane %v961_v8, 1  ;;  %v336_v26 = vsel %vm322_vm0, %v317_v24, 0 }
  0x2e   : > { %425 = vrot.lane.b32.xlu0 %v419_v11, %s831_s19  ;;  %v301_v23 = vpack.c.bf16 %v300_v17, %v300_v17  ;;  %371 = vmatpush.bf16.msra.mxu2 %v330_v21  ;;  %vm441_vm6 = vcmask 519170   ;;  %vm462_vm8 = vcmask 517120  }
  0x2f   : > { %384 = vmatpush.bf16.msra.mxu3 %v333_v22  ;;  %vm1002_vm7 = vmor %vm441_vm6, %vm438_vm5 }
  0x30   : > { %669 = vmatmul.msk.bf16.vlgmr.msra.gmra.mxu0 %vm318_vm1, %v301_v23  ;;  %670 = vmatmul.msk.bf16.vlgmr.msra.gmra.mxu1 %vm318_vm1, %v301_v23 }
  0x31   : > { %671 = vmatmul.msk.bf16.vlgmr.msra.gmra.mxu2 %vm318_vm1, %v301_v23  ;;  %397 = vmatpush.bf16.msrb.mxu0 %v336_v26 }
  0x32   : > { %672 = vmatmul.msk.bf16.vlgmr.msra.gmra.mxu3 %vm318_vm1, %v301_v23 }
  0x36   : > { %427 = vrot.lane.b32.xlu0 %v420_v25, %s831_s19 }
  0x40   : > { %673 = vmatmul.msk.bf16.vlgmr.msrb.gmra.mxu0 %vm318_vm1, %v301_v23 }
  0xa0   : > { %v426_v27 = vpop.permute.xlu0 %425 }
  0xa8   : > { %v428_v32 = vpop.permute.xlu0 %427 }
  0xa9   : > { %v430_v37 = vsel %vm429_vm4, %v426_v27, %v428_v32 }
  0xad   : > { %v347_v28 = vpop.f32.mrf.mxu0  ;;  %v360_v29 = vpop.f32.mrf.mxu1 }
  0xae   : > { %v405_v30 = vsel %vm403_vm2, %v360_v29, 0.0  ;;  %v404_v55 = vsel %vm403_vm2, %v347_v28, 0.0 }
  0xaf   : > { %v433_v31 = vadd.f32 %v426_v27, %v405_v30 }
  0xb1   : > { %v512_v33 = vmul.f32 %v433_v31, %v433_v31  ;;  %v471_v34 = vsel %vm470_vm3, %v433_v31, 0.0 }
  0xb2   : > { %v472_v41 = vrot.slane %v471_v34, 4 }
  0xb3   : > { %v514_v42 = vsel %vm470_vm3, %v512_v33, 0.0 }
  0xb4   : > { %v373_v35 = vpop.f32.mrf.mxu2  ;;  %v515_v48 = vrot.slane %v514_v42, 4  ;;  %v473_v50 = vadd.f32 %v472_v41, %v471_v34 }
  0xb5   : > { %v386_v36 = vpop.f32.mrf.mxu3  ;;  %v416_v38 = vsel %vm403_vm2, %v373_v35, 0.0  ;;  %v349_v39 = vpop.f32.mrf.mxu0 }
  0xb6   : > { %v362_v40 = vpop.f32.mrf.mxu1  ;;  %v434_v43 = vadd.f32 %v430_v37, %v416_v38  ;;  %v408_v47 = vrot.slane %v386_v36, 7  ;;  %v516_v62 = vadd.f32 %v515_v48, %v514_v42  ;;  %v474_v0 = vrot.slane %v473_v50, 2 }
  0xb8   : > { %v446_v44 = vrot.slane %v434_v43, 6  ;;  %v478_v45 = vsel %vm438_vm5, %v434_v43, 0.0  ;;  %v513_v46 = vmul.f32 %v434_v43, %v434_v43  ;;  %v412_v57 = vsel %vm403_vm2, 0.0, %v408_v47 }
  0xb9   : > { %v479_v49 = vrot.slane %v478_v45, 4  ;;  %v414_v1 = vadd.f32 %v412_v57, %v404_v55  ;;  %v517_v9 = vrot.slane %v516_v62, 2  ;;  %v475_v10 = vadd.f32 %v474_v0, %v473_v50 }
  0xba   : > { %v447_v51 = vsel %vm438_vm5, %v433_v31, %v446_v44  ;;  %v521_v52 = vsel %vm438_vm5, %v513_v46, 0.0 }
  0xbb   : > { %448 = vrot.lane.b32.xlu0 %v447_v51, %s831_s19  ;;  %v480_v53 = vadd.f32 %v479_v49, %v478_v45  ;;  %v522_v54 = vrot.slane %v521_v52, 4  ;;  %v423_v13 = vadd.f32 %v419_v11, %v414_v1  ;;  %v518_v18 = vadd.f32 %v517_v9, %v516_v62 }
  0xbc   : > { %v375_v56 = vpop.f32.mrf.mxu2  ;;  %v476_v11 = vrot.slane %v475_v10, 1 }
  0xbd   : > { %v388_v58 = vpop.f32.mrf.mxu3  ;;  %v399_v59 = vpop.f32.mrf.mxu0  ;;  %v481_v60 = vrot.slane %v480_v53, 2  ;;  %v523_v61 = vadd.f32 %v522_v54, %v521_v52  ;;  %v519_v21 = vrot.slane %v518_v18, 1  ;;  %v496_v27 = vmul.f32 %v423_v13, %v423_v13 }
  0xbe   : > { %v409_v63 = vrot.slane %v399_v59, 7  ;;  %v477_v22 = vadd.f32 %v476_v11, %v475_v10  ;;  %v455_v32 = vsel %vm438_vm5, %v423_v13, 0.0 }
  0xbf   : > { %v482_v2 = vadd.f32 %v481_v60, %v480_v53  ;;  %v524_v3 = vrot.slane %v523_v61, 2  ;;  %v520_v23 = vadd.f32 %v519_v21, %v518_v18  ;;  %v456_v38 = vrot.slane %v455_v32, 4 }
  0xc0   : > { %v413_v4 = vsel %vm403_vm2, 0.0, %v409_v63 }
  0xc1   : > { %v415_v5 = vadd.f32 %v413_v4, %v405_v30  ;;  %v483_v6 = vrot.slane %v482_v2, 1  ;;  %v525_v7 = vadd.f32 %v524_v3, %v523_v61  ;;  %v498_v30 = vsel %vm438_vm5, %v496_v27, 0.0 }
  0xc2   : > { %v499_v35 = vrot.slane %v498_v30, 4  ;;  %v457_v43 = vadd.f32 %v456_v38, %v455_v32 }
  0xc3   : > { %v424_v12 = vadd.f32 %v420_v25, %v415_v5  ;;  %v484_v14 = vadd.f32 %v483_v6, %v482_v2  ;;  %v526_v15 = vrot.slane %v525_v7, 1 }
  0xc4   : > { %v500_v41 = vadd.f32 %v499_v35, %v498_v30  ;;  %v458_v48 = vrot.slane %v457_v43, 2 }
  0xc5   : > { %v437_v16 = vrot.slane %v424_v12, 6  ;;  %489 = vrot.lane.b32.xlu2 %v484_v14, %s831_s19  ;;  %v527_v17 = vadd.f32 %v526_v15, %v525_v7  ;;  %v401_v19 = vpop.f32.mrf.mxu0  ;;  %v497_v24 = vmul.f32 %v424_v12, %v424_v12  ;;  %v463_v28 = vsel %vm462_vm8, %v424_v12, 0.0 }
  0xc6   : > { %v464_v31 = vrot.slane %v463_v28, 4  ;;  %v501_v46 = vrot.slane %v500_v41, 2  ;;  %v459_v53 = vadd.f32 %v458_v48, %v457_v43 }
  0xc7   : > { %v439_v8 = vsel %vm438_vm5, %v423_v13, %v437_v16  ;;  %532 = vrot.lane.b32.xlu1 %v527_v17, %s831_s19  ;;  %v505_v25 = vsel %vm462_vm8, %v497_v24, 0.0 }
  0xc8   : > { %443 = vst.msk [vmem:[%s289_s28] sm:$0xf] %vm1002_vm7, %v439_v8  ;;  %v506_v26 = vrot.slane %v505_v25, 4  ;;  %v465_v37 = vadd.f32 %v464_v31, %v463_v28  ;;  %v502_v51 = vadd.f32 %v501_v46, %v500_v41  ;;  %v460_v58 = vrot.slane %v459_v53, 1 }
  0xca   : > { %v507_v29 = vadd.f32 %v506_v26, %v505_v25  ;;  %v466_v42 = vrot.slane %v465_v37, 2  ;;  %v503_v55 = vrot.slane %v502_v51, 1  ;;  %v461_v1 = vadd.f32 %v460_v58, %v459_v53 }
  0xcc   : > { %v508_v34 = vrot.slane %v507_v29, 2  ;;  %v467_v47 = vadd.f32 %v466_v42, %v465_v37  ;;  %v504_v62 = vadd.f32 %v503_v55, %v502_v51 }
  0xcd   : > { %487 = vrot.lane.b32.xlu2 %v477_v22, %s831_s19 }
  0xce   : > { %v509_v40 = vadd.f32 %v508_v34, %v507_v29  ;;  %v468_v52 = vrot.slane %v467_v47, 1 }
  0xcf   : > { %530 = vrot.lane.b32.xlu1 %v520_v23, %s831_s19 }
  0xd0   : > { %v510_v45 = vrot.slane %v509_v40, 1  ;;  %v469_v56 = vadd.f32 %v468_v52, %v467_v47 }
  0xd2   : > { %v511_v50 = vadd.f32 %v510_v45, %v509_v40 }
 0x11f   : > { %v490_v44 = vpop.permute.xlu2 %489 }
 0x120   : > { %v495_v60 = vadd.f32 %v490_v44, %v469_v56 }
 0x127   : > { %v488_v57 = vpop.permute.xlu2 %487 }
 0x128   : > { %v491_v63 = vsel %vm429_vm4, %v488_v57, %v490_v44 }
 0x129   : > { %v494_v4 = vadd.f32 %v491_v63, %v461_v1 }
 0x12d   : > { %v449_v33 = vpop.permute.xlu0 %448 }
 0x12e   : > { %v450_v36 = vrot.slane %v449_v33, 2 }
 0x130   : > { %v451_v39 = vsel %vm429_vm4, %v449_v33, %v450_v36 }
 0x131   : > { %674 = vst.msk [vmem:[%s289_s28 + $0x4] sm:$0xf] %vm1002_vm7, %v451_v39 }
 0x139   : > { %v533_v49 = vpop.permute.xlu1 %532 }
 0x13a   : > { %v538_v54 = vadd.f32 %v533_v49, %v511_v50 }
 0x13c   : > { %v542_v59 = vrot.slane %v538_v54, 7 }
 0x13e   : > { %v546_v2 = vsel %vm403_vm2, %v495_v60, %v542_v59 }
 0x13f   : > { %v549_v6 = vrot.slane %v546_v2, 6 }
 0x141   : > { %v531_v61 = vpop.permute.xlu1 %530 }
 0x142   : > { %v534_v0 = vsel %vm429_vm4, %v531_v61, %v533_v49 }
 0x143   : > { %v537_v3 = vadd.f32 %v534_v0, %v504_v62 }
 0x145   : > { %v541_v5 = vrot.slane %v537_v3, 7 }
 0x147   : > { %v545_v7 = vsel %vm403_vm2, %v494_v4, %v541_v5 }
 0x148   : > { %v550_v9 = vsel %vm438_vm5, %v545_v7, %v549_v6 }
 0x149   : > { %552 = vst.msk [vmem:[%s294_s8] sm:$0xf] %vm1002_vm7, %v550_v9 }
 0x14a PF: > { %p18_p4 = scmp.ge.s32.totalorder %s910_s9, 4   ;;  %s1053_s21 = smov %s820_s22 }
 0x14b   : > { %s1054_s22 = smov %s824_s23  ;;  %s1055_s23 = smov %s920_s12 }
 0x14c   : > { %s1056_s24 = smov %s910_s9  ;;  %20 = sbr.rel (!%p18_p4) target bundleno = 4 (0x4), region = 97 }
 0x151   :  { %590 = vsyncpa [#allocation3], 1 }
 0x152   :  { %592 = vsyncpa [#allocation3 + $0x1], 1 }
 0x153   :  { %593 = vsyncpa [#allocation5], 1 }

// kernel: tile.69
= control target key start
LH: loop header
LB: loop body
LE: loop exit
PB: predicated region body
PF: predicated region fallthrough
CT: control target
= control target key end

     0   :  { %s20_s8 = smov 3  ;;  %s81_s9 = smov 112   ;;  %vm4_vm0 = vcmask 130048   ;;  %vm10_vm1 = vcmask 1048448   ;;  %vm17_vm2 = vcmask 917248   ;;  %vm24_vm3 = vcmask 786048   ;;  %s128_s0 = inlined_call_operand.vmem [shape: f32[15,16], index: 0, kind: input, shape index: {}]   ;;  %s129_s1 = inlined_call_operand.vmem [shape: f32[1,240], index: 1, kind: output, shape index: {}]  }
   0x1   :  { %v66_v0 = vld [vmem:[%s128_s0 + $0x7] sm:$0x1]   ;;  %v68_v1 = vld [vmem:[%s128_s0 + $0x5] ss:$8 sm:%s20_s8]   ;;  %s82_s12 = smov 80   ;;  %s13_s13 = smov 3 }
   0x2   :  { %8 = vrot.lane.b32.xlu0 %v66_v0, %s81_s9  ;;  %22 = vrot.lane.b32.xlu1 %v68_v1, %s82_s12  ;;  %s27_s14 = smov 3  ;;  %s34_s15 = smov 3  ;;  %v67_v3 = vld [vmem:[%s128_s0 + $0x6] ss:$8 sm:%s13_s13]   ;;  %vm31_vm4 = vcmask 654848   ;;  %vm38_vm5 = vcmask 523648  }
   0x3   :  { %v70_v2 = vld [vmem:[%s128_s0 + $0x3] ss:$8 sm:%s34_s15]   ;;  %s83_s20 = smov 48   ;;  %v69_v4 = vld [vmem:[%s128_s0 + $0x4] ss:$8 sm:%s27_s14]   ;;  %s41_s23 = smov 3 }
   0x4   :  { %36 = vrot.lane.b32.xlu2 %v70_v2, %s83_s20  ;;  %s84_s24 = smov 96   ;;  %s85_s25 = smov 64   ;;  %v71_v5 = vld [vmem:[%s128_s0 + $0x2] ss:$8 sm:%s41_s23]   ;;  %vm45_vm6 = vcmask 392448   ;;  %vm52_vm7 = vcmask 261248  }
   0x5   :  { %s48_s26 = smov 3  ;;  %s86_s2 = smov 32  }
   0x6   :  { %v72_v6 = vld [vmem:[%s128_s0 + $0x1] ss:$8 sm:%s48_s26]   ;;  %s87_s3 = smov 16   ;;  %s2_s4 = smov 3 }
   0x7   :  { %v3_v7 = vld [vmem:[%s128_s0] ss:$8 sm:%s2_s4]  }
   0x8   :  { %5 = vst.msk [vmem:[#allocation0] ss:$8 sm:$0x3] %vm4_vm0, %v3_v7  }
   0xa   :  { %15 = vrot.lane.b32.xlu0 %v67_v3, %s84_s24  ;;  %29 = vrot.lane.b32.xlu1 %v69_v4, %s85_s25 }
   0xc   :  { %43 = vrot.lane.b32.xlu2 %v71_v5, %s86_s2 }
  0x12   :  { %50 = vrot.lane.b32.xlu0 %v72_v6, %s87_s3 }
  0x5e   :  { %v37_v8 = vpop.permute.xlu2 %36  }
  0x66   :  { %v44_v9 = vpop.permute.xlu2 %43  }
  0x74   :  { %v9_v10 = vpop.permute.xlu0 %8   ;;  %v23_v11 = vpop.permute.xlu1 %22  }
  0x75   :  { %11 = vst.msk [vmem:[#allocation0] sm:$0x1] %vm10_vm1, %v9_v10  }
  0x7c   :  { %v16_v12 = vpop.permute.xlu0 %15   ;;  %v30_v13 = vpop.permute.xlu1 %29  }
  0x7d   :  { %18 = vst.msk [vmem:[#allocation0] ss:$8 sm:$0x3] %vm17_vm2, %v16_v12  }
  0x7e   :  { %25 = vst.msk [vmem:[#allocation0] ss:$8 sm:$0x3] %vm24_vm3, %v23_v11  }
  0x7f   :  { %32 = vst.msk [vmem:[#allocation0] ss:$8 sm:$0x3] %vm31_vm4, %v30_v13  }
  0x80   :  { %39 = vst.msk [vmem:[#allocation0] ss:$8 sm:$0x3] %vm38_vm5, %v37_v8  }
  0x81   :  { %46 = vst.msk [vmem:[#allocation0] ss:$8 sm:$0x3] %vm45_vm6, %v44_v9  }
  0x84   :  { %v51_v14 = vpop.permute.xlu0 %50  }
  0x85   :  { %53 = vst.msk [vmem:[#allocation0] ss:$8 sm:$0x3] %vm52_vm7, %v51_v14  }
  0x8c   :  { %v56_v15 = vld [vmem:[#allocation0] sm:$0x1]  ;;  %v61_v16 = vld [vmem:[#allocation0 + $0x8] sm:$0x1] }
  0x8d   :  { %59 = vst [vmem:[%s129_s1] sm:$0x1] %v56_v15 }
  0x8e   :  { %73 = vst [vmem:[%s129_s1 + $0x1] sm:$0x1] %v61_v16 }

// kernel: _lambda_.6
= control target key start
LH: loop header
LB: loop body
LE: loop exit
PB: predicated region body
PF: predicated region fallthrough
CT: control target
= control target key end

     0   :  { %12 = vsyncpa [#allocation3], 0  ;;  %s1690_s21 = smov 0   ;;  %s1835_s0 = inlined_call_operand.vmem [shape: f32[2,3,192], index: 0, kind: input, shape index: {}]   ;;  %s1836_s1 = inlined_call_operand.vmem [shape: f32[1,192], index: 1, kind: input, shape index: {}]   ;;  %s1837_s2 = inlined_call_operand.vmem [shape: f32[1,192], index: 2, kind: input, shape index: {}]   ;;  %s1838_s3 = inlined_call_operand.hbm [shape: bf16[192,672], index: 3, kind: input, shape index: {}]   ;;  %s1839_s4 = inlined_call_operand.vmem [shape: f32[1,224], index: 4, kind: input, shape index: {}]   ;;  %s1840_s5 = inlined_call_operand.vmem [shape: f32[2,2,4,224], index: 5, kind: output, shape index: {0}]   ;;  %s1841_s6 = inlined_call_operand.vmem [shape: f32[2,2,224], index: 6, kind: output, shape index: {1}]  }
   0x1 LB: > { %s202_s24 = sshll.u32 %s1838_s3, 4  ;;  %s1198_s25 = sadd.s32 4294967295, %s1647_s21   ;;  %s1647_s21 = sphi %s1690_s21, %s18_s21   ;;  %s203_s24 = int_to_ptr.hbm [resolvable:$true] %s202_s24 }
   0x2   : > { %p1200_p0 = scmp.ge.s32.totalorder %s1647_s21, 1  ;;  %p185_p1 = scmp.lt.s32.totalorder %s1647_s21, 3 }
   0x3   : > { %p1591_p2 = scmp.eq.s32.totalorder %s1198_s25, 0  ;;  %s1649_s26 = smov [#allocation2]  }
   0x4   : > { %p186_p3 = pnand %p1200_p0, %p185_p1  ;;  %s204_s27 = sshll.u32 %s1649_s26, 4  ;;  %s205_s27 = int_to_ptr.vmem [resolvable:$true] %s204_s27 }
   0x5   : > { %s1650_s28 = smov 384   ;;  %s1651_s29 = smov 24  }
   0x6   : > { %p1587_p4 = pneg %p186_p3  ;;  %231 = sbr.rel (%p186_p3) target bundleno = 377 (0x179), region = 40 }
   0x8   : > { %p1588_p5 = pnand %p1591_p2, %p1587_p4 }
   0xa   : > { %1590 = dma.hbm_to_vmem [thread:$0]  (!%p1588_p5), %s203_s24, 9216, %s205_s27, [#allocation3], %s1650_s28, %s1650_s28, %s1651_s29  }
   0xb   : > { %1642 = dma.done.wait (%p1591_p2), [#allocation3], 9216  }
   0xc   : > { %1644 = vsyncadd (%p1591_p2), [#allocation3], 4294958080  ;;  %p267_p6 = scmp.lt.s32.totalorder %s1198_s25, 1  ;;  %v1381_v0 = vld [vmem:[#allocation2 + $0x150] sm:$0xf]  ;;  %vm289_vm0 = vcmask 1043456  }
   0xd   : > { %v1556_v1 = vld [vmem:[#allocation2 + $0x164] sm:$0xf0]  ;;  %v1477_v2 = vld [vmem:[#allocation2 + $0x210] sm:$0xf]  ;;  %v1553_v5 = vld [vmem:[#allocation2 + $0x154] sm:$0xf] }
   0xe   : > { %s1845_s25 = smov (!%p267_p6, %s1198_s25), 1  ;;  %v1382_v3 = vor.u32 %v1556_v1, %v1381_v0  ;;  %v1580_v4 = vld [vmem:[#allocation2 + $0x224] sm:$0xf0]  ;;  %v1383_v6 = vld [vmem:[#allocation2 + $0x168] sm:$0xf0]  ;;  %vm742_vm1 = vcmask 523264  }
   0xf   : > { %v1478_v7 = vor.u32 %v1580_v4, %v1477_v2  ;;  %v1386_v8 = vor.u32 %v1553_v5, %v1383_v6  ;;  %v1577_v9 = vld [vmem:[#allocation2 + $0x214] sm:$0xf]  ;;  %v1479_v10 = vld [vmem:[#allocation2 + $0x228] sm:$0xf0]  ;;  %v1357_v11 = vld [vmem:[#allocation2 + $0x120] sm:$0xf] }
  0x10   : > { %746 = vmatpush.bf16.msra.mxu0 %v1382_v3  ;;  %v1482_v12 = vor.u32 %v1577_v9, %v1479_v10  ;;  %v1550_v13 = vld [vmem:[#allocation2 + $0x134] sm:$0xf0]  ;;  %v1453_v14 = vld [vmem:[#allocation2 + $0x1e0] sm:$0xf]  ;;  %v1547_v18 = vld [vmem:[#allocation2 + $0x124] sm:$0xf] }
  0x11   : > { %v1574_v15 = vld [vmem:[#allocation2 + $0x1f4] sm:$0xf0]  ;;  %763 = vmatpush.bf16.msra.mxu1 %v1478_v7  ;;  %772 = vmatpush.bf16.msra.mxu2 %v1386_v8  ;;  %v1358_v16 = vor.u32 %v1550_v13, %v1357_v11  ;;  %v1359_v19 = vld [vmem:[#allocation2 + $0x138] sm:$0xf0]  ;;  %v1571_v20 = vld [vmem:[#allocation2 + $0x1e4] sm:$0xf] }
  0x12   : > { %v1454_v17 = vor.u32 %v1574_v15, %v1453_v14  ;;  %789 = vmatpush.bf16.msra.mxu3 %v1482_v12  ;;  %v1362_v21 = vor.u32 %v1547_v18, %v1359_v19  ;;  %v1455_v22 = vld [vmem:[#allocation2 + $0x1f8] sm:$0xf0]  ;;  %v1333_v23 = vld [vmem:[#allocation2 + $0xf0] sm:$0xf]  ;;  %v1544_v24 = vld [vmem:[#allocation2 + $0x104] sm:$0xf0] }
  0x13   : > { %v1458_v25 = vor.u32 %v1571_v20, %v1455_v22  ;;  %v1429_v26 = vld [vmem:[#allocation2 + $0x1b0] sm:$0xf]  ;;  %v1568_v27 = vld [vmem:[#allocation2 + $0x1c4] sm:$0xf0]  ;;  %v1541_v28 = vld [vmem:[#allocation2 + $0xf4] sm:$0xf]  ;;  %v1334_v29 = vor.u32 %v1544_v24, %v1333_v23 }
  0x14   : > { %747 = vmatpush.bf16.msra.mxu0 %v1358_v16  ;;  %v1335_v30 = vld [vmem:[#allocation2 + $0x108] sm:$0xf0]  ;;  %v1565_v31 = vld [vmem:[#allocation2 + $0x1b4] sm:$0xf]  ;;  %v1430_v33 = vor.u32 %v1568_v27, %v1429_v26  ;;  %v1309_v35 = vld [vmem:[#allocation2 + $0xc0] sm:$0xf] }
  0x15   : > { %v1431_v32 = vld [vmem:[#allocation2 + $0x1c8] sm:$0xf0]  ;;  %764 = vmatpush.bf16.msra.mxu1 %v1454_v17  ;;  %773 = vmatpush.bf16.msra.mxu2 %v1362_v21  ;;  %v1338_v34 = vor.u32 %v1541_v28, %v1335_v30  ;;  %v1538_v36 = vld [vmem:[#allocation2 + $0xd4] sm:$0xf0]  ;;  %v1405_v37 = vld [vmem:[#allocation2 + $0x180] sm:$0xf] }
  0x16   : > { %790 = vmatpush.bf16.msra.mxu3 %v1458_v25  ;;  %v1434_v38 = vor.u32 %v1565_v31, %v1431_v32  ;;  %v1562_v39 = vld [vmem:[#allocation2 + $0x194] sm:$0xf0]  ;;  %v1535_v40 = vld [vmem:[#allocation2 + $0xc4] sm:$0xf]  ;;  %v1311_v41 = vld [vmem:[#allocation2 + $0xd8] sm:$0xf0]  ;;  %v1310_v45 = vor.u32 %v1538_v36, %v1309_v35 }
  0x17   : > { %v1559_v42 = vld [vmem:[#allocation2 + $0x184] sm:$0xf]  ;;  %v1407_v43 = vld [vmem:[#allocation2 + $0x198] sm:$0xf0]  ;;  %v1389_v44 = vld [vmem:[#allocation2 + $0x158] sm:$0xf]  ;;  %v1406_v49 = vor.u32 %v1562_v39, %v1405_v37  ;;  %v1314_v50 = vor.u32 %v1535_v40, %v1311_v41 }
  0x18   : > { %748 = vmatpush.bf16.msra.mxu0 %v1334_v29  ;;  %v1557_v46 = vld [vmem:[#allocation2 + $0x16c] sm:$0xf0]  ;;  %v1485_v47 = vld [vmem:[#allocation2 + $0x218] sm:$0xf]  ;;  %v1532_v52 = vld [vmem:[#allocation2 + $0xa4] sm:$0xf0]  ;;  %v1410_v53 = vor.u32 %v1559_v42, %v1407_v43 }
  0x19   : > { %v1581_v48 = vld [vmem:[#allocation2 + $0x22c] sm:$0xf0]  ;;  %765 = vmatpush.bf16.msra.mxu1 %v1430_v33  ;;  %774 = vmatpush.bf16.msra.mxu2 %v1338_v34  ;;  %v1390_v54 = vor.u32 %v1557_v46, %v1389_v44  ;;  %v1529_v55 = vld [vmem:[#allocation2 + $0x94] sm:$0xf]  ;;  %v1287_v56 = vld [vmem:[#allocation2 + $0xa8] sm:$0xf0] }
  0x1a   : > { %v1285_v51 = vld [vmem:[#allocation2 + $0x90] sm:$0xf]  ;;  %791 = vmatpush.bf16.msra.mxu3 %v1434_v38  ;;  %s1508_s30 = sshll.u32 %s1845_s25, 3  ;;  %v1486_v57 = vor.u32 %v1581_v48, %v1485_v47  ;;  %v1365_v58 = vld [vmem:[#allocation2 + $0x128] sm:$0xf]  ;;  %v1290_v0 = vor.u32 %v1529_v55, %v1287_v56  ;;  %s1652_s16 = smov 96  }
  0x1b   : > { %v1551_v59 = vld [vmem:[#allocation2 + $0x13c] sm:$0xf0]  ;;  %v1286_v60 = vor.u32 %v1532_v52, %v1285_v51  ;;  %v1461_v61 = vld [vmem:[#allocation2 + $0x1e8] sm:$0xf]  ;;  %v1526_v1 = vld [vmem:[#allocation2 + $0x74] sm:$0xf0]  ;;  %s271_s9 = scalar_lea.vmem %s1835_s0, %s1508_s30 }
  0x1c   : > { %749 = vmatpush.bf16.msra.mxu0 %v1310_v45  ;;  %v1575_v62 = vld [vmem:[#allocation2 + $0x1fc] sm:$0xf0]  ;;  %v1523_v2 = vld [vmem:[#allocation2 + $0x64] sm:$0xf]  ;;  %v1263_v3 = vld [vmem:[#allocation2 + $0x78] sm:$0xf0]  ;;  %v1366_v4 = vor.u32 %v1551_v59, %v1365_v58 }
  0x1d   : > { %v1261_v63 = vld [vmem:[#allocation2 + $0x60] sm:$0xf]  ;;  %766 = vmatpush.bf16.msra.mxu1 %v1406_v49  ;;  %775 = vmatpush.bf16.msra.mxu2 %v1314_v50  ;;  %v1341_v5 = vld [vmem:[#allocation2 + $0xf8] sm:$0xf]  ;;  %v1545_v6 = vld [vmem:[#allocation2 + $0x10c] sm:$0xf0]  ;;  %v1462_v8 = vor.u32 %v1575_v62, %v1461_v61  ;;  %v1266_v18 = vor.u32 %v1523_v2, %v1263_v3 }
  0x1e   : > { %792 = vmatpush.bf16.msra.mxu3 %v1410_v53  ;;  %v284_v7 = vld [vmem:[%s1836_s1] sm:$0x3]  ;;  %v1262_v13 = vor.u32 %v1526_v1, %v1261_v63  ;;  %v1569_v14 = vld [vmem:[#allocation2 + $0x1cc] sm:$0xf0]  ;;  %v1520_v21 = vld [vmem:[#allocation2 + $0x44] sm:$0xf0]  ;;  %v1342_v22 = vor.u32 %v1545_v6, %v1341_v5 }
  0x1f   : > { %v1437_v9 = vld [vmem:[#allocation2 + $0x1b8] sm:$0xf]  ;;  %v286_v10 = vperm.slane %v284_v7, 0  ;;  %v287_v11 = vperm.slane %v284_v7, 1  ;;  %v1237_v20 = vld [vmem:[#allocation2 + $0x30] sm:$0xf] }
  0x20   : > { %v293_v12 = vld [vmem:[%s1837_s2] sm:$0x3]  ;;  %750 = vmatpush.bf16.msra.mxu0 %v1286_v60  ;;  %v1517_v24 = vld [vmem:[#allocation2 + $0x34] sm:$0xf]  ;;  %v1239_v25 = vld [vmem:[#allocation2 + $0x48] sm:$0xf0]  ;;  %v1438_v26 = vor.u32 %v1569_v14, %v1437_v9  ;;  %v1238_v32 = vor.u32 %v1520_v21, %v1237_v20 }
  0x21   : > { %798 = vmatpush.bf16.msrb.mxu1 %v1390_v54  ;;  %v283_v15 = vld [vmem:[%s271_s9] sm:$0x77]  ;;  %v295_v16 = vperm.slane %v293_v12, 0  ;;  %v296_v17 = vperm.slane %v293_v12, 1  ;;  %776 = vmatpush.bf16.msra.mxu2 %v1290_v0  ;;  %v288_v19 = vrot.slane %v287_v11, 4  ;;  %v1242_v36 = vor.u32 %v1517_v24, %v1239_v25  ;;  %s1653_s17 = smov 32  }
  0x22   : > { %815 = vmatpush.bf16.msrb.mxu3 %v1486_v57  ;;  %v1317_v28 = vld [vmem:[#allocation2 + $0xc8] sm:$0xf]  ;;  %v1539_v29 = vld [vmem:[#allocation2 + $0xdc] sm:$0xf0]  ;;  %v1514_v37 = vld [vmem:[#allocation2 + $0x14] sm:$0xf0] }
  0x23   : > { %v297_v23 = vrot.slane %v296_v17, 4  ;;  %v290_v27 = vsel %vm289_vm0, %v286_v10, %v288_v19  ;;  %v1413_v33 = vld [vmem:[#allocation2 + $0x188] sm:$0xf]  ;;  %v1563_v34 = vld [vmem:[#allocation2 + $0x19c] sm:$0xf0]  ;;  %v1318_v41 = vor.u32 %v1539_v29, %v1317_v28  ;;  %vm902_vm2 = vcmask 1042432  }
  0x24   : > { %751 = vmatpush.bf16.msra.mxu0 %v1262_v13  ;;  %v292_v30 = vmul.f32 %v290_v27, %v283_v15  ;;  %v1213_v35 = vld [vmem:[#allocation2] sm:$0xf]  ;;  %v1511_v38 = vld [vmem:[#allocation2 + $0x4] sm:$0xf]  ;;  %v1215_v39 = vld [vmem:[#allocation2 + $0x18] sm:$0xf0]  ;;  %v1414_v45 = vor.u32 %v1563_v34, %v1413_v33 }
  0x25   : > { %799 = vmatpush.bf16.msrb.mxu1 %v1366_v4  ;;  %v298_v31 = vsel %vm289_vm0, %v295_v16, %v297_v23  ;;  %777 = vmatpush.bf16.msra.mxu2 %v1266_v18  ;;  %v1293_v42 = vld [vmem:[#allocation2 + $0x98] sm:$0xf]  ;;  %v1554_v43 = vld [vmem:[#allocation2 + $0x15c] sm:$0xf]  ;;  %v1391_v44 = vld [vmem:[#allocation2 + $0x170] sm:$0xf0]  ;;  %v1214_v50 = vor.u32 %v1514_v37, %v1213_v35  ;;  %v1218_v51 = vor.u32 %v1511_v38, %v1215_v39 }
  0x26   : > { %816 = vmatpush.bf16.msrb.mxu3 %v1462_v8  ;;  %v300_v40 = vadd.f32 %v298_v31, %v292_v30  ;;  %v1533_v46 = vld [vmem:[#allocation2 + $0xac] sm:$0xf0]  ;;  %v1578_v47 = vld [vmem:[#allocation2 + $0x21c] sm:$0xf]  ;;  %v1487_v48 = vld [vmem:[#allocation2 + $0x230] sm:$0xf0]  ;;  %v1394_v52 = vor.u32 %v1554_v43, %v1391_v44 }
  0x27   : > { %v1269_v53 = vld [vmem:[#allocation2 + $0x68] sm:$0xf]  ;;  %v1294_v54 = vor.u32 %v1533_v46, %v1293_v42  ;;  %v1490_v55 = vor.u32 %v1578_v47, %v1487_v48  ;;  %v1548_v56 = vld [vmem:[#allocation2 + $0x12c] sm:$0xf]  ;;  %v1367_v57 = vld [vmem:[#allocation2 + $0x140] sm:$0xf0] }
  0x28   : > { %v301_v49 = vmax.f32 %v300_v40, 0.0  ;;  %752 = vmatpush.bf16.msra.mxu0 %v1238_v32  ;;  %v1527_v58 = vld [vmem:[#allocation2 + $0x7c] sm:$0xf0]  ;;  %v1572_v59 = vld [vmem:[#allocation2 + $0x1ec] sm:$0xf]  ;;  %v1370_v62 = vor.u32 %v1548_v56, %v1367_v57  ;;  %vm988_vm3 = vcmask 1044224  }
  0x29   : > { %800 = vmatpush.bf16.msrb.mxu1 %v1342_v22  ;;  %778 = vmatpush.bf16.msra.mxu2 %v1242_v36  ;;  %v1463_v60 = vld [vmem:[#allocation2 + $0x200] sm:$0xf0]  ;;  %v1397_v61 = vld [vmem:[#allocation2 + $0x160] sm:$0xf]  ;;  %v1558_v63 = vld [vmem:[#allocation2 + $0x174] sm:$0xf0]  ;;  %v1270_v0 = vor.u32 %v1527_v58, %v1269_v53 }
  0x2a   : > { %817 = vmatpush.bf16.msrb.mxu3 %v1438_v26  ;;  %303 = vst [vmem:[#allocation1] ss:$2 sm:$0xff] %v301_v49  ;;  %v1466_v1 = vor.u32 %v1572_v59, %v1463_v60  ;;  %v1245_v2 = vld [vmem:[#allocation2 + $0x38] sm:$0xf]  ;;  %v1521_v3 = vld [vmem:[#allocation2 + $0x4c] sm:$0xf0]  ;;  %v1398_v10 = vor.u32 %v1558_v63, %v1397_v61 }
  0x2b   : > { %v1542_v4 = vld [vmem:[#allocation2 + $0xfc] sm:$0xf]  ;;  %v1343_v5 = vld [vmem:[#allocation2 + $0x110] sm:$0xf0]  ;;  %v1373_v6 = vld [vmem:[#allocation2 + $0x130] sm:$0xf]  ;;  %v1246_v12 = vor.u32 %v1521_v3, %v1245_v2 }
  0x2c   : > { %753 = vmatpush.bf16.msra.mxu0 %v1214_v50  ;;  %v1566_v7 = vld [vmem:[#allocation2 + $0x1bc] sm:$0xf]  ;;  %v1439_v8 = vld [vmem:[#allocation2 + $0x1d0] sm:$0xf0]  ;;  %v1552_v14 = vld [vmem:[#allocation2 + $0x144] sm:$0xf0]  ;;  %v1346_v16 = vor.u32 %v1542_v4, %v1343_v5 }
  0x2d   : > { %801 = vmatpush.bf16.msrb.mxu1 %v1318_v41  ;;  %779 = vmatpush.bf16.msra.mxu2 %v1218_v51  ;;  %v1221_v17 = vld [vmem:[#allocation2 + $0x8] sm:$0xf]  ;;  %v1515_v18 = vld [vmem:[#allocation2 + $0x1c] sm:$0xf0]  ;;  %v1442_v19 = vor.u32 %v1566_v7, %v1439_v8  ;;  %v1536_v20 = vld [vmem:[#allocation2 + $0xcc] sm:$0xf]  ;;  %v1374_v26 = vor.u32 %v1552_v14, %v1373_v6 }
  0x2e   : > { %818 = vmatpush.bf16.msrb.mxu3 %v1414_v45  ;;  %v1319_v21 = vld [vmem:[#allocation2 + $0xe0] sm:$0xf0]  ;;  %v1560_v22 = vld [vmem:[#allocation2 + $0x18c] sm:$0xf]  ;;  %v1493_v25 = vld [vmem:[#allocation2 + $0x220] sm:$0xf]  ;;  %v1222_v32 = vor.u32 %v1515_v18, %v1221_v17 }
  0x2f   : > { %v1415_v23 = vld [vmem:[#allocation2 + $0x1a0] sm:$0xf0]  ;;  %v1399_v27 = vld [vmem:[#allocation2 + $0x178] sm:$0xf0]  ;;  %v1582_v28 = vld [vmem:[#allocation2 + $0x234] sm:$0xf0]  ;;  %v1322_v33 = vor.u32 %v1536_v20, %v1319_v21 }
  0x30   : > { %824 = vmatpush.bf16.msrb.mxu0 %v1394_v52  ;;  %v1555_v24 = vld [vmem:[#allocation2 + $0x164] sm:$0xf]  ;;  %v1727_v29 = vld [vmem:[%s1839_s4] sm:$0x3]  ;;  %v1349_v30 = vld [vmem:[#allocation2 + $0x100] sm:$0xf]  ;;  %v1418_v35 = vor.u32 %v1560_v22, %v1415_v23  ;;  %v1494_v38 = vor.u32 %v1582_v28, %v1493_v25 }
  0x31   : > { %802 = vmatpush.bf16.msrb.mxu1 %v1294_v54  ;;  %841 = vmatpush.bf16.msrb.mxu2 %v1490_v55  ;;  %v305_v9 = vld.sshfl [vmem:[#allocation1 + $0x8] sm:$0xff pattern:$0x75316420]  ;;  %v304_v11 = vld.sshfl [vmem:[#allocation1] sm:$0xff pattern:$0x75316420]  ;;  %v1402_v39 = vor.u32 %v1555_v24, %v1399_v27 }
  0x32   : > { %v1715_v13 = vpack.c.bf16 %v305_v9, %v305_v9  ;;  %v1717_v15 = vpack.c.bf16 %v304_v11, %v304_v11  ;;  %v1546_v31 = vld [vmem:[#allocation2 + $0x114] sm:$0xf0]  ;;  %v930_v34 = vperm.slane %v1727_v29, 0  ;;  %v1530_v36 = vld [vmem:[#allocation2 + $0x9c] sm:$0xf]  ;;  %v931_v52 = vperm.slane %v1727_v29, 1 }
  0x33   : > { %v1295_v37 = vld [vmem:[#allocation2 + $0xb0] sm:$0xf0]  ;;  %v1469_v40 = vld [vmem:[#allocation2 + $0x1f0] sm:$0xf]  ;;  %v1576_v41 = vld [vmem:[#allocation2 + $0x204] sm:$0xf0]  ;;  %v1350_v42 = vor.u32 %v1546_v31, %v1349_v30 }
  0x34   : > { %825 = vmatpush.bf16.msrb.mxu0 %v1370_v62  ;;  %1500 = vmatmul.msk.bf16.vlgmr.msra.gmra.mxu3 %vm742_vm1, %v1715_v13  ;;  %v1549_v43 = vld [vmem:[#allocation2 + $0x134] sm:$0xf]  ;;  %v1375_v44 = vld [vmem:[#allocation2 + $0x148] sm:$0xf0]  ;;  %v1325_v45 = vld [vmem:[#allocation2 + $0xd0] sm:$0xf]  ;;  %v1298_v47 = vor.u32 %v1530_v36, %v1295_v37  ;;  %v1470_v50 = vor.u32 %v1576_v41, %v1469_v40 }
  0x35   : > { %803 = vmatpush.bf16.msrb.mxu1 %v1270_v0  ;;  %842 = vmatpush.bf16.msrb.mxu2 %v1466_v1  ;;  %v1540_v46 = vld [vmem:[#allocation2 + $0xe4] sm:$0xf0]  ;;  %v1524_v48 = vld [vmem:[#allocation2 + $0x6c] sm:$0xf]  ;;  %v1271_v49 = vld [vmem:[#allocation2 + $0x80] sm:$0xf0]  ;;  %v1378_v51 = vor.u32 %v1549_v43, %v1375_v44 }
  0x36   : > { %1499 = vmatmul.msk.bf16.vlgmr.msra.gmra.mxu1 %vm742_vm1, %v1715_v13  ;;  %850 = vmatpush.bf16.msra.mxu3 %v1398_v10  ;;  %v1445_v53 = vld [vmem:[#allocation2 + $0x1c0] sm:$0xf]  ;;  %v1570_v54 = vld [vmem:[#allocation2 + $0x1d4] sm:$0xf0]  ;;  %v1326_v55 = vor.u32 %v1540_v46, %v1325_v45  ;;  %v1274_v58 = vor.u32 %v1524_v48, %v1271_v49  ;;  %v1543_v59 = vld [vmem:[#allocation2 + $0x104] sm:$0xf] }
  0x37   : > { %780 = vmatmul.bf16.vlgmr.msra.gmra.mxu2 %v1717_v15  ;;  %754 = vmatmul.bf16.vlgmr.msra.gmra.mxu0 %v1717_v15  ;;  %v1301_v56 = vld [vmem:[#allocation2 + $0xa0] sm:$0xf]  ;;  %v1534_v57 = vld [vmem:[#allocation2 + $0xb4] sm:$0xf0]  ;;  %v1351_v60 = vld [vmem:[#allocation2 + $0x118] sm:$0xf0]  ;;  %v1446_v63 = vor.u32 %v1570_v54, %v1445_v53 }
  0x38   : > { %826 = vmatpush.bf16.msrb.mxu0 %v1346_v16  ;;  %936 = vrot.lane.b32.xlu0 %v930_v34, %s1652_s16  ;;  %v1518_v61 = vld [vmem:[#allocation2 + $0x3c] sm:$0xf]  ;;  %v1247_v62 = vld [vmem:[#allocation2 + $0x50] sm:$0xf0]  ;;  %v1421_v0 = vld [vmem:[#allocation2 + $0x190] sm:$0xf]  ;;  %v1302_v2 = vor.u32 %v1534_v57, %v1301_v56  ;;  %v1354_v5 = vor.u32 %v1543_v59, %v1351_v60 }
  0x39   : > { %804 = vmatpush.bf16.msrb.mxu1 %v1246_v12  ;;  %843 = vmatpush.bf16.msrb.mxu2 %v1442_v19  ;;  %v1564_v1 = vld [vmem:[#allocation2 + $0x1a4] sm:$0xf0]  ;;  %v1277_v3 = vld [vmem:[#allocation2 + $0x70] sm:$0xf]  ;;  %v1250_v6 = vor.u32 %v1518_v61, %v1247_v62  ;;  %v1537_v7 = vld [vmem:[#allocation2 + $0xd4] sm:$0xf] }
  0x3a   : > { %851 = vmatpush.bf16.msra.mxu3 %v1374_v26  ;;  %v1528_v4 = vld [vmem:[#allocation2 + $0x84] sm:$0xf0]  ;;  %v1327_v8 = vld [vmem:[#allocation2 + $0xe8] sm:$0xf0]  ;;  %v1223_v10 = vld [vmem:[#allocation2 + $0x20] sm:$0xf0]  ;;  %v1422_v11 = vor.u32 %v1564_v1, %v1421_v0 }
  0x3b   : > { %v1512_v9 = vld [vmem:[#allocation2 + $0xc] sm:$0xf]  ;;  %v1579_v12 = vld [vmem:[#allocation2 + $0x224] sm:$0xf]  ;;  %v1495_v14 = vld [vmem:[#allocation2 + $0x238] sm:$0xf0]  ;;  %v1278_v16 = vor.u32 %v1528_v4, %v1277_v3  ;;  %v1330_v19 = vor.u32 %v1537_v7, %v1327_v8 }
  0x3c   : > { %827 = vmatpush.bf16.msrb.mxu0 %v1322_v33  ;;  %v1253_v17 = vld [vmem:[#allocation2 + $0x40] sm:$0xf]  ;;  %v1522_v18 = vld [vmem:[#allocation2 + $0x54] sm:$0xf0]  ;;  %v1226_v20 = vor.u32 %v1512_v9, %v1223_v10  ;;  %v1531_v21 = vld [vmem:[#allocation2 + $0xa4] sm:$0xf]  ;;  %v1498_v23 = vor.u32 %v1579_v12, %v1495_v14 }
  0x3d   : > { %805 = vmatpush.bf16.msrb.mxu1 %v1222_v32  ;;  %844 = vmatpush.bf16.msrb.mxu2 %v1418_v35  ;;  %v1303_v22 = vld [vmem:[#allocation2 + $0xb8] sm:$0xf0]  ;;  %v1573_v24 = vld [vmem:[#allocation2 + $0x1f4] sm:$0xf]  ;;  %v1471_v25 = vld [vmem:[#allocation2 + $0x208] sm:$0xf0]  ;;  %v1254_v26 = vor.u32 %v1522_v18, %v1253_v17 }
  0x3e   : > { %852 = vmatpush.bf16.msra.mxu3 %v1350_v42  ;;  %v1229_v27 = vld [vmem:[#allocation2 + $0x10] sm:$0xf]  ;;  %v1516_v28 = vld [vmem:[#allocation2 + $0x24] sm:$0xf0]  ;;  %v1306_v30 = vor.u32 %v1531_v21, %v1303_v22  ;;  %v1525_v31 = vld [vmem:[#allocation2 + $0x74] sm:$0xf]  ;;  %v1474_v33 = vor.u32 %v1573_v24, %v1471_v25 }
  0x3f   : > { %v1279_v32 = vld [vmem:[#allocation2 + $0x88] sm:$0xf0]  ;;  %v1567_v35 = vld [vmem:[#allocation2 + $0x1c4] sm:$0xf]  ;;  %v1447_v36 = vld [vmem:[#allocation2 + $0x1d8] sm:$0xf0]  ;;  %v1230_v37 = vor.u32 %v1516_v28, %v1229_v27 }
  0x40   : > { %828 = vmatpush.bf16.msrb.mxu0 %v1298_v47  ;;  %938 = vrot.lane.b32.xlu0 %v931_v52, %s1652_s16  ;;  %v1255_v40 = vld [vmem:[#allocation2 + $0x58] sm:$0xf0]  ;;  %v1450_v41 = vor.u32 %v1567_v35, %v1447_v36  ;;  %v1561_v42 = vld [vmem:[#allocation2 + $0x194] sm:$0xf]  ;;  %v1423_v43 = vld [vmem:[#allocation2 + $0x1a8] sm:$0xf0] }
  0x41   : > { %867 = vmatpush.bf16.msra.mxu1 %v1494_v38  ;;  %876 = vmatpush.bf16.msra.mxu2 %v1402_v39  ;;  %v1282_v38 = vor.u32 %v1525_v31, %v1279_v32  ;;  %v1519_v39 = vld [vmem:[#allocation2 + $0x44] sm:$0xf]  ;;  %v1513_v45 = vld [vmem:[#allocation2 + $0x14] sm:$0xf]  ;;  %v1231_v46 = vld [vmem:[#allocation2 + $0x28] sm:$0xf0]  ;;  %v1426_v47 = vor.u32 %v1561_v42, %v1423_v43 }
  0x42   : > { %853 = vmatpush.bf16.msra.mxu3 %v1326_v55  ;;  %v1258_v44 = vor.u32 %v1519_v39, %v1255_v40  ;;  %v1234_v48 = vor.u32 %v1513_v45, %v1231_v46  ;;  %vm940_vm4 = vcmask 785408   ;;  %vm1003_vm5 = vcmask 519168   ;;  %s1654_s18 = smov 64   ;;  %s1509_s19 = sshll.u32 %s1845_s25, 4 }
  0x43   : > { %vm921_vm6 = vcmask 1040384   ;;  %vm953_vm7 = vcmask 785412   ;;  %s276_s23 = scalar_lea.vmem %s1840_s5, %s1509_s19  ;;  %vm980_vm9 = vcmask 781312   ;;  %vm968_vm10 = vcmask 261120   ;;  %s1510_s24 = sshll.u32 %s1845_s25, 2 }
  0x44   : > { %829 = vmatpush.bf16.msrb.mxu0 %v1274_v58  ;;  %1501 = vmatmul.msk.bf16.vlgmr.msrb.gmra.mxu3 %vm742_vm1, %v1715_v13  ;;  %vm1806_vm8 = vmor %vm953_vm7, %vm289_vm0  ;;  %vm1092_vm11 = vcmask 1041408   ;;  %vm1095_vm12 = vcmask 781314   ;;  %s281_s28 = scalar_lea.vmem %s1841_s6, %s1510_s24 }
  0x45   : > { %868 = vmatpush.bf16.msra.mxu1 %v1470_v50  ;;  %877 = vmatpush.bf16.msra.mxu2 %v1378_v51  ;;  %vm1096_vm13 = vmor %vm1095_vm12, %vm1092_vm11 }
  0x46   : > { %806 = vmatmul.bf16.vlgmr.msrb.gmra.mxu1 %v1717_v15  ;;  %854 = vmatpush.bf16.msra.mxu3 %v1302_v2 }
  0x47   : > { %1502 = vmatmul.msk.bf16.vlgmr.msrb.gmra.mxu2 %vm742_vm1, %v1715_v13 }
  0x48   : > { %830 = vmatpush.bf16.msrb.mxu0 %v1250_v6 }
  0x49   : > { %869 = vmatpush.bf16.msra.mxu1 %v1446_v63  ;;  %878 = vmatpush.bf16.msra.mxu2 %v1354_v5 }
  0x4a   : > { %855 = vmatpush.bf16.msra.mxu3 %v1278_v16 }
  0x4c   : > { %831 = vmatpush.bf16.msrb.mxu0 %v1226_v20 }
  0x4d   : > { %870 = vmatpush.bf16.msra.mxu1 %v1422_v11  ;;  %879 = vmatpush.bf16.msra.mxu2 %v1330_v19 }
  0x4e   : > { %856 = vmatpush.bf16.msra.mxu3 %v1254_v26 }
  0x4f   : > { %832 = vmatmul.bf16.vlgmr.msrb.gmra.mxu0 %v1717_v15 }
  0x50   : > { %893 = vmatpush.bf16.msra.mxu0 %v1498_v23 }
  0x51   : > { %880 = vmatpush.bf16.msra.mxu2 %v1306_v30 }
  0x52   : > { %857 = vmatpush.bf16.msra.mxu3 %v1230_v37 }
  0x54   : > { %894 = vmatpush.bf16.msra.mxu0 %v1474_v33 }
  0x55   : > { %881 = vmatpush.bf16.msra.mxu2 %v1282_v38  ;;  %858 = vmatmul.bf16.vlgmr.msra.gmra.mxu3 %v1717_v15 }
  0x56   : > { %1503 = vmatmul.msk.bf16.vlgmr.msra.gmra.mxu1 %vm742_vm1, %v1715_v13 }
  0x58   : > { %895 = vmatpush.bf16.msra.mxu0 %v1450_v41 }
  0x59   : > { %882 = vmatpush.bf16.msra.mxu2 %v1258_v44 }
  0x5c   : > { %896 = vmatpush.bf16.msra.mxu0 %v1426_v47 }
  0x5d   : > { %883 = vmatpush.bf16.msra.mxu2 %v1234_v48 }
  0x5f   : > { %1504 = vmatmul.msk.bf16.vlgmr.msra.gmra.mxu0 %vm742_vm1, %v1715_v13 }
  0x60   : > { %884 = vmatmul.bf16.vlgmr.msra.gmra.mxu2 %v1717_v15 }
  0xaa   : > { %v937_v59 = vpop.permute.xlu0 %936 }
  0xb2   : > { %v939_v3 = vpop.permute.xlu0 %938 }
  0xb3   : > { %v768_v49 = vpop.f32.mrf.mxu1  ;;  %v941_v8 = vsel %vm940_vm4, %v937_v59, %v939_v3 }
  0xb4   : > { %v755_v50 = vpop.f32.mrf.mxu0 }
  0xb5   : > { %v769_v51 = vadd.f32 %v768_v49, %v755_v50 }
  0xb7   : > { %v794_v53 = vpop.f32.mrf.mxu3  ;;  %v1751_v54 = vsel %vm902_vm2, %v769_v51, 0.0 }
  0xba   : > { %v781_v55 = vpop.f32.mrf.mxu2 }
  0xbb   : > { %v770_v56 = vpop.f32.mrf.mxu1  ;;  %v795_v57 = vadd.f32 %v794_v53, %v781_v55 }
  0xbc   : > { %v757_v60 = vpop.f32.mrf.mxu0 }
  0xbd   : > { %v1754_v58 = vsel %vm902_vm2, %v795_v57, 0.0 }
  0xbe   : > { %v1757_v15 = vadd.f32 %v937_v59, %v1754_v58 }
  0xbf   : > { %v796_v61 = vpop.f32.mrf.mxu3 }
  0xc0   : > { %v1042_v13 = vmul.f32 %v1757_v15, %v1757_v15  ;;  %v989_v59 = vsel %vm988_vm3, %v1757_v15, 0.0 }
  0xc1   : > { %v990_v61 = vrot.slane %v989_v59, 4 }
  0xc2   : > { %v1045_v62 = vsel %vm988_vm3, %v1042_v13, 0.0  ;;  %v783_v63 = vpop.f32.mrf.mxu2 }
  0xc3   : > { %v1046_v0 = vrot.slane %v1045_v62, 4  ;;  %v807_v1 = vpop.f32.mrf.mxu1 }
  0xc5   : > { %v1047_v2 = vadd.f32 %v1046_v0, %v1045_v62 }
  0xc7   : > { %v1048_v4 = vrot.slane %v1047_v2, 2  ;;  %v820_v5 = vpop.f32.mrf.mxu3 }
  0xc8   : > { %v821_v7 = vadd.f32 %v820_v5, %v807_v1 }
  0xc9   : > { %v1049_v6 = vadd.f32 %v1048_v4, %v1047_v2  ;;  %v991_v4 = vadd.f32 %v990_v61, %v989_v59 }
  0xca   : > { %v846_v9 = vpop.f32.mrf.mxu2  ;;  %v926_v12 = vsel %vm902_vm2, %v821_v7, 0.0 }
  0xcb   : > { %v809_v10 = vpop.f32.mrf.mxu1  ;;  %v1050_v11 = vrot.slane %v1049_v6, 1  ;;  %v1763_v16 = vadd.f32 %v941_v8, %v926_v12 }
  0xcc   : > { %v833_v14 = vpop.f32.mrf.mxu0 }
  0xcd   : > { %v1051_v17 = vadd.f32 %v1050_v11, %v1049_v6  ;;  %v847_v18 = vadd.f32 %v846_v9, %v833_v14  ;;  %v1043_v19 = vmul.f32 %v1763_v16, %v1763_v16  ;;  %v996_v38 = vsel %vm289_vm0, %v1763_v16, 0.0 }
  0xce   : > { %v997_v43 = vrot.slane %v996_v38, 4  ;;  %v959_v7 = vrot.slane %v1763_v16, 4  ;;  %v992_v9 = vrot.slane %v991_v4, 2 }
  0xcf   : > { %1069 = vrot.lane.b32.xlu0 %v1051_v17, %s1653_s17  ;;  %v927_v20 = vsel %vm902_vm2, %v847_v18, 0.0  ;;  %v908_v21 = vrot.slane %v847_v18, 7  ;;  %v822_v23 = vpop.f32.mrf.mxu3  ;;  %v1052_v24 = vsel %vm289_vm0, %v1043_v19, 0.0 }
  0xd0   : > { %v947_v22 = vadd.f32 %v939_v3, %v927_v20  ;;  %v1053_v28 = vrot.slane %v1052_v24, 4  ;;  %v998_v57 = vadd.f32 %v997_v43, %v996_v38  ;;  %v960_v11 = vsel %vm289_vm0, %v1757_v15, %v959_v7 }
  0xd1   : > { %911 = vrot.lane.b32.xlu2 %v908_v21, %s1654_s18  ;;  %v993_v14 = vadd.f32 %v992_v9, %v991_v4 }
  0xd2   : > { %v1004_v25 = vsel %vm1003_vm5, %v947_v22, 0.0  ;;  %v1044_v26 = vmul.f32 %v947_v22, %v947_v22  ;;  %v848_v27 = vpop.f32.mrf.mxu2  ;;  %v1054_v33 = vadd.f32 %v1053_v28, %v1052_v24  ;;  %v999_v63 = vrot.slane %v998_v57, 2 }
  0xd3   : > { %v1005_v30 = vrot.slane %v1004_v25, 4  ;;  %v872_v31 = vpop.f32.mrf.mxu1  ;;  %v994_v17 = vrot.slane %v993_v14, 1 }
  0xd4   : > { %v835_v32 = vpop.f32.mrf.mxu0  ;;  %v1059_v35 = vsel %vm1003_vm5, %v1044_v26, 0.0  ;;  %v1055_v39 = vrot.slane %v1054_v33, 2  ;;  %v1000_v6 = vadd.f32 %v999_v63, %v998_v57 }
  0xd5   : > { %v1060_v36 = vrot.slane %v1059_v35, 4  ;;  %v1006_v37 = vadd.f32 %v1005_v30, %v1004_v25  ;;  %v995_v18 = vadd.f32 %v994_v17, %v993_v14 }
  0xd6   : > { %v1056_v41 = vadd.f32 %v1055_v39, %v1054_v33  ;;  %v1001_v8 = vrot.slane %v1000_v6, 1 }
  0xd7   : > { %v1061_v40 = vadd.f32 %v1060_v36, %v1059_v35  ;;  %v1007_v42 = vrot.slane %v1006_v37, 2 }
  0xd8   : > { %v859_v44 = vpop.f32.mrf.mxu3  ;;  %v1057_v47 = vrot.slane %v1056_v41, 1  ;;  %v1002_v12 = vadd.f32 %v1001_v8, %v1000_v6 }
  0xd9   : > { %v1062_v45 = vrot.slane %v1061_v40, 2  ;;  %v873_v46 = vadd.f32 %v872_v31, %v859_v44  ;;  %v1008_v55 = vadd.f32 %v1007_v42, %v1006_v37 }
  0xda   : > { %v1058_v51 = vadd.f32 %v1057_v47, %v1056_v41 }
  0xdb   : > { %v874_v48 = vpop.f32.mrf.mxu1  ;;  %v1063_v49 = vadd.f32 %v1062_v45, %v1061_v40  ;;  %v909_v50 = vrot.slane %v873_v46, 7  ;;  %v1009_v13 = vrot.slane %v1008_v55, 1 }
  0xdc   : > { %v898_v53 = vpop.f32.mrf.mxu0  ;;  %1071 = vrot.lane.b32.xlu2 %v1058_v51, %s1653_s17 }
  0xdd   : > { %v1064_v56 = vrot.slane %v1063_v49, 1  ;;  %913 = vrot.lane.b32.xlu1 %v909_v50, %s1654_s18  ;;  %v1010_v2 = vadd.f32 %v1009_v13, %v1008_v55 }
  0xdf   : > { %v1065_v60 = vadd.f32 %v1064_v56, %v1063_v49 }
  0xe0   : > { %v861_v62 = vpop.f32.mrf.mxu3 }
  0xe1   : > { %1073 = vrot.lane.b32.xlu0 %v1065_v60, %s1653_s17 }
  0xe3   : > { %v885_v0 = vpop.f32.mrf.mxu2 }
  0xe4   : > { %v899_v1 = vadd.f32 %v898_v53, %v885_v0  ;;  %v900_v3 = vpop.f32.mrf.mxu0  ;;  %1018 = vrot.lane.b32.xlu2 %v1010_v2, %s1653_s17 }
  0xe6   : > { %v910_v5 = vrot.slane %v899_v1, 7 }
  0xe8   : > { %915 = vrot.lane.b32.xlu1 %v910_v5, %s1654_s18 }
  0xe9   : > { %963 = vrot.lane.b32.xlu0 %v947_v22, %s1653_s17 }
  0xeb   : > { %v887_v10 = vpop.f32.mrf.mxu2 }
  0xec   : > { %961 = vrot.lane.b32.xlu2 %v960_v11, %s1653_s17 }
  0xf0   : > { %1016 = vrot.lane.b32.xlu1 %v1002_v12, %s1653_s17 }
  0xf8   : > { %1014 = vrot.lane.b32.xlu1 %v995_v18, %s1653_s17 }
 0x12b   : > { %v912_v19 = vpop.permute.xlu2 %911 }
 0x136   : > { %v1787_v20 = vpop.permute.xlu2 %1071 }
 0x13e   : > { %v1789_v21 = vpop.permute.xlu2 %1018 }
 0x141   : > { %v1070_v16 = vpop.permute.xlu0 %1069 }
 0x142   : > { %v1075_v7 = vsel %vm968_vm10, %v1070_v16, %v1787_v20 }
 0x146   : > { %v962_v30 = vpop.permute.xlu2 %961 }
 0x147   : > { %v965_v38 = vrot.slane %v962_v30, 4 }
 0x14f   : > { %v914_v22 = vpop.permute.xlu1 %913 }
 0x150   : > { %v917_v15 = vsel %vm742_vm1, %v912_v19, %v914_v22 }
 0x151   : > { %v922_v23 = vsel %vm921_vm6, 0.0, %v917_v15 }
 0x152   : > { %v924_v24 = vadd.f32 %v922_v23, %v1751_v54 }
 0x153   : > { %v1074_v25 = vpop.permute.xlu0 %1073 }
 0x154   : > { %v934_v26 = vadd.f32 %v930_v34, %v924_v24  ;;  %v1076_v8 = vsel %vm968_vm10, %v1787_v20, %v1074_v25 }
 0x156   : > { %v1026_v27 = vmul.f32 %v934_v26, %v934_v26  ;;  %v973_v28 = vsel %vm289_vm0, %v934_v26, 0.0 }
 0x157   : > { %v974_v54 = vrot.slane %v973_v28, 4 }
 0x158   : > { %v1028_v31 = vsel %vm289_vm0, %v1026_v27, 0.0 }
 0x159   : > { %v1029_v33 = vrot.slane %v1028_v31, 4  ;;  %v975_v45 = vadd.f32 %v974_v54, %v973_v28 }
 0x15a   : > { %v916_v32 = vpop.permute.xlu1 %915 }
 0x15b   : > { %v918_v35 = vsel %vm742_vm1, %v914_v22, %v916_v32  ;;  %v964_v37 = vpop.permute.xlu0 %963  ;;  %v1030_v39 = vadd.f32 %v1029_v33, %v1028_v31  ;;  %v976_v56 = vrot.slane %v975_v45, 2 }
 0x15c   : > { %v923_v36 = vsel %vm921_vm6, 0.0, %v918_v35  ;;  %v966_v40 = vrot.slane %v964_v37, 4 }
 0x15d   : > { %v925_v34 = vadd.f32 %v923_v36, %v1754_v58  ;;  %v1031_v44 = vrot.slane %v1030_v39, 2  ;;  %v977_v61 = vadd.f32 %v976_v56, %v975_v45 }
 0x15e   : > { %v967_v43 = vsel %vm289_vm0, %v965_v38, %v966_v40 }
 0x15f   : > { %v935_v42 = vadd.f32 %v931_v52, %v925_v34  ;;  %v969_v58 = vsel %vm968_vm10, %v962_v30, %v967_v43  ;;  %v1032_v55 = vadd.f32 %v1031_v44, %v1030_v39  ;;  %v978_v2 = vrot.slane %v977_v61, 1 }
 0x160   : > { %1505 = vst.msk [vmem:[%s276_s23 + $0x8] sm:$0xff] %vm1806_vm8, %v969_v58 }
 0x161   : > { %v950_v46 = vrot.slane %v935_v42, 4  ;;  %v1027_v47 = vmul.f32 %v935_v42, %v935_v42  ;;  %v981_v48 = vsel %vm980_vm9, %v935_v42, 0.0  ;;  %v1033_v62 = vrot.slane %v1032_v55, 1 }
 0x162   : > { %v982_v49 = vrot.slane %v981_v48, 4  ;;  %v1017_v50 = vpop.permute.xlu1 %1016  ;;  %v979_v11 = vadd.f32 %v978_v2, %v977_v61 }
 0x163   : > { %v951_v51 = vsel %vm289_vm0, %v934_v26, %v950_v46  ;;  %v1035_v53 = vsel %vm980_vm9, %v1027_v47, 0.0  ;;  %v1034_v3 = vadd.f32 %v1033_v62, %v1032_v55  ;;  %v1021_v14 = vsel %vm968_vm10, %v1017_v50, %v1789_v21 }
 0x164   : > { %955 = vst.msk [vmem:[%s276_s23] sm:$0xff] %vm1806_vm8, %v951_v51  ;;  %v983_v29 = vadd.f32 %v982_v49, %v981_v48  ;;  %v1036_v52 = vrot.slane %v1035_v53, 4 }
 0x165   : > { %v1079_v12 = vadd.f32 %v1075_v7, %v1034_v3 }
 0x166   : > { %v984_v57 = vrot.slane %v983_v29, 2  ;;  %v1037_v59 = vadd.f32 %v1036_v52, %v1035_v53 }
 0x167   : > { %v1083_v16 = vrot.slane %v1079_v12, 7 }
 0x168   : > { %v985_v60 = vadd.f32 %v984_v57, %v983_v29  ;;  %v1038_v13 = vrot.slane %v1037_v59, 2 }
 0x16a   : > { %v986_v63 = vrot.slane %v985_v60, 1  ;;  %v1039_v0 = vadd.f32 %v1038_v13, %v1037_v59  ;;  %v1015_v4 = vpop.permute.xlu1 %1014 }
 0x16b   : > { %v1020_v9 = vsel %vm968_vm10, %v1015_v4, %v1017_v50 }
 0x16c   : > { %v1040_v1 = vrot.slane %v1039_v0, 1  ;;  %v987_v5 = vadd.f32 %v986_v63, %v985_v60  ;;  %v1024_v19 = vadd.f32 %v1020_v9, %v979_v11 }
 0x16e   : > { %v1041_v6 = vadd.f32 %v1040_v1, %v1039_v0  ;;  %v1025_v18 = vadd.f32 %v1021_v14, %v987_v5  ;;  %v1087_v20 = vsel %vm921_vm6, %v1024_v19, %v1083_v16 }
 0x170   : > { %v1080_v10 = vadd.f32 %v1076_v8, %v1041_v6 }
 0x172   : > { %v1084_v17 = vrot.slane %v1080_v10, 7 }
 0x174   : > { %v1088_v22 = vsel %vm921_vm6, %v1025_v18, %v1084_v17 }
 0x175   : > { %v1091_v15 = vrot.slane %v1088_v22, 6 }
 0x177   : > { %v1093_v23 = vsel %vm1092_vm11, %v1087_v20, %v1091_v15 }
 0x178   : > { %1097 = vst.msk [vmem:[%s281_s28] sm:$0xf] %vm1096_vm13, %v1093_v23 }
 0x179 PF: > { %s18_s21 = sadd.s32 1, %s1647_s21  }
 0x17a   : > { %p15_p7 = scmp.ge.s32.totalorder %s18_s21, 4  }
 0x17c   :  { %17 = sbr.rel (!%p15_p7) target bundleno = 1 (0x1), region = 88 }
 0x181   :  { %1135 = vsyncpa [#allocation3], 1 }
 0x182   :  { %1137 = vsyncpa [#allocation3 + $0x1], 1 }

// kernel: _lambda_.7
= control target key start
LH: loop header
LB: loop body
LE: loop exit
PB: predicated region body
PF: predicated region fallthrough
CT: control target
= control target key end

     0   :  { %12 = vsyncpa [#allocation3], 0  ;;  %s1807_s21 = smov 0   ;;  %s1945_s0 = inlined_call_operand.vmem [shape: f32[2,7,224], index: 0, kind: input, shape index: {}]   ;;  %s1946_s1 = inlined_call_operand.vmem [shape: f32[1,224], index: 1, kind: input, shape index: {}]   ;;  %s1947_s2 = inlined_call_operand.vmem [shape: f32[1,224], index: 2, kind: input, shape index: {}]   ;;  %s1948_s3 = inlined_call_operand.hbm [shape: bf16[224,720], index: 3, kind: input, shape index: {}]   ;;  %s1949_s4 = inlined_call_operand.vmem [shape: f32[1,240], index: 4, kind: input, shape index: {}]   ;;  %s1950_s5 = inlined_call_operand.vmem [shape: f32[2,2,8,240], index: 5, kind: output, shape index: {0}]   ;;  %s1951_s6 = inlined_call_operand.vmem [shape: f32[2,2,240], index: 6, kind: output, shape index: {1}]  }
   0x1 LB: > { %s202_s24 = sshll.u32 %s1948_s3, 4  ;;  %s1816_s25 = sadd.s32 4294967295, %s1764_s21   ;;  %s1764_s21 = sphi %s1807_s21, %s18_s21   ;;  %s203_s24 = int_to_ptr.hbm [resolvable:$true] %s202_s24 }
   0x2   : > { %p1256_p0 = scmp.ge.s32.totalorder %s1764_s21, 1  ;;  %p185_p1 = scmp.lt.s32.totalorder %s1764_s21, 3 }
   0x3   : > { %p1708_p2 = scmp.eq.s32.totalorder %s1816_s25, 0  ;;  %s1766_s26 = smov [#allocation2]  }
   0x4   : > { %p186_p3 = pnand %p1256_p0, %p185_p1  ;;  %s204_s27 = sshll.u32 %s1766_s26, 4  ;;  %s205_s27 = int_to_ptr.vmem [resolvable:$true] %s204_s27 }
   0x5   : > { %s1767_s28 = smov 384   ;;  %s1768_s29 = smov 24  }
   0x6   : > { %p1704_p4 = pneg %p186_p3  ;;  %231 = sbr.rel (%p186_p3) target bundleno = 386 (0x182), region = 40 }
   0x8   : > { %p1705_p5 = pnand %p1708_p2, %p1704_p4 }
   0xa   : > { %1707 = dma.hbm_to_vmem [thread:$0]  (!%p1705_p5), %s203_s24, 10752, %s205_s27, [#allocation3], %s1767_s28, %s1767_s28, %s1768_s29  }
   0xb   : > { %1759 = dma.done.wait (%p1708_p2), [#allocation3], 10752  }
   0xc   : > { %1761 = vsyncadd (%p1708_p2), [#allocation3], 4294956544  ;;  %p267_p6 = scmp.lt.s32.totalorder %s1816_s25, 1  ;;  %v1437_v0 = vld [vmem:[#allocation2 + $0x150] sm:$0xf]  ;;  %vm809_vm0 = vcmask 785408  }
   0xd   : > { %v1661_v1 = vld [vmem:[#allocation2 + $0x164] sm:$0xf0]  ;;  %v1581_v2 = vld [vmem:[#allocation2 + $0x270] sm:$0xf]  ;;  %v1658_v5 = vld [vmem:[#allocation2 + $0x154] sm:$0xf] }
   0xe   : > { %v1438_v3 = vor.u32 %v1661_v1, %v1437_v0  ;;  %v1697_v4 = vld [vmem:[#allocation2 + $0x284] sm:$0xf0]  ;;  %v1439_v6 = vld [vmem:[#allocation2 + $0x168] sm:$0xf0]  ;;  %v1694_v9 = vld [vmem:[#allocation2 + $0x274] sm:$0xf] }
   0xf   : > { %v1582_v7 = vor.u32 %v1697_v4, %v1581_v2  ;;  %v1442_v8 = vor.u32 %v1658_v5, %v1439_v6  ;;  %v1583_v10 = vld [vmem:[#allocation2 + $0x288] sm:$0xf0]  ;;  %v1413_v11 = vld [vmem:[#allocation2 + $0x120] sm:$0xf]  ;;  %v1655_v13 = vld [vmem:[#allocation2 + $0x134] sm:$0xf0] }
  0x10   : > { %813 = vmatpush.bf16.msra.mxu0 %v1438_v3  ;;  %v1586_v12 = vor.u32 %v1694_v9, %v1583_v10  ;;  %v1557_v14 = vld [vmem:[#allocation2 + $0x240] sm:$0xf]  ;;  %v1691_v15 = vld [vmem:[#allocation2 + $0x254] sm:$0xf0]  ;;  %v1414_v16 = vor.u32 %v1655_v13, %v1413_v11  ;;  %v1652_v18 = vld [vmem:[#allocation2 + $0x124] sm:$0xf] }
  0x11   : > { %828 = vmatpush.bf16.msra.mxu1 %v1582_v7  ;;  %839 = vmatpush.bf16.msra.mxu2 %v1442_v8  ;;  %v1558_v17 = vor.u32 %v1691_v15, %v1557_v14  ;;  %v1415_v19 = vld [vmem:[#allocation2 + $0x138] sm:$0xf0]  ;;  %v1688_v20 = vld [vmem:[#allocation2 + $0x244] sm:$0xf]  ;;  %v1389_v23 = vld [vmem:[#allocation2 + $0xf0] sm:$0xf] }
  0x12   : > { %854 = vmatpush.bf16.msra.mxu3 %v1586_v12  ;;  %v1418_v21 = vor.u32 %v1652_v18, %v1415_v19  ;;  %v1559_v22 = vld [vmem:[#allocation2 + $0x258] sm:$0xf0]  ;;  %v1649_v24 = vld [vmem:[#allocation2 + $0x104] sm:$0xf0]  ;;  %v1533_v26 = vld [vmem:[#allocation2 + $0x210] sm:$0xf] }
  0x13   : > { %v1562_v25 = vor.u32 %v1688_v20, %v1559_v22  ;;  %v1685_v27 = vld [vmem:[#allocation2 + $0x224] sm:$0xf0]  ;;  %v1646_v28 = vld [vmem:[#allocation2 + $0xf4] sm:$0xf]  ;;  %v1390_v29 = vor.u32 %v1649_v24, %v1389_v23  ;;  %v1391_v30 = vld [vmem:[#allocation2 + $0x108] sm:$0xf0] }
  0x14   : > { %814 = vmatpush.bf16.msra.mxu0 %v1414_v16  ;;  %v1682_v31 = vld [vmem:[#allocation2 + $0x214] sm:$0xf]  ;;  %v1535_v32 = vld [vmem:[#allocation2 + $0x228] sm:$0xf0]  ;;  %v1534_v33 = vor.u32 %v1685_v27, %v1533_v26  ;;  %v1394_v34 = vor.u32 %v1646_v28, %v1391_v30  ;;  %v1365_v35 = vld [vmem:[#allocation2 + $0xc0] sm:$0xf] }
  0x15   : > { %829 = vmatpush.bf16.msra.mxu1 %v1558_v17  ;;  %840 = vmatpush.bf16.msra.mxu2 %v1418_v21  ;;  %v1643_v36 = vld [vmem:[#allocation2 + $0xd4] sm:$0xf0]  ;;  %v1509_v37 = vld [vmem:[#allocation2 + $0x1e0] sm:$0xf]  ;;  %v1538_v38 = vor.u32 %v1682_v31, %v1535_v32  ;;  %v1640_v40 = vld [vmem:[#allocation2 + $0xc4] sm:$0xf] }
  0x16   : > { %855 = vmatpush.bf16.msra.mxu3 %v1562_v25  ;;  %v1679_v39 = vld [vmem:[#allocation2 + $0x1f4] sm:$0xf0]  ;;  %v1367_v41 = vld [vmem:[#allocation2 + $0xd8] sm:$0xf0]  ;;  %v1676_v42 = vld [vmem:[#allocation2 + $0x1e4] sm:$0xf]  ;;  %v1366_v44 = vor.u32 %v1643_v36, %v1365_v35 }
  0x17   : > { %v1511_v43 = vld [vmem:[#allocation2 + $0x1f8] sm:$0xf0]  ;;  %s1953_s25 = smov (!%p267_p6, %s1816_s25), 1  ;;  %v1510_v45 = vor.u32 %v1679_v39, %v1509_v37  ;;  %v1370_v46 = vor.u32 %v1640_v40, %v1367_v41  ;;  %v1341_v47 = vld [vmem:[#allocation2 + $0x90] sm:$0xf]  ;;  %s1769_s16 = smov 112  }
  0x18   : > { %815 = vmatpush.bf16.msra.mxu0 %v1390_v29  ;;  %v1637_v48 = vld [vmem:[#allocation2 + $0xa4] sm:$0xf0]  ;;  %v1485_v49 = vld [vmem:[#allocation2 + $0x1b0] sm:$0xf]  ;;  %v1514_v50 = vor.u32 %v1676_v42, %v1511_v43  ;;  %v1634_v52 = vld [vmem:[#allocation2 + $0x94] sm:$0xf] }
  0x19   : > { %830 = vmatpush.bf16.msra.mxu1 %v1534_v33  ;;  %841 = vmatpush.bf16.msra.mxu2 %v1394_v34  ;;  %v1673_v51 = vld [vmem:[#allocation2 + $0x1c4] sm:$0xf0]  ;;  %v1343_v53 = vld [vmem:[#allocation2 + $0xa8] sm:$0xf0]  ;;  %v1670_v54 = vld [vmem:[#allocation2 + $0x1b4] sm:$0xf]  ;;  %v1342_v56 = vor.u32 %v1637_v48, %v1341_v47 }
  0x1a   : > { %856 = vmatpush.bf16.msra.mxu3 %v1538_v38  ;;  %v1487_v55 = vld [vmem:[#allocation2 + $0x1c8] sm:$0xf0]  ;;  %v1317_v57 = vld [vmem:[#allocation2 + $0x60] sm:$0xf]  ;;  %s1613_s30 = sshll.u32 %s1953_s25, 4  ;;  %v1486_v58 = vor.u32 %v1673_v51, %v1485_v49  ;;  %v1346_v59 = vor.u32 %v1634_v52, %v1343_v53  ;;  %vm969_vm1 = vcmask 1046528  }
  0x1b   : > { %v1631_v60 = vld [vmem:[#allocation2 + $0x74] sm:$0xf0]  ;;  %v1461_v61 = vld [vmem:[#allocation2 + $0x180] sm:$0xf]  ;;  %v1490_v63 = vor.u32 %v1670_v54, %v1487_v55  ;;  %v1628_v0 = vld [vmem:[#allocation2 + $0x64] sm:$0xf]  ;;  %s271_s9 = scalar_lea.vmem %s1945_s0, %s1613_s30 }
  0x1c   : > { %816 = vmatpush.bf16.msra.mxu0 %v1366_v44  ;;  %v1667_v62 = vld [vmem:[#allocation2 + $0x194] sm:$0xf0]  ;;  %v1319_v1 = vld [vmem:[#allocation2 + $0x78] sm:$0xf0]  ;;  %v1664_v2 = vld [vmem:[#allocation2 + $0x184] sm:$0xf]  ;;  %v1318_v6 = vor.u32 %v1631_v60, %v1317_v57 }
  0x1d   : > { %831 = vmatpush.bf16.msra.mxu1 %v1510_v45  ;;  %842 = vmatpush.bf16.msra.mxu2 %v1370_v46  ;;  %v1463_v3 = vld [vmem:[#allocation2 + $0x198] sm:$0xf0]  ;;  %v1445_v4 = vld [vmem:[#allocation2 + $0x158] sm:$0xf]  ;;  %v1662_v5 = vld [vmem:[#allocation2 + $0x16c] sm:$0xf0]  ;;  %v1462_v10 = vor.u32 %v1667_v62, %v1461_v61  ;;  %v1322_v11 = vor.u32 %v1628_v0, %v1319_v1 }
  0x1e   : > { %857 = vmatpush.bf16.msra.mxu3 %v1514_v50  ;;  %v1589_v7 = vld [vmem:[#allocation2 + $0x278] sm:$0xf]  ;;  %v1698_v8 = vld [vmem:[#allocation2 + $0x28c] sm:$0xf0]  ;;  %v1625_v12 = vld [vmem:[#allocation2 + $0x44] sm:$0xf0]  ;;  %v1466_v15 = vor.u32 %v1664_v2, %v1463_v3  ;;  %v1446_v16 = vor.u32 %v1662_v5, %v1445_v4 }
  0x1f   : > { %v1293_v9 = vld [vmem:[#allocation2 + $0x30] sm:$0xf]  ;;  %v1622_v13 = vld [vmem:[#allocation2 + $0x34] sm:$0xf]  ;;  %v1295_v14 = vld [vmem:[#allocation2 + $0x48] sm:$0xf0]  ;;  %v1590_v20 = vor.u32 %v1698_v8, %v1589_v7 }
  0x20   : > { %817 = vmatpush.bf16.msra.mxu0 %v1342_v56  ;;  %v1421_v17 = vld [vmem:[#allocation2 + $0x128] sm:$0xf]  ;;  %v1656_v18 = vld [vmem:[#allocation2 + $0x13c] sm:$0xf0]  ;;  %v1619_v23 = vld [vmem:[#allocation2 + $0x14] sm:$0xf0]  ;;  %v1294_v24 = vor.u32 %v1625_v12, %v1293_v9  ;;  %v1298_v29 = vor.u32 %v1622_v13, %v1295_v14 }
  0x21   : > { %832 = vmatpush.bf16.msra.mxu1 %v1486_v58  ;;  %843 = vmatpush.bf16.msra.mxu2 %v1346_v59  ;;  %v1565_v19 = vld [vmem:[#allocation2 + $0x248] sm:$0xf]  ;;  %v1692_v21 = vld [vmem:[#allocation2 + $0x25c] sm:$0xf0]  ;;  %v1616_v25 = vld [vmem:[#allocation2 + $0x4] sm:$0xf]  ;;  %v1422_v30 = vor.u32 %v1656_v18, %v1421_v17 }
  0x22   : > { %858 = vmatpush.bf16.msra.mxu3 %v1490_v63  ;;  %v1269_v22 = vld [vmem:[#allocation2] sm:$0xf]  ;;  %v1271_v26 = vld [vmem:[#allocation2 + $0x18] sm:$0xf0]  ;;  %v1447_v28 = vld [vmem:[#allocation2 + $0x170] sm:$0xf0]  ;;  %v1566_v40 = vor.u32 %v1692_v21, %v1565_v19 }
  0x23   : > { %v1659_v27 = vld [vmem:[#allocation2 + $0x15c] sm:$0xf]  ;;  %v1397_v31 = vld [vmem:[#allocation2 + $0xf8] sm:$0xf]  ;;  %v283_v32 = vld [vmem:[%s271_s9] sm:$0x7f]  ;;  %v1270_v44 = vor.u32 %v1619_v23, %v1269_v22  ;;  %v1274_v49 = vor.u32 %v1616_v25, %v1271_v26 }
  0x24   : > { %818 = vmatpush.bf16.msra.mxu0 %v1318_v6  ;;  %v285_v33 = vld [vmem:[%s1946_s1] sm:$0x3]  ;;  %v284_v37 = vld [vmem:[%s271_s9 + $0x8] sm:$0x7f]  ;;  %v1650_v41 = vld [vmem:[#allocation2 + $0x10c] sm:$0xf0]  ;;  %v1450_v50 = vor.u32 %v1659_v27, %v1447_v28 }
  0x25   : > { %833 = vmatpush.bf16.msra.mxu1 %v1462_v10  ;;  %844 = vmatpush.bf16.msra.mxu2 %v1322_v11  ;;  %v293_v34 = vld [vmem:[%s1947_s2] sm:$0x3]  ;;  %v287_v35 = vperm.slane %v285_v33, 0  ;;  %v288_v38 = vperm.slane %v285_v33, 1  ;;  %v1695_v42 = vld [vmem:[#allocation2 + $0x27c] sm:$0xf]  ;;  %v1398_v52 = vor.u32 %v1650_v41, %v1397_v31 }
  0x26   : > { %859 = vmatpush.bf16.msra.mxu3 %v1466_v15  ;;  %v295_v36 = vperm.slane %v293_v34, 0  ;;  %v296_v39 = vperm.slane %v293_v34, 1  ;;  %v1591_v43 = vld [vmem:[#allocation2 + $0x290] sm:$0xf0]  ;;  %v1541_v45 = vld [vmem:[#allocation2 + $0x218] sm:$0xf] }
  0x27   : > { %v1686_v46 = vld [vmem:[#allocation2 + $0x22c] sm:$0xf0]  ;;  %v291_v47 = vmul.f32 %v287_v35, %v283_v32  ;;  %v292_v48 = vmul.f32 %v288_v38, %v284_v37  ;;  %v1373_v51 = vld [vmem:[#allocation2 + $0xc8] sm:$0xf]  ;;  %v1594_v53 = vor.u32 %v1695_v42, %v1591_v43  ;;  %v1644_v56 = vld [vmem:[#allocation2 + $0xdc] sm:$0xf0] }
  0x28   : > { %819 = vmatpush.bf16.msra.mxu0 %v1294_v24  ;;  %v1653_v57 = vld [vmem:[#allocation2 + $0x12c] sm:$0xf]  ;;  %v1423_v58 = vld [vmem:[#allocation2 + $0x140] sm:$0xf0]  ;;  %v1542_v59 = vor.u32 %v1686_v46, %v1541_v45  ;;  %v1517_v0 = vld [vmem:[#allocation2 + $0x1e8] sm:$0xf]  ;;  %v1374_v2 = vor.u32 %v1644_v56, %v1373_v51 }
  0x29   : > { %865 = vmatpush.bf16.msrb.mxu1 %v1446_v16  ;;  %845 = vmatpush.bf16.msra.mxu2 %v1298_v29  ;;  %v299_v54 = vadd.f32 %v295_v36, %v291_v47  ;;  %v300_v55 = vadd.f32 %v296_v39, %v292_v48  ;;  %v1689_v60 = vld [vmem:[#allocation2 + $0x24c] sm:$0xf]  ;;  %v1567_v61 = vld [vmem:[#allocation2 + $0x260] sm:$0xf0]  ;;  %v1680_v1 = vld [vmem:[#allocation2 + $0x1fc] sm:$0xf0]  ;;  %v1426_v3 = vor.u32 %v1653_v57, %v1423_v58 }
  0x2a   : > { %880 = vmatpush.bf16.msrb.mxu3 %v1590_v20  ;;  %v1570_v6 = vor.u32 %v1689_v60, %v1567_v61  ;;  %v1349_v7 = vld [vmem:[#allocation2 + $0x98] sm:$0xf]  ;;  %v1647_v8 = vld [vmem:[#allocation2 + $0xfc] sm:$0xf]  ;;  %v1399_v9 = vld [vmem:[#allocation2 + $0x110] sm:$0xf0]  ;;  %v1518_v10 = vor.u32 %v1680_v1, %v1517_v0 }
  0x2b   : > { %v301_v62 = vmax.f32 %v299_v54, 0.0  ;;  %v302_v63 = vmax.f32 %v300_v55, 0.0  ;;  %v1638_v11 = vld [vmem:[#allocation2 + $0xac] sm:$0xf0]  ;;  %v1683_v12 = vld [vmem:[#allocation2 + $0x21c] sm:$0xf]  ;;  %v1402_v16 = vor.u32 %v1647_v8, %v1399_v9 }
  0x2c   : > { %820 = vmatpush.bf16.msra.mxu0 %v1270_v44  ;;  %v1543_v13 = vld [vmem:[#allocation2 + $0x230] sm:$0xf0]  ;;  %v1493_v14 = vld [vmem:[#allocation2 + $0x1b8] sm:$0xf]  ;;  %v1674_v15 = vld [vmem:[#allocation2 + $0x1cc] sm:$0xf0]  ;;  %v1350_v17 = vor.u32 %v1638_v11, %v1349_v7 }
  0x2d   : > { %866 = vmatpush.bf16.msrb.mxu1 %v1422_v30  ;;  %846 = vmatpush.bf16.msra.mxu2 %v1274_v49  ;;  %v1839_v4 = vpack.c.bf16 %v301_v62, %v301_v62  ;;  %v1841_v5 = vpack.c.bf16 %v302_v63, %v302_v63  ;;  %v1546_v18 = vor.u32 %v1683_v12, %v1543_v13  ;;  %v1325_v19 = vld [vmem:[#allocation2 + $0x68] sm:$0xf]  ;;  %v1641_v20 = vld [vmem:[#allocation2 + $0xcc] sm:$0xf]  ;;  %v1375_v21 = vld [vmem:[#allocation2 + $0xe0] sm:$0xf0] }
  0x2e   : > { %881 = vmatpush.bf16.msrb.mxu3 %v1566_v40  ;;  %v1494_v22 = vor.u32 %v1674_v15, %v1493_v14  ;;  %v1632_v23 = vld [vmem:[#allocation2 + $0x7c] sm:$0xf0]  ;;  %v1677_v24 = vld [vmem:[#allocation2 + $0x1ec] sm:$0xf]  ;;  %v1519_v25 = vld [vmem:[#allocation2 + $0x200] sm:$0xf0]  ;;  %v1378_v28 = vor.u32 %v1641_v20, %v1375_v21 }
  0x2f   : > { %1604 = vmatmul.msk.bf16.vlgmr.msra.gmra.mxu3 %vm809_vm0, %v1841_v5  ;;  %1603 = vmatmul.msk.bf16.vlgmr.msra.gmra.mxu1 %vm809_vm0, %v1841_v5  ;;  %v1469_v26 = vld [vmem:[#allocation2 + $0x188] sm:$0xf]  ;;  %v1668_v27 = vld [vmem:[#allocation2 + $0x19c] sm:$0xf0]  ;;  %v1663_v30 = vld [vmem:[#allocation2 + $0x174] sm:$0xf0]  ;;  %v1326_v32 = vor.u32 %v1632_v23, %v1325_v19  ;;  %v1522_v33 = vor.u32 %v1677_v24, %v1519_v25 }
  0x30   : > { %891 = vmatpush.bf16.msrb.mxu0 %v1450_v50  ;;  %847 = vmatmul.bf16.vlgmr.msra.gmra.mxu2 %v1839_v4  ;;  %v1453_v29 = vld [vmem:[#allocation2 + $0x160] sm:$0xf]  ;;  %v1301_v31 = vld [vmem:[#allocation2 + $0x38] sm:$0xf]  ;;  %v1626_v34 = vld [vmem:[#allocation2 + $0x4c] sm:$0xf0]  ;;  %v1470_v37 = vor.u32 %v1668_v27, %v1469_v26 }
  0x31   : > { %867 = vmatpush.bf16.msrb.mxu1 %v1398_v52  ;;  %906 = vmatpush.bf16.msrb.mxu2 %v1594_v53  ;;  %v1635_v35 = vld [vmem:[#allocation2 + $0x9c] sm:$0xf]  ;;  %v1351_v36 = vld [vmem:[#allocation2 + $0xb0] sm:$0xf0]  ;;  %v1852_v40 = vld [vmem:[%s1949_s4] sm:$0x3]  ;;  %v1454_v41 = vor.u32 %v1663_v30, %v1453_v29  ;;  %v1302_v47 = vor.u32 %v1626_v34, %v1301_v31 }
  0x32   : > { %882 = vmatpush.bf16.msrb.mxu3 %v1542_v59  ;;  %821 = vmatmul.bf16.vlgmr.msra.gmra.mxu0 %v1839_v4  ;;  %v1671_v38 = vld [vmem:[#allocation2 + $0x1bc] sm:$0xf]  ;;  %v1495_v39 = vld [vmem:[#allocation2 + $0x1d0] sm:$0xf0]  ;;  %v998_v42 = vperm.slane %v1852_v40, 0  ;;  %v1354_v43 = vor.u32 %v1635_v35, %v1351_v36  ;;  %vm1048_vm2 = vcmask 1048448  }
  0x33   : > { %v1429_v44 = vld [vmem:[#allocation2 + $0x130] sm:$0xf]  ;;  %v1657_v45 = vld [vmem:[#allocation2 + $0x144] sm:$0xf0]  ;;  %v1498_v48 = vor.u32 %v1671_v38, %v1495_v39  ;;  %v1620_v49 = vld [vmem:[#allocation2 + $0x1c] sm:$0xf0] }
  0x34   : > { %892 = vmatpush.bf16.msrb.mxu0 %v1426_v3  ;;  %v1277_v46 = vld [vmem:[#allocation2 + $0x8] sm:$0xf]  ;;  %v1629_v50 = vld [vmem:[#allocation2 + $0x6c] sm:$0xf]  ;;  %v1327_v51 = vld [vmem:[#allocation2 + $0x80] sm:$0xf0]  ;;  %1004 = vrot.lane.b32.xlu0 %v998_v42, %s1769_s16  ;;  %v1430_v55 = vor.u32 %v1657_v45, %v1429_v44 }
  0x35   : > { %868 = vmatpush.bf16.msrb.mxu1 %v1374_v2  ;;  %907 = vmatpush.bf16.msrb.mxu2 %v1570_v6  ;;  %v1665_v52 = vld [vmem:[#allocation2 + $0x18c] sm:$0xf]  ;;  %v1471_v53 = vld [vmem:[#allocation2 + $0x1a0] sm:$0xf0]  ;;  %v1597_v54 = vld [vmem:[#allocation2 + $0x280] sm:$0xf]  ;;  %v1330_v59 = vor.u32 %v1629_v50, %v1327_v51  ;;  %v1278_v62 = vor.u32 %v1620_v49, %v1277_v46 }
  0x36   : > { %883 = vmatpush.bf16.msrb.mxu3 %v1518_v10  ;;  %v1699_v56 = vld [vmem:[#allocation2 + $0x294] sm:$0xf0]  ;;  %v1660_v57 = vld [vmem:[#allocation2 + $0x164] sm:$0xf]  ;;  %v1455_v58 = vld [vmem:[#allocation2 + $0x178] sm:$0xf0]  ;;  %v1474_v63 = vor.u32 %v1665_v52, %v1471_v53 }
  0x37   : > { %v1405_v60 = vld [vmem:[#allocation2 + $0x100] sm:$0xf]  ;;  %v1651_v61 = vld [vmem:[#allocation2 + $0x114] sm:$0xf0]  ;;  %v1623_v0 = vld [vmem:[#allocation2 + $0x3c] sm:$0xf]  ;;  %v1598_v2 = vor.u32 %v1699_v56, %v1597_v54  ;;  %v1458_v3 = vor.u32 %v1660_v57, %v1455_v58 }
  0x38   : > { %893 = vmatpush.bf16.msrb.mxu0 %v1402_v16  ;;  %v1303_v1 = vld [vmem:[#allocation2 + $0x50] sm:$0xf0]  ;;  %v999_v6 = vperm.slane %v1852_v40, 1  ;;  %v1573_v7 = vld [vmem:[#allocation2 + $0x250] sm:$0xf]  ;;  %v1406_v8 = vor.u32 %v1651_v61, %v1405_v60  ;;  %vm1008_vm3 = vcmask 916480  }
  0x39   : > { %869 = vmatpush.bf16.msrb.mxu1 %v1350_v17  ;;  %908 = vmatpush.bf16.msrb.mxu2 %v1546_v18  ;;  %v1693_v9 = vld [vmem:[#allocation2 + $0x264] sm:$0xf0]  ;;  %v1654_v10 = vld [vmem:[#allocation2 + $0x134] sm:$0xf]  ;;  %v1431_v11 = vld [vmem:[#allocation2 + $0x148] sm:$0xf0]  ;;  %v1306_v12 = vor.u32 %v1623_v0, %v1303_v1 }
  0x3a   : > { %884 = vmatpush.bf16.msrb.mxu3 %v1494_v22  ;;  %v1381_v13 = vld [vmem:[#allocation2 + $0xd0] sm:$0xf]  ;;  %v1645_v14 = vld [vmem:[#allocation2 + $0xe4] sm:$0xf0]  ;;  %v1617_v15 = vld [vmem:[#allocation2 + $0xc] sm:$0xf]  ;;  %v1574_v17 = vor.u32 %v1693_v9, %v1573_v7  ;;  %v1434_v18 = vor.u32 %v1654_v10, %v1431_v11 }
  0x3b   : > { %v1279_v16 = vld [vmem:[#allocation2 + $0x20] sm:$0xf0]  ;;  %v1549_v19 = vld [vmem:[#allocation2 + $0x220] sm:$0xf]  ;;  %v1599_v21 = vld [vmem:[#allocation2 + $0x298] sm:$0xf0]  ;;  %v1382_v22 = vor.u32 %v1645_v14, %v1381_v13 }
  0x3c   : > { %894 = vmatpush.bf16.msrb.mxu0 %v1378_v28  ;;  %v1696_v20 = vld [vmem:[#allocation2 + $0x284] sm:$0xf]  ;;  %v1687_v23 = vld [vmem:[#allocation2 + $0x234] sm:$0xf0]  ;;  %v1407_v25 = vld [vmem:[#allocation2 + $0x118] sm:$0xf0]  ;;  %1006 = vrot.lane.b32.xlu0 %v999_v6, %s1769_s16  ;;  %v1282_v26 = vor.u32 %v1617_v15, %v1279_v16 }
  0x3d   : > { %870 = vmatpush.bf16.msrb.mxu1 %v1326_v32  ;;  %909 = vmatpush.bf16.msrb.mxu2 %v1522_v33  ;;  %v1648_v24 = vld [vmem:[#allocation2 + $0x104] sm:$0xf]  ;;  %v1357_v27 = vld [vmem:[#allocation2 + $0xa0] sm:$0xf]  ;;  %v1639_v28 = vld [vmem:[#allocation2 + $0xb4] sm:$0xf0]  ;;  %v1602_v29 = vor.u32 %v1696_v20, %v1599_v21  ;;  %v1550_v30 = vor.u32 %v1687_v23, %v1549_v19 }
  0x3e   : > { %885 = vmatpush.bf16.msrb.mxu3 %v1470_v37  ;;  %v1410_v31 = vor.u32 %v1648_v24, %v1407_v25  ;;  %v1525_v32 = vld [vmem:[#allocation2 + $0x1f0] sm:$0xf]  ;;  %v1690_v33 = vld [vmem:[#allocation2 + $0x254] sm:$0xf]  ;;  %v1575_v34 = vld [vmem:[#allocation2 + $0x268] sm:$0xf0]  ;;  %v1358_v35 = vor.u32 %v1639_v28, %v1357_v27 }
  0x3f   : > { %v1681_v36 = vld [vmem:[#allocation2 + $0x204] sm:$0xf0]  ;;  %v1642_v37 = vld [vmem:[#allocation2 + $0xd4] sm:$0xf]  ;;  %v1383_v38 = vld [vmem:[#allocation2 + $0xe8] sm:$0xf0] }
  0x40   : > { %895 = vmatpush.bf16.msrb.mxu0 %v1354_v43  ;;  %v1333_v39 = vld [vmem:[#allocation2 + $0x70] sm:$0xf]  ;;  %v1578_v43 = vor.u32 %v1690_v33, %v1575_v34  ;;  %v1526_v44 = vor.u32 %v1681_v36, %v1525_v32  ;;  %v1386_v45 = vor.u32 %v1642_v37, %v1383_v38  ;;  %v1501_v46 = vld [vmem:[#allocation2 + $0x1c0] sm:$0xf]  ;;  %v1675_v50 = vld [vmem:[#allocation2 + $0x1d4] sm:$0xf0] }
  0x41   : > { %871 = vmatpush.bf16.msrb.mxu1 %v1302_v47  ;;  %910 = vmatpush.bf16.msrb.mxu2 %v1498_v48  ;;  %v1684_v47 = vld [vmem:[#allocation2 + $0x224] sm:$0xf]  ;;  %v1551_v48 = vld [vmem:[#allocation2 + $0x238] sm:$0xf0]  ;;  %v1309_v53 = vld [vmem:[#allocation2 + $0x40] sm:$0xf]  ;;  %v1502_v56 = vor.u32 %v1675_v50, %v1501_v46 }
  0x42   : > { %917 = vmatpush.bf16.msra.mxu3 %v1454_v41  ;;  %v1633_v41 = vld [vmem:[#allocation2 + $0x84] sm:$0xf0]  ;;  %v1636_v51 = vld [vmem:[#allocation2 + $0xa4] sm:$0xf]  ;;  %v1359_v52 = vld [vmem:[#allocation2 + $0xb8] sm:$0xf0] }
  0x43   : > { %1605 = vmatmul.msk.bf16.vlgmr.msrb.gmra.mxu3 %vm809_vm0, %v1841_v5  ;;  %v1334_v49 = vor.u32 %v1633_v41, %v1333_v39  ;;  %v1627_v54 = vld [vmem:[#allocation2 + $0x54] sm:$0xf0]  ;;  %v1362_v57 = vor.u32 %v1636_v51, %v1359_v52  ;;  %v1477_v58 = vld [vmem:[#allocation2 + $0x190] sm:$0xf]  ;;  %v1527_v60 = vld [vmem:[#allocation2 + $0x208] sm:$0xf0] }
  0x44   : > { %896 = vmatpush.bf16.msrb.mxu0 %v1330_v59  ;;  %v1678_v59 = vld [vmem:[#allocation2 + $0x1f4] sm:$0xf]  ;;  %v1310_v61 = vor.u32 %v1627_v54, %v1309_v53  ;;  %v1335_v0 = vld [vmem:[#allocation2 + $0x88] sm:$0xf0]  ;;  %v1285_v1 = vld [vmem:[#allocation2 + $0x10] sm:$0xf] }
  0x45   : > { %872 = vmatpush.bf16.msrb.mxu1 %v1278_v62  ;;  %911 = vmatpush.bf16.msrb.mxu2 %v1474_v63  ;;  %v1669_v62 = vld [vmem:[#allocation2 + $0x1a4] sm:$0xf0]  ;;  %v1630_v63 = vld [vmem:[#allocation2 + $0x74] sm:$0xf]  ;;  %v1672_v9 = vld [vmem:[#allocation2 + $0x1c4] sm:$0xf] }
  0x46   : > { %918 = vmatpush.bf16.msra.mxu3 %v1430_v55  ;;  %v1554_v55 = vor.u32 %v1684_v47, %v1551_v48  ;;  %v1478_v7 = vor.u32 %v1669_v62, %v1477_v58  ;;  %v1503_v10 = vld [vmem:[#allocation2 + $0x1d8] sm:$0xf0]  ;;  %v1666_v16 = vld [vmem:[#allocation2 + $0x194] sm:$0xf]  ;;  %v1287_v19 = vld [vmem:[#allocation2 + $0x28] sm:$0xf0] }
  0x47   : > { %v1311_v13 = vld [vmem:[#allocation2 + $0x58] sm:$0xf0]  ;;  %v1506_v14 = vor.u32 %v1672_v9, %v1503_v10  ;;  %s1770_s17 = smov 16   ;;  %s1771_s18 = smov 32   ;;  %vm984_vm4 = vcmask 261120   ;;  %vm989_vm5 = vcmask 1040384  }
  0x48   : > { %873 = vmatmul.bf16.vlgmr.msrb.gmra.mxu1 %v1839_v4  ;;  %897 = vmatpush.bf16.msrb.mxu0 %v1306_v12  ;;  %v1624_v12 = vld [vmem:[#allocation2 + $0x44] sm:$0xf]  ;;  %s1614_s19 = sshll.u32 %s1953_s25, 5  ;;  %vm1027_vm6 = vcmask 130048   ;;  %vm1148_vm7 = vcmask 1041408   ;;  %s1615_s24 = sshll.u32 %s1953_s25, 2 }
  0x49   : > { %932 = vmatpush.bf16.msra.mxu1 %v1598_v2  ;;  %943 = vmatpush.bf16.msra.mxu2 %v1458_v3  ;;  %v1621_v2 = vld [vmem:[#allocation2 + $0x24] sm:$0xf0]  ;;  %v1530_v3 = vor.u32 %v1678_v59, %v1527_v60  ;;  %v1314_v15 = vor.u32 %v1624_v12, %v1311_v13  ;;  %s1912_s23 = scalar_lea.vmem %s1950_s5, %s1614_s19  ;;  %vm1151_vm8 = vcmask 912386   ;;  %s281_s28 = scalar_lea.vmem %s1951_s6, %s1615_s24 }
  0x4a   : > { %919 = vmatpush.bf16.msra.mxu3 %v1406_v8  ;;  %1606 = vmatmul.msk.bf16.vlgmr.msrb.gmra.mxu2 %vm809_vm0, %v1841_v5  ;;  %v1338_v8 = vor.u32 %v1630_v63, %v1335_v0  ;;  %v1286_v11 = vor.u32 %v1621_v2, %v1285_v1  ;;  %vm1152_vm9 = vmor %vm1151_vm8, %vm1148_vm7 }
  0x4c   : > { %898 = vmatpush.bf16.msrb.mxu0 %v1282_v26 }
  0x4d   : > { %933 = vmatpush.bf16.msra.mxu1 %v1574_v17  ;;  %944 = vmatpush.bf16.msra.mxu2 %v1434_v18  ;;  %v1479_v17 = vld [vmem:[#allocation2 + $0x1a8] sm:$0xf0]  ;;  %v1618_v18 = vld [vmem:[#allocation2 + $0x14] sm:$0xf] }
  0x4e   : > { %920 = vmatpush.bf16.msra.mxu3 %v1382_v22  ;;  %v1482_v20 = vor.u32 %v1666_v16, %v1479_v17  ;;  %v1290_v21 = vor.u32 %v1618_v18, %v1287_v19 }
  0x4f   : > { %899 = vmatmul.bf16.vlgmr.msrb.gmra.mxu0 %v1839_v4 }
  0x50   : > { %958 = vmatpush.bf16.msra.mxu0 %v1602_v29 }
  0x51   : > { %934 = vmatpush.bf16.msra.mxu1 %v1550_v30  ;;  %945 = vmatpush.bf16.msra.mxu2 %v1410_v31 }
  0x52   : > { %921 = vmatpush.bf16.msra.mxu3 %v1358_v35 }
  0x54   : > { %959 = vmatpush.bf16.msra.mxu0 %v1578_v43 }
  0x55   : > { %935 = vmatpush.bf16.msra.mxu1 %v1526_v44  ;;  %946 = vmatpush.bf16.msra.mxu2 %v1386_v45 }
  0x56   : > { %922 = vmatpush.bf16.msra.mxu3 %v1334_v49 }
  0x58   : > { %960 = vmatpush.bf16.msra.mxu0 %v1554_v55 }
  0x59   : > { %936 = vmatpush.bf16.msra.mxu1 %v1502_v56  ;;  %947 = vmatpush.bf16.msra.mxu2 %v1362_v57 }
  0x5a   : > { %923 = vmatpush.bf16.msra.mxu3 %v1310_v61 }
  0x5c   : > { %961 = vmatpush.bf16.msra.mxu0 %v1530_v3 }
  0x5d   : > { %937 = vmatpush.bf16.msra.mxu1 %v1478_v7  ;;  %948 = vmatpush.bf16.msra.mxu2 %v1338_v8 }
  0x5e   : > { %924 = vmatpush.bf16.msra.mxu3 %v1286_v11 }
  0x60   : > { %1607 = vmatmul.msk.bf16.vlgmr.msra.gmra.mxu1 %vm809_vm0, %v1841_v5  ;;  %962 = vmatpush.bf16.msra.mxu0 %v1506_v14 }
  0x61   : > { %925 = vmatmul.bf16.vlgmr.msra.gmra.mxu3 %v1839_v4  ;;  %949 = vmatpush.bf16.msra.mxu2 %v1314_v15 }
  0x64   : > { %963 = vmatpush.bf16.msra.mxu0 %v1482_v20 }
  0x65   : > { %950 = vmatpush.bf16.msra.mxu2 %v1290_v21 }
  0x67   : > { %1608 = vmatmul.msk.bf16.vlgmr.msra.gmra.mxu0 %vm809_vm0, %v1841_v5 }
  0x68   : > { %951 = vmatmul.bf16.vlgmr.msra.gmra.mxu2 %v1839_v4 }
  0xa6   : > { %v1005_v29 = vpop.permute.xlu0 %1004 }
  0xac   : > { %v835_v22 = vpop.f32.mrf.mxu1 }
  0xae   : > { %v1007_v41 = vpop.permute.xlu0 %1006 }
  0xaf   : > { %v822_v23 = vpop.f32.mrf.mxu0  ;;  %v1009_v47 = vsel %vm1008_vm3, %v1005_v29, %v1007_v41 }
  0xb0   : > { %v836_v24 = vadd.f32 %v835_v22, %v822_v23 }
  0xb2   : > { %v861_v26 = vpop.f32.mrf.mxu3  ;;  %v1875_v27 = vsel %vm969_vm1, %v836_v24, 0.0 }
  0xb3   : > { %v848_v25 = vpop.f32.mrf.mxu2 }
  0xb4   : > { %v862_v28 = vadd.f32 %v861_v26, %v848_v25  ;;  %v837_v31 = vpop.f32.mrf.mxu1 }
  0xb6   : > { %v1878_v30 = vsel %vm969_vm1, %v862_v28, 0.0 }
  0xb7   : > { %v1881_v32 = vadd.f32 %v1005_v29, %v1878_v30  ;;  %v824_v4 = vpop.f32.mrf.mxu0 }
  0xb9   : > { %v1099_v5 = vmul.f32 %v1881_v32, %v1881_v32  ;;  %v1049_v4 = vsel %vm1048_vm2, %v1881_v32, 0.0 }
  0xba   : > { %v863_v34 = vpop.f32.mrf.mxu3 }
  0xbb   : > { %v1102_v33 = vsel %vm1048_vm2, %v1099_v5, 0.0  ;;  %v850_v35 = vpop.f32.mrf.mxu2  ;;  %v1050_v5 = vrot.slane %v1049_v4, 4 }
  0xbc   : > { %v1103_v36 = vrot.slane %v1102_v33, 4 }
  0xbe   : > { %v1104_v37 = vadd.f32 %v1103_v36, %v1102_v33 }
  0xc0   : > { %v1105_v38 = vrot.slane %v1104_v37, 2 }
  0xc2   : > { %v1106_v43 = vadd.f32 %v1105_v38, %v1104_v37 }
  0xc4   : > { %v1107_v45 = vrot.slane %v1106_v43, 1 }
  0xc5   : > { %v874_v39 = vpop.f32.mrf.mxu1 }
  0xc6   : > { %v887_v44 = vpop.f32.mrf.mxu3  ;;  %v1108_v48 = vadd.f32 %v1107_v45, %v1106_v43 }
  0xc7   : > { %v888_v46 = vadd.f32 %v887_v44, %v874_v39  ;;  %v1051_v39 = vadd.f32 %v1050_v5, %v1049_v4 }
  0xc8   : > { %1125 = vrot.lane.b32.xlu0 %v1108_v48, %s1770_s17 }
  0xc9   : > { %v994_v49 = vsel %vm969_vm1, %v888_v46, 0.0  ;;  %v1052_v45 = vrot.slane %v1051_v39, 2 }
  0xca   : > { %v1014_v50 = vadd.f32 %v1009_v47, %v994_v49 }
  0xcb   : > { %v1053_v47 = vadd.f32 %v1052_v45, %v1051_v39 }
  0xcc   : > { %v900_v51 = vpop.f32.mrf.mxu0  ;;  %v1100_v55 = vmul.f32 %v1014_v50, %v1014_v50  ;;  %v1056_v23 = vrot.slane %v1014_v50, 4 }
  0xcd   : > { %v913_v52 = vpop.f32.mrf.mxu2  ;;  %v876_v54 = vpop.f32.mrf.mxu1  ;;  %v1054_v48 = vrot.slane %v1053_v47, 1 }
  0xce   : > { %v914_v53 = vadd.f32 %v913_v52, %v900_v51  ;;  %v889_v57 = vpop.f32.mrf.mxu3  ;;  %v1109_v59 = vrot.slane %v1100_v55, 4  ;;  %v1057_v31 = vadd.f32 %v1056_v23, %v1014_v50 }
  0xcf   : > { %v1055_v49 = vadd.f32 %v1054_v48, %v1053_v47 }
  0xd0   : > { %v995_v56 = vsel %vm969_vm1, %v914_v53, 0.0  ;;  %v975_v58 = vrot.slane %v914_v53, 7  ;;  %v1110_v61 = vadd.f32 %v1109_v59, %v1100_v55  ;;  %v1058_v34 = vrot.slane %v1057_v31, 2 }
  0xd1   : > { %v1015_v60 = vadd.f32 %v1007_v41, %v995_v56 }
  0xd2   : > { %978 = vrot.lane.b32.xlu2 %v975_v58, %s1771_s18  ;;  %v1111_v1 = vrot.slane %v1110_v61, 2  ;;  %v1059_v41 = vadd.f32 %v1058_v34, %v1057_v31 }
  0xd3   : > { %v1062_v62 = vsel %vm809_vm0, %v1015_v60, 0.0  ;;  %v1101_v63 = vmul.f32 %v1015_v60, %v1015_v60 }
  0xd4   : > { %v1063_v0 = vrot.slane %v1062_v62, 4  ;;  %v902_v2 = vpop.f32.mrf.mxu0  ;;  %v1112_v8 = vadd.f32 %v1111_v1, %v1110_v61  ;;  %v1060_v44 = vrot.slane %v1059_v41, 1 }
  0xd5   : > { %v915_v3 = vpop.f32.mrf.mxu2  ;;  %v1115_v7 = vsel %vm809_vm0, %v1101_v63, 0.0 }
  0xd6   : > { %v1116_v9 = vrot.slane %v1115_v7, 4  ;;  %v1064_v10 = vadd.f32 %v1063_v0, %v1062_v62  ;;  %v1113_v11 = vrot.slane %v1112_v8, 1  ;;  %v1061_v46 = vadd.f32 %v1060_v44, %v1059_v41 }
  0xd8   : > { %v1117_v12 = vadd.f32 %v1116_v9, %v1115_v7  ;;  %v1065_v13 = vrot.slane %v1064_v10, 2  ;;  %v1114_v14 = vadd.f32 %v1113_v11, %v1112_v8 }
  0xda   : > { %v1118_v15 = vrot.slane %v1117_v12, 2  ;;  %v1066_v16 = vadd.f32 %v1065_v13, %v1064_v10  ;;  %1127 = vrot.lane.b32.xlu2 %v1114_v14, %s1770_s17 }
  0xdc   : > { %v1119_v18 = vadd.f32 %v1118_v15, %v1117_v12  ;;  %v1067_v19 = vrot.slane %v1066_v16, 1 }
  0xdd   : > { %v939_v17 = vpop.f32.mrf.mxu1 }
  0xde   : > { %v1120_v20 = vrot.slane %v1119_v18, 1  ;;  %v1068_v22 = vadd.f32 %v1067_v19, %v1066_v16 }
  0xe0   : > { %v1121_v21 = vadd.f32 %v1120_v20, %v1119_v18 }
  0xe2   : > { %1129 = vrot.lane.b32.xlu0 %v1121_v21, %s1770_s17  ;;  %1076 = vrot.lane.b32.xlu2 %v1068_v22, %s1770_s17 }
  0xe4   : > { %v926_v24 = vpop.f32.mrf.mxu3  ;;  %v965_v25 = vpop.f32.mrf.mxu0 }
  0xe5   : > { %v940_v26 = vadd.f32 %v939_v17, %v926_v24  ;;  %v941_v28 = vpop.f32.mrf.mxu1 }
  0xe7   : > { %v976_v29 = vrot.slane %v940_v26, 7 }
  0xe9   : > { %980 = vrot.lane.b32.xlu1 %v976_v29, %s1771_s18 }
  0xea   : > { %1023 = vrot.lane.b32.xlu0 %v1014_v50, %s1770_s17  ;;  %1021 = vrot.lane.b32.xlu2 %v1881_v32, %s1770_s17 }
  0xeb   : > { %v952_v33 = vpop.f32.mrf.mxu2 }
  0xec   : > { %v928_v35 = vpop.f32.mrf.mxu3  ;;  %v966_v36 = vadd.f32 %v965_v25, %v952_v33  ;;  %v967_v37 = vpop.f32.mrf.mxu0 }
  0xee   : > { %v977_v38 = vrot.slane %v966_v36, 7 }
  0xf1   : > { %982 = vrot.lane.b32.xlu1 %v977_v38, %s1771_s18 }
  0xf3   : > { %v954_v43 = vpop.f32.mrf.mxu2 }
  0xf9   : > { %1074 = vrot.lane.b32.xlu1 %v1061_v46, %s1770_s17 }
 0x101   : > { %1072 = vrot.lane.b32.xlu1 %v1055_v49, %s1770_s17 }
 0x109   : > { %1025 = vrot.lane.b32.xlu1 %v1015_v60, %s1770_s17 }
 0x12c   : > { %v979_v50 = vpop.permute.xlu2 %978 }
 0x134   : > { %v1128_v32 = vpop.permute.xlu2 %1127 }
 0x13a   : > { %v1126_v51 = vpop.permute.xlu0 %1125 }
 0x13b   : > { %v1131_v4 = vsel %vm1027_vm6, %v1126_v51, %v1128_v32 }
 0x13c   : > { %v1077_v52 = vpop.permute.xlu2 %1076 }
 0x144   : > { %v1022_v57 = vpop.permute.xlu2 %1021 }
 0x154   : > { %v1130_v53 = vpop.permute.xlu0 %1129 }
 0x155   : > { %v1132_v5 = vsel %vm1027_vm6, %v1128_v32, %v1130_v53 }
 0x15b   : > { %v981_v54 = vpop.permute.xlu1 %980 }
 0x15c   : > { %v985_v55 = vsel %vm984_vm4, %v979_v50, %v981_v54  ;;  %v1024_v59 = vpop.permute.xlu0 %1023 }
 0x15d   : > { %v990_v56 = vsel %vm989_vm5, 0.0, %v985_v55  ;;  %v1028_v60 = vsel %vm1027_vm6, %v1022_v57, %v1024_v59 }
 0x15e   : > { %v992_v58 = vadd.f32 %v990_v56, %v1875_v27  ;;  %1609 = vst [vmem:[%s1912_s23 + $0x10] sm:$0xff] %v1028_v60 }
 0x160   : > { %v1002_v61 = vadd.f32 %v998_v42, %v992_v58 }
 0x162   : > { %v1084_v62 = vmul.f32 %v1002_v61, %v1002_v61  ;;  %1016 = vst [vmem:[%s1912_s23] sm:$0xff] %v1002_v61  ;;  %v1035_v3 = vrot.slane %v1002_v61, 4 }
 0x163   : > { %v983_v63 = vpop.permute.xlu1 %982 }
 0x164   : > { %v1086_v0 = vrot.slane %v1084_v62, 4  ;;  %v986_v1 = vsel %vm984_vm4, %v981_v54, %v983_v63  ;;  %v1036_v10 = vadd.f32 %v1035_v3, %v1002_v61 }
 0x165   : > { %v991_v2 = vsel %vm989_vm5, 0.0, %v986_v1 }
 0x166   : > { %v1087_v7 = vadd.f32 %v1086_v0, %v1084_v62  ;;  %v993_v27 = vadd.f32 %v991_v2, %v1878_v30  ;;  %v1037_v17 = vrot.slane %v1036_v10, 2 }
 0x168   : > { %v1003_v8 = vadd.f32 %v999_v6, %v993_v27  ;;  %v1088_v9 = vrot.slane %v1087_v7, 2  ;;  %v1038_v6 = vadd.f32 %v1037_v17, %v1036_v10 }
 0x16a   : > { %1017 = vst.msk [vmem:[%s1912_s23 + $0x8] sm:$0xff] %vm1008_vm3, %v1003_v8  ;;  %v1085_v42 = vmul.f32 %v1003_v8, %v1003_v8  ;;  %v1041_v11 = vsel %vm1008_vm3, %v1003_v8, 0.0  ;;  %v1089_v18 = vadd.f32 %v1088_v9, %v1087_v7  ;;  %v1039_v26 = vrot.slane %v1038_v6, 1 }
 0x16b   : > { %v1042_v12 = vrot.slane %v1041_v11, 4  ;;  %v1075_v13 = vpop.permute.xlu1 %1074 }
 0x16c   : > { %v1092_v14 = vsel %vm1008_vm3, %v1085_v42, 0.0  ;;  %v1090_v21 = vrot.slane %v1089_v18, 1  ;;  %v1040_v35 = vadd.f32 %v1039_v26, %v1038_v6  ;;  %v1079_v37 = vsel %vm1027_vm6, %v1075_v13, %v1077_v52 }
 0x16d   : > { %v1093_v15 = vrot.slane %v1092_v14, 4  ;;  %v1043_v16 = vadd.f32 %v1042_v12, %v1041_v11 }
 0x16e   : > { %v1091_v28 = vadd.f32 %v1090_v21, %v1089_v18 }
 0x16f   : > { %v1094_v19 = vadd.f32 %v1093_v15, %v1092_v14  ;;  %v1044_v30 = vrot.slane %v1043_v16, 2 }
 0x170   : > { %v1135_v36 = vadd.f32 %v1131_v4, %v1091_v28 }
 0x171   : > { %v1095_v20 = vrot.slane %v1094_v19, 2  ;;  %v1045_v40 = vadd.f32 %v1044_v30, %v1043_v16 }
 0x172   : > { %v1139_v46 = vrot.slane %v1135_v36, 7 }
 0x173   : > { %v1096_v22 = vadd.f32 %v1095_v20, %v1094_v19  ;;  %v1046_v23 = vrot.slane %v1045_v40, 1  ;;  %v1073_v24 = vpop.permute.xlu1 %1072 }
 0x174   : > { %v1078_v33 = vsel %vm1027_vm6, %v1073_v24, %v1075_v13 }
 0x175   : > { %v1097_v25 = vrot.slane %v1096_v22, 1  ;;  %v1047_v29 = vadd.f32 %v1046_v23, %v1045_v40  ;;  %v1082_v41 = vadd.f32 %v1078_v33, %v1040_v35 }
 0x177   : > { %v1098_v31 = vadd.f32 %v1097_v25, %v1096_v22  ;;  %v1083_v39 = vadd.f32 %v1079_v37, %v1047_v29  ;;  %v1143_v48 = vsel %vm989_vm5, %v1082_v41, %v1139_v46 }
 0x179   : > { %v1136_v34 = vadd.f32 %v1132_v5, %v1098_v31 }
 0x17b   : > { %v1140_v38 = vrot.slane %v1136_v34, 7  ;;  %v1026_v43 = vpop.permute.xlu1 %1025 }
 0x17c   : > { %v1029_v44 = vsel %vm1027_vm6, %v1024_v59, %v1026_v43 }
 0x17d   : > { %v1144_v45 = vsel %vm989_vm5, %v1083_v39, %v1140_v38  ;;  %1610 = vst.msk [vmem:[%s1912_s23 + $0x18] sm:$0xff] %vm1008_vm3, %v1029_v44 }
 0x17e   : > { %v1147_v47 = vrot.slane %v1144_v45, 6 }
 0x180   : > { %v1149_v49 = vsel %vm1148_vm7, %v1143_v48, %v1147_v47 }
 0x181   : > { %1153 = vst.msk [vmem:[%s281_s28] sm:$0xf] %vm1152_vm9, %v1149_v49 }
 0x182 PF: > { %s18_s21 = sadd.s32 1, %s1764_s21  }
 0x183   : > { %p15_p7 = scmp.ge.s32.totalorder %s18_s21, 4  }
 0x185   :  { %17 = sbr.rel (!%p15_p7) target bundleno = 1 (0x1), region = 88 }
 0x18a   :  { %1191 = vsyncpa [#allocation3], 1 }
 0x18b   :  { %1193 = vsyncpa [#allocation3 + $0x1], 1 }

// kernel: tile.78
= control target key start
LH: loop header
LB: loop body
LE: loop exit
PB: predicated region body
PF: predicated region fallthrough
CT: control target
= control target key end

     0   :  { %s40_s0 = inlined_call_operand.vmem [shape: f32[8], index: 0, kind: input, shape index: {}]   ;;  %s41_s1 = inlined_call_operand.vmem [shape: f32[31,8], index: 1, kind: output, shape index: {}]  }
   0x1   :  { %v4_v0 = vld [vmem:[%s40_s0] ss:$0 sm:$0xff] }
   0x2   :  { %5 = vst [vmem:[%s41_s1] sm:$0xff] %v4_v0 }
   0x3   :  { %12 = vst [vmem:[%s41_s1 + $0x8] sm:$0xff] %v4_v0 }
   0x4   :  { %13 = vst [vmem:[%s41_s1 + $0x10] sm:$0xff] %v4_v0 }
   0x5   :  { %14 = vst [vmem:[%s41_s1 + $0x18] sm:$0xff] %v4_v0 }

// kernel: tile.79
= control target key start
LH: loop header
LB: loop body
LE: loop exit
PB: predicated region body
PF: predicated region fallthrough
CT: control target
= control target key end

     0   :  { %s20_s8 = smov 3  ;;  %s153_s9 = smov 120   ;;  %vm4_vm0 = vcmask 64512   ;;  %vm10_vm1 = vcmask 1048512   ;;  %vm17_vm2 = vcmask 982912   ;;  %vm24_vm3 = vcmask 917312   ;;  %s232_s0 = inlined_call_operand.vmem [shape: f32[31,8], index: 0, kind: input, shape index: {}]   ;;  %s233_s1 = inlined_call_operand.vmem [shape: f32[1,248], index: 1, kind: output, shape index: {}]  }
   0x1   :  { %v122_v0 = vld [vmem:[%s232_s0 + $0xf] sm:$0x1]   ;;  %v124_v1 = vld [vmem:[%s232_s0 + $0xd] ss:$16 sm:%s20_s8]   ;;  %s154_s12 = smov 104   ;;  %s13_s13 = smov 3 }
   0x2   :  { %8 = vrot.lane.b32.xlu0 %v122_v0, %s153_s9  ;;  %22 = vrot.lane.b32.xlu1 %v124_v1, %s154_s12  ;;  %s27_s14 = smov 3  ;;  %v123_v2 = vld [vmem:[%s232_s0 + $0xe] ss:$16 sm:%s13_s13]   ;;  %s34_s19 = smov 3  ;;  %vm31_vm4 = vcmask 851712   ;;  %vm38_vm5 = vcmask 786112  }
   0x3   :  { %v125_v3 = vld [vmem:[%s232_s0 + $0xc] ss:$16 sm:%s27_s14]   ;;  %v126_v4 = vld [vmem:[%s232_s0 + $0xb] ss:$16 sm:%s34_s19]   ;;  %s155_s22 = smov 112   ;;  %s156_s23 = smov 88  }
   0x4   :  { %36 = vrot.lane.b32.xlu2 %v126_v4, %s156_s23  ;;  %s157_s24 = smov 96   ;;  %s48_s25 = smov 3  ;;  %vm45_vm6 = vcmask 720512   ;;  %vm52_vm7 = vcmask 654912   ;;  %vm59_vm8 = vcmask 589312   ;;  %vm66_vm9 = vcmask 523712  }
   0x5   :  { %s41_s26 = smov 3  ;;  %s55_s27 = smov 3  ;;  %v128_v5 = vld [vmem:[%s232_s0 + $0x9] ss:$16 sm:%s48_s25]   ;;  %vm73_vm10 = vcmask 458112   ;;  %vm80_vm11 = vcmask 392512  }
   0x6   :  { %v127_v6 = vld [vmem:[%s232_s0 + $0xa] ss:$16 sm:%s41_s26]   ;;  %v129_v7 = vld [vmem:[%s232_s0 + $0x8] ss:$16 sm:%s55_s27]   ;;  %s158_s5 = smov 72   ;;  %s159_s6 = smov 80  }
   0x7   :  { %s160_s7 = smov 64   ;;  %s69_s8 = smov 3  ;;  %vm87_vm12 = vcmask 326912   ;;  %vm94_vm13 = vcmask 261312   ;;  %vm101_vm14 = vcmask 195712   ;;  %vm108_vm15 = vcmask 130112  }
   0x8   :  { %s62_s9 = smov 3  ;;  %s76_s10 = smov 3  ;;  %v131_v8 = vld [vmem:[%s232_s0 + $0x6] ss:$16 sm:%s69_s8]  }
   0x9   :  { %v130_v9 = vld [vmem:[%s232_s0 + $0x7] ss:$16 sm:%s62_s9]   ;;  %v132_v10 = vld [vmem:[%s232_s0 + $0x5] ss:$16 sm:%s76_s10]   ;;  %s161_s17 = smov 48   ;;  %s162_s18 = smov 56  }
   0xa   :  { %15 = vrot.lane.b32.xlu0 %v123_v2, %s155_s22  ;;  %29 = vrot.lane.b32.xlu1 %v125_v3, %s157_s24  ;;  %s163_s19 = smov 40   ;;  %s90_s20 = smov 3 }
   0xb   :  { %s83_s21 = smov 3  ;;  %s97_s22 = smov 3  ;;  %v134_v11 = vld [vmem:[%s232_s0 + $0x3] ss:$16 sm:%s90_s20]  }
   0xc   :  { %43 = vrot.lane.b32.xlu2 %v127_v6, %s159_s6  ;;  %v133_v12 = vld [vmem:[%s232_s0 + $0x4] ss:$16 sm:%s83_s21]   ;;  %s164_s29 = smov 24   ;;  %s165_s30 = smov 32  }
   0xd   :  { %v135_v13 = vld [vmem:[%s232_s0 + $0x2] ss:$16 sm:%s97_s22]   ;;  %s166_s2 = smov 16   ;;  %s104_s3 = smov 3 }
   0xe   :  { %v136_v14 = vld [vmem:[%s232_s0 + $0x1] ss:$16 sm:%s104_s3]   ;;  %s167_s6 = smov 8  }
  0x12   :  { %50 = vrot.lane.b32.xlu0 %v128_v5, %s158_s5  ;;  %57 = vrot.lane.b32.xlu1 %v129_v7, %s160_s7  ;;  %s2_s7 = smov 3 }
  0x13   :  { %v3_v15 = vld [vmem:[%s232_s0] ss:$16 sm:%s2_s7]  }
  0x14   :  { %64 = vrot.lane.b32.xlu2 %v130_v9, %s162_s18  ;;  %5 = vst.msk [vmem:[#allocation0] ss:$8 sm:$0x3] %vm4_vm0, %v3_v15  }
  0x1a   :  { %71 = vrot.lane.b32.xlu0 %v131_v8, %s161_s17  ;;  %78 = vrot.lane.b32.xlu1 %v132_v10, %s163_s19 }
  0x1c   :  { %85 = vrot.lane.b32.xlu2 %v133_v12, %s165_s30 }
  0x22   :  { %92 = vrot.lane.b32.xlu0 %v134_v11, %s164_s29  ;;  %99 = vrot.lane.b32.xlu1 %v135_v13, %s166_s2 }
  0x24   :  { %106 = vrot.lane.b32.xlu2 %v136_v14, %s167_s6 }
  0x5e   :  { %v37_v16 = vpop.permute.xlu2 %36  }
  0x66   :  { %v44_v17 = vpop.permute.xlu2 %43  }
  0x6e   :  { %v65_v19 = vpop.permute.xlu2 %64  }
  0x74   :  { %v9_v18 = vpop.permute.xlu0 %8   ;;  %v23_v20 = vpop.permute.xlu1 %22  }
  0x75   :  { %11 = vst.msk [vmem:[#allocation0] sm:$0x1] %vm10_vm1, %v9_v18  }
  0x76   :  { %v86_v22 = vpop.permute.xlu2 %85  }
  0x7c   :  { %v16_v21 = vpop.permute.xlu0 %15   ;;  %v30_v23 = vpop.permute.xlu1 %29  }
  0x7d   :  { %18 = vst.msk [vmem:[#allocation0] ss:$8 sm:$0x3] %vm17_vm2, %v16_v21  }
  0x7e   :  { %25 = vst.msk [vmem:[#allocation0] ss:$8 sm:$0x3] %vm24_vm3, %v23_v20   ;;  %v107_v25 = vpop.permute.xlu2 %106  }
  0x7f   :  { %32 = vst.msk [vmem:[#allocation0] ss:$8 sm:$0x3] %vm31_vm4, %v30_v23  }
  0x80   :  { %39 = vst.msk [vmem:[#allocation0] ss:$8 sm:$0x3] %vm38_vm5, %v37_v16  }
  0x81   :  { %46 = vst.msk [vmem:[#allocation0] ss:$8 sm:$0x3] %vm45_vm6, %v44_v17  }
  0x84   :  { %v51_v24 = vpop.permute.xlu0 %50   ;;  %v58_v26 = vpop.permute.xlu1 %57  }
  0x85   :  { %53 = vst.msk [vmem:[#allocation0] ss:$8 sm:$0x3] %vm52_vm7, %v51_v24  }
  0x86   :  { %60 = vst.msk [vmem:[#allocation0] ss:$8 sm:$0x3] %vm59_vm8, %v58_v26  }
  0x87   :  { %67 = vst.msk [vmem:[#allocation0] ss:$8 sm:$0x3] %vm66_vm9, %v65_v19  }
  0x8c   :  { %v72_v27 = vpop.permute.xlu0 %71   ;;  %v79_v28 = vpop.permute.xlu1 %78  }
  0x8d   :  { %74 = vst.msk [vmem:[#allocation0] ss:$8 sm:$0x3] %vm73_vm10, %v72_v27  }
  0x8e   :  { %81 = vst.msk [vmem:[#allocation0] ss:$8 sm:$0x3] %vm80_vm11, %v79_v28  }
  0x8f   :  { %88 = vst.msk [vmem:[#allocation0] ss:$8 sm:$0x3] %vm87_vm12, %v86_v22  }
  0x94   :  { %v93_v29 = vpop.permute.xlu0 %92   ;;  %v100_v30 = vpop.permute.xlu1 %99  }
  0x95   :  { %95 = vst.msk [vmem:[#allocation0] ss:$8 sm:$0x3] %vm94_vm13, %v93_v29  }
  0x96   :  { %102 = vst.msk [vmem:[#allocation0] ss:$8 sm:$0x3] %vm101_vm14, %v100_v30  }
  0x97   :  { %109 = vst.msk [vmem:[#allocation0] ss:$8 sm:$0x3] %vm108_vm15, %v107_v25  }
  0x9e   :  { %v112_v31 = vld [vmem:[#allocation0] sm:$0x1]  ;;  %v117_v32 = vld [vmem:[#allocation0 + $0x8] sm:$0x1] }
  0x9f   :  { %115 = vst [vmem:[%s233_s1] sm:$0x1] %v112_v31 }
  0xa0   :  { %137 = vst [vmem:[%s233_s1 + $0x1] sm:$0x1] %v117_v32 }

// kernel: _lambda_.9
= control target key start
LH: loop header
LB: loop body
LE: loop exit
PB: predicated region body
PF: predicated region fallthrough
CT: control target
= control target key end

     0   :  { %12 = vsyncpa [#allocation3], 0  ;;  %s2811_s0 = inlined_call_operand.vmem [shape: f32[2,31,248], index: 0, kind: input, shape index: {}]   ;;  %s2812_s1 = inlined_call_operand.vmem [shape: f32[1,248], index: 1, kind: input, shape index: {}]   ;;  %s2813_s2 = inlined_call_operand.vmem [shape: f32[1,248], index: 2, kind: input, shape index: {}]   ;;  %s2814_s3 = inlined_call_operand.hbm [shape: bf16[248,768], index: 3, kind: input, shape index: {}]   ;;  %s2815_s4 = inlined_call_operand.hbm [shape: f32[1,192], index: 4, kind: input, shape index: {}]   ;;  %s2816_s5 = inlined_call_operand.vmem [shape: f32[2,2,32,192], index: 5, kind: output, shape index: {0}]   ;;  %s2817_s6 = inlined_call_operand.hbm [shape: f32[2,2,192], index: 6, kind: output, shape index: {1}]  }
   0x1   :  { %13 = vsyncpa [#allocation6], 0 }
   0x2   :  { %14 = vsyncpa [#allocation4], 0 }
   0x3   :  { %16 = vsyncpa [#allocation4 + $0x1], 0  ;;  %s2405_s21 = smov 0   ;;  %s2407_s22 = smov 0  }
   0x4   :  { %s2409_s23 = smov 0   ;;  %s2411_s24 = smov 0  }
   0x5 LB: > { %s2426_s25 = sadd.s32 4294967295, %s2363_s24   ;;  %s1647_s26 = sadd.s32 4294967294, %s2363_s24   ;;  %s2363_s24 = sphi %s2411_s24, %s2824_s24   ;;  %s2359_s23 = sphi %s2409_s23, %s2823_s23   ;;  %s2355_s22 = sphi %s2407_s22, %s2822_s22   ;;  %s2351_s21 = sphi %s2405_s21, %s2821_s21  }
   0x6   : > { %s2430_s27 = sadd.s32 1, %s2363_s24   ;;  %s165_s28 = sadd.s32 1, %s2359_s23 }
   0x7   : > { %s162_s29 = ssub.s32 %s2363_s24, %s2430_s27  ;;  %p175_p0 = scmp.ne.s32.totalorder %s2359_s23, %s2355_s22 }
   0x8   : > { %p163_p1 = scmp.eq.s32.totalorder %s162_s29, 0  ;;  %p176_p2 = scmp.eq.s32.totalorder %s2426_s25, 1 }
   0x9   : > { %p181_p3 = scmp.ne.s32.totalorder %s2355_s22, %s2351_s21  ;;  %p182_p4 = scmp.eq.s32.totalorder %s1647_s26, 1 }
   0xa   : > { %s2441_s30 = scalar_select %p163_p1, %s2359_s23, %s165_s28  }
   0xb   : > { %p2443_p5 = por %p176_p2, %p175_p0  ;;  %p2447_p6 = por %p182_p4, %p181_p3 }
   0xc   : > { %p1648_p7 = scmp.ge.s32.totalorder %s2363_s24, 1  ;;  %p189_p8 = scmp.lt.s32.totalorder %s2363_s24, 3 }
   0xd   : > { %p2159_p9 = scmp.eq.s32.totalorder %s2426_s25, 0  ;;  %s206_s12 = sshll.u32 %s2814_s3, 4  ;;  %s207_s12 = int_to_ptr.hbm [resolvable:$true] %s206_s12 }
   0xe   : > { %p2454_p10 = pnand %p1648_p7, %p189_p8  ;;  %s2365_s13 = smov [#allocation2]  }
   0xf   : > { %s208_s14 = sshll.u32 %s2365_s13, 4  ;;  %s221_s17 = sshll.u32 %s2815_s4, 4  ;;  %s209_s14 = int_to_ptr.vmem [resolvable:$true] %s208_s14  ;;  %s222_s17 = int_to_ptr.hbm [resolvable:$true] %s221_s17 }
  0x10   : > { %p2148_p11 = pneg %p2454_p10  ;;  %s2366_s18 = smov 384  }
  0x11   : > { %s2367_s19 = smov 24   ;;  %s2368_s20 = smov [#allocation5]  }
  0x12   : > { %p2149_p12 = pnand %p2159_p9, %p2148_p11  ;;  %s223_s26 = sshll.u32 %s2368_s20, 4  ;;  %s224_s26 = int_to_ptr.vmem [resolvable:$true] %s223_s26 }
  0x13   : > { %244 = sbr.rel (%p2454_p10) target bundleno = 686 (0x2ae), region = 40 }
  0x14   : > { %2151 = dma.hbm_to_vmem [thread:$0]  (!%p2149_p12), %s207_s12, 11904, %s209_s14, [#allocation3], %s2366_s18, %s2366_s18, %s2367_s19  }
  0x15   : > { %2154 = dma.hbm_to_vmem [thread:$0]  (!%p2149_p12), %s222_s17, 32, %s224_s26, [#allocation6]  }
  0x18   : > { %2338 = dma.done.wait (%p2159_p9), [#allocation3], 11904  }
  0x19   : > { %2340 = vsyncadd (%p2159_p9), [#allocation3], 4294955392 }
  0x1a   : > { %2342 = dma.done.wait (%p2159_p9), [#allocation6], 32  }
  0x1b   : > { %2344 = vsyncadd (%p2159_p9), [#allocation6], 4294967264  ;;  %v1830_v0 = vld [vmem:[#allocation2 + $0x150] sm:$0xf]  ;;  %v2092_v1 = vld [vmem:[#allocation2 + $0x164] sm:$0xf0] }
  0x1c   : > { %v2089_v2 = vld [vmem:[#allocation2 + $0x154] sm:$0xf]  ;;  %v1831_v3 = vor.u32 %v2092_v1, %v1830_v0  ;;  %v1832_v4 = vld [vmem:[#allocation2 + $0x168] sm:$0xf0]  ;;  %v1806_v6 = vld [vmem:[#allocation2 + $0x120] sm:$0xf] }
  0x1d   : > { %v433_v5 = vld [vmem:[#allocation2 + $0x2d0] sm:$0xff]  ;;  %v1835_v7 = vor.u32 %v2089_v2, %v1832_v4  ;;  %v2086_v10 = vld [vmem:[#allocation2 + $0x134] sm:$0xf0]  ;;  %v2083_v11 = vld [vmem:[#allocation2 + $0x124] sm:$0xf]  ;;  %vm908_vm0 = vcmask 1043456  }
  0x1e   : > { %v709_v8 = vunpack.c.l.b16 %v433_v5  ;;  %v710_v9 = vunpack.c.h.b16 %v433_v5  ;;  %v1808_v12 = vld [vmem:[#allocation2 + $0x138] sm:$0xf0]  ;;  %927 = vmatpush.bf16.msra.mxu0 %v1831_v3  ;;  %v1998_v13 = vld [vmem:[#allocation2 + $0x2a0] sm:$0xf]  ;;  %v2134_v14 = vld [vmem:[#allocation2 + $0x2b4] sm:$0xf0]  ;;  %v1807_v17 = vor.u32 %v2086_v10, %v1806_v6 }
  0x1f   : > { %p285_p13 = scmp.lt.s32.totalorder %s2426_s25, 1  ;;  %965 = vmatpush.bf16.msra.mxu2 %v1835_v7  ;;  %v1811_v18 = vor.u32 %v2083_v11, %v1808_v12  ;;  %v2131_v19 = vld [vmem:[#allocation2 + $0x2a4] sm:$0xf]  ;;  %v2000_v20 = vld [vmem:[#allocation2 + $0x2b8] sm:$0xf0]  ;;  %v1999_v27 = vor.u32 %v2134_v14, %v1998_v13  ;;  %vm901_vm1 = vcmask 982016  }
  0x20   : > { %v805_v15 = vpack.c.b16 %v709_v8, %v709_v8  ;;  %v806_v16 = vpack.c.b16 %v710_v9, %v710_v9  ;;  %v1782_v21 = vld [vmem:[#allocation2 + $0xf0] sm:$0xf]  ;;  %v2080_v22 = vld [vmem:[#allocation2 + $0x104] sm:$0xf0]  ;;  %v2077_v23 = vld [vmem:[#allocation2 + $0xf4] sm:$0xf]  ;;  %v2003_v28 = vor.u32 %v2131_v19, %v2000_v20 }
  0x21   : > { %v1784_v24 = vld [vmem:[#allocation2 + $0x108] sm:$0xf0]  ;;  %v1974_v29 = vld [vmem:[#allocation2 + $0x270] sm:$0xf]  ;;  %v2128_v30 = vld [vmem:[#allocation2 + $0x284] sm:$0xf0]  ;;  %v1783_v31 = vor.u32 %v2080_v22, %v1782_v21 }
  0x22   : > { %v910_v25 = vsel %vm908_vm0, %v805_v15, 0  ;;  %v913_v26 = vsel %vm908_vm0, %v806_v16, 0  ;;  %s2484_s28 = scalar_select %p285_p13, %s2426_s25, 1  ;;  %928 = vmatpush.bf16.msra.mxu0 %v1807_v17  ;;  %v1787_v32 = vor.u32 %v2077_v23, %v1784_v24  ;;  %v2125_v33 = vld [vmem:[#allocation2 + $0x274] sm:$0xf]  ;;  %v1975_v39 = vor.u32 %v2128_v30, %v1974_v29 }
  0x23   : > { %946 = vmatpush.bf16.msra.mxu1 %v910_v25  ;;  %984 = vmatpush.bf16.msra.mxu3 %v913_v26  ;;  %v1976_v34 = vld [vmem:[#allocation2 + $0x288] sm:$0xf0]  ;;  %v1758_v35 = vld [vmem:[#allocation2 + $0xc0] sm:$0xf]  ;;  %v2074_v36 = vld [vmem:[#allocation2 + $0xd4] sm:$0xf0] }
  0x24   : > { %966 = vmatpush.bf16.msra.mxu2 %v1811_v18  ;;  %v2071_v37 = vld [vmem:[#allocation2 + $0xc4] sm:$0xf]  ;;  %v1760_v38 = vld [vmem:[#allocation2 + $0xd8] sm:$0xf0]  ;;  %v1979_v40 = vor.u32 %v2125_v33, %v1976_v34  ;;  %v1950_v41 = vld [vmem:[#allocation2 + $0x240] sm:$0xf]  ;;  %v1759_v43 = vor.u32 %v2074_v36, %v1758_v35 }
  0x25   : > { %v2122_v42 = vld [vmem:[#allocation2 + $0x254] sm:$0xf0]  ;;  %s2045_s29 = sshll.u32 %s2484_s28, 6  ;;  %v1763_v44 = vor.u32 %v2071_v37, %v1760_v38  ;;  %v2119_v45 = vld [vmem:[#allocation2 + $0x244] sm:$0xf]  ;;  %vm1166_vm2 = vcmask 1040384  }
  0x26   : > { %929 = vmatpush.bf16.msra.mxu0 %v1783_v31  ;;  %v1952_v46 = vld [vmem:[#allocation2 + $0x258] sm:$0xf0]  ;;  %v1734_v47 = vld [vmem:[#allocation2 + $0x90] sm:$0xf]  ;;  %v2068_v48 = vld [vmem:[#allocation2 + $0xa4] sm:$0xf0]  ;;  %v1951_v51 = vor.u32 %v2122_v42, %v1950_v41  ;;  %s2490_s11 = scalar_lea.vmem %s2811_s0, %s2045_s29 }
  0x27   : > { %947 = vmatpush.bf16.msra.mxu1 %v1999_v27  ;;  %985 = vmatpush.bf16.msra.mxu3 %v2003_v28  ;;  %v2065_v49 = vld [vmem:[#allocation2 + $0x94] sm:$0xf]  ;;  %v1736_v50 = vld [vmem:[#allocation2 + $0xa8] sm:$0xf0]  ;;  %v1955_v52 = vor.u32 %v2119_v45, %v1952_v46  ;;  %v1926_v53 = vld [vmem:[#allocation2 + $0x210] sm:$0xf]  ;;  %v1735_v56 = vor.u32 %v2068_v48, %v1734_v47 }
  0x28   : > { %967 = vmatpush.bf16.msra.mxu2 %v1787_v32  ;;  %v2116_v54 = vld [vmem:[#allocation2 + $0x224] sm:$0xf0]  ;;  %v2113_v55 = vld [vmem:[#allocation2 + $0x214] sm:$0xf]  ;;  %v1739_v57 = vor.u32 %v2065_v49, %v1736_v50  ;;  %v1928_v58 = vld [vmem:[#allocation2 + $0x228] sm:$0xf0] }
  0x29   : > { %v1710_v59 = vld [vmem:[#allocation2 + $0x60] sm:$0xf]  ;;  %v2062_v60 = vld [vmem:[#allocation2 + $0x74] sm:$0xf0]  ;;  %v2059_v61 = vld [vmem:[#allocation2 + $0x64] sm:$0xf]  ;;  %v1927_v3 = vor.u32 %v2116_v54, %v1926_v53  ;;  %v1931_v4 = vor.u32 %v2113_v55, %v1928_v58 }
  0x2a   : > { %930 = vmatpush.bf16.msra.mxu0 %v1759_v43  ;;  %v1712_v62 = vld [vmem:[#allocation2 + $0x78] sm:$0xf0]  ;;  %v1902_v63 = vld [vmem:[#allocation2 + $0x1e0] sm:$0xf]  ;;  %v2110_v0 = vld [vmem:[#allocation2 + $0x1f4] sm:$0xf0]  ;;  %v1711_v8 = vor.u32 %v2062_v60, %v1710_v59 }
  0x2b   : > { %948 = vmatpush.bf16.msra.mxu1 %v1975_v39  ;;  %986 = vmatpush.bf16.msra.mxu3 %v1979_v40  ;;  %v2107_v1 = vld [vmem:[#allocation2 + $0x1e4] sm:$0xf]  ;;  %v1904_v2 = vld [vmem:[#allocation2 + $0x1f8] sm:$0xf0]  ;;  %v1686_v5 = vld [vmem:[#allocation2 + $0x30] sm:$0xf]  ;;  %v1715_v9 = vor.u32 %v2059_v61, %v1712_v62  ;;  %v1903_v17 = vor.u32 %v2110_v0, %v1902_v63 }
  0x2c   : > { %968 = vmatpush.bf16.msra.mxu2 %v1763_v44  ;;  %v2056_v6 = vld [vmem:[#allocation2 + $0x44] sm:$0xf0]  ;;  %v295_v7 = vld [vmem:[%s2490_s11] sm:$0xff]  ;;  %v297_v10 = vld [vmem:[%s2490_s11 + $0x10] sm:$0xff]  ;;  %v1907_v21 = vor.u32 %v2107_v1, %v1904_v2  ;;  %s2046_s16 = sshll.u32 %s2484_s28, 7  ;;  %vm1155_vm3 = vcmask 1046528  }
  0x2d   : > { %v303_v11 = vld [vmem:[%s2812_s1] sm:$0x3]  ;;  %v2053_v13 = vld [vmem:[#allocation2 + $0x34] sm:$0xf]  ;;  %v1688_v14 = vld [vmem:[#allocation2 + $0x48] sm:$0xf0]  ;;  %v1687_v28 = vor.u32 %v2056_v6, %v1686_v5  ;;  %s2609_s19 = scalar_lea.vmem %s2816_s5, %s2046_s16 }
  0x2e   : > { %931 = vmatpush.bf16.msra.mxu0 %v1735_v56  ;;  %v317_v12 = vld [vmem:[%s2813_s2] sm:$0x3]  ;;  %v2500_v15 = vperm.slane %v303_v11, 0  ;;  %v1878_v18 = vld [vmem:[#allocation2 + $0x1b0] sm:$0xf]  ;;  %v296_v26 = vld [vmem:[%s2490_s11 + $0x8] sm:$0xff]  ;;  %v1691_v29 = vor.u32 %v2053_v13, %v1688_v14 }
  0x2f   : > { %949 = vmatpush.bf16.msra.mxu1 %v1951_v51  ;;  %987 = vmatpush.bf16.msra.mxu3 %v1955_v52  ;;  %v2502_v16 = vperm.slane %v317_v12, 0  ;;  %v2104_v19 = vld [vmem:[#allocation2 + $0x1c4] sm:$0xf0]  ;;  %v2101_v20 = vld [vmem:[#allocation2 + $0x1b4] sm:$0xf]  ;;  %v2507_v27 = vperm.slane %v303_v11, 1 }
  0x30   : > { %969 = vmatpush.bf16.msra.mxu2 %v1739_v57  ;;  %v1880_v22 = vld [vmem:[#allocation2 + $0x1c8] sm:$0xf0]  ;;  %v1662_v23 = vld [vmem:[#allocation2] sm:$0xf]  ;;  %v309_v24 = vmul.f32 %v2500_v15, %v295_v7  ;;  %v311_v25 = vmul.f32 %v2500_v15, %v297_v10  ;;  %v2050_v30 = vld [vmem:[#allocation2 + $0x14] sm:$0xf0]  ;;  %v1879_v41 = vor.u32 %v2104_v19, %v1878_v18 }
  0x31   : > { %v298_v31 = vld [vmem:[%s2490_s11 + $0x18] sm:$0xff]  ;;  %v2510_v32 = vperm.slane %v317_v12, 1  ;;  %v2047_v34 = vld [vmem:[#allocation2 + $0x4] sm:$0xf]  ;;  %v310_v39 = vmul.f32 %v2507_v27, %v296_v26  ;;  %v1883_v42 = vor.u32 %v2101_v20, %v1880_v22  ;;  %v2093_v43 = vld [vmem:[#allocation2 + $0x16c] sm:$0xf0]  ;;  %v1663_v52 = vor.u32 %v2050_v30, %v1662_v23 }
  0x32   : > { %932 = vmatpush.bf16.msra.mxu0 %v1711_v8  ;;  %v434_v33 = vld [vmem:[#allocation2 + $0x2d8] sm:$0xff]  ;;  %v323_v36 = vadd.f32 %v2502_v16, %v309_v24  ;;  %v325_v37 = vadd.f32 %v2502_v16, %v311_v25  ;;  %v312_v40 = vmul.f32 %v2507_v27, %v298_v31  ;;  %v1840_v45 = vld [vmem:[#allocation2 + $0x170] sm:$0xf0]  ;;  %v1854_v54 = vld [vmem:[#allocation2 + $0x180] sm:$0xf]  ;;  %s2369_s20 = smov 64  }
  0x33   : > { %950 = vmatpush.bf16.msra.mxu1 %v1927_v3  ;;  %988 = vmatpush.bf16.msra.mxu3 %v1931_v4  ;;  %v1664_v35 = vld [vmem:[#allocation2 + $0x18] sm:$0xf0]  ;;  %v1838_v38 = vld [vmem:[#allocation2 + $0x158] sm:$0xf]  ;;  %v711_v46 = vunpack.c.l.b16 %v434_v33  ;;  %v712_v47 = vunpack.c.h.b16 %v434_v33  ;;  %v324_v50 = vadd.f32 %v2510_v32, %v310_v39  ;;  %v2095_v56 = vld [vmem:[#allocation2 + $0x184] sm:$0xf] }
  0x34   : > { %970 = vmatpush.bf16.msra.mxu2 %v1715_v9  ;;  %v2090_v44 = vld [vmem:[#allocation2 + $0x15c] sm:$0xf]  ;;  %v331_v48 = vmax.f32 %v323_v36, 0.0  ;;  %v333_v49 = vmax.f32 %v325_v37, 0.0  ;;  %v326_v51 = vadd.f32 %v2510_v32, %v312_v40  ;;  %v1667_v53 = vor.u32 %v2047_v34, %v1664_v35  ;;  %v2098_v55 = vld [vmem:[#allocation2 + $0x194] sm:$0xf0] }
  0x35   : > { %v1856_v57 = vld [vmem:[#allocation2 + $0x198] sm:$0xf0]  ;;  %v1839_v58 = vor.u32 %v2093_v43, %v1838_v38  ;;  %v1843_v59 = vor.u32 %v2090_v44, %v1840_v45  ;;  %v332_v60 = vmax.f32 %v324_v50, 0.0  ;;  %v807_v62 = vpack.c.b16 %v711_v46, %v711_v46  ;;  %v1814_v2 = vld [vmem:[#allocation2 + $0x128] sm:$0xf]  ;;  %v299_v9 = vld [vmem:[%s2490_s11 + $0x20] sm:$0xff] }
  0x36   : > { %933 = vmatpush.bf16.msra.mxu0 %v1687_v28  ;;  %v334_v61 = vmax.f32 %v326_v51, 0.0  ;;  %v808_v63 = vpack.c.b16 %v712_v47, %v712_v47  ;;  %v2518_v0 = vpack.c.bf16 %v333_v49, %v331_v48  ;;  %v1855_v1 = vor.u32 %v2098_v55, %v1854_v54  ;;  %v2087_v3 = vld [vmem:[#allocation2 + $0x13c] sm:$0xf0]  ;;  %v2084_v5 = vld [vmem:[#allocation2 + $0x12c] sm:$0xf]  ;;  %s282_s26 = sand.u32 1, %s2355_s22  }
  0x37   : > { %951 = vmatpush.bf16.msra.mxu1 %v1903_v17  ;;  %989 = vmatpush.bf16.msra.mxu3 %v1907_v21  ;;  %v1859_v4 = vor.u32 %v2095_v56, %v1856_v57  ;;  %v1816_v6 = vld [vmem:[#allocation2 + $0x140] sm:$0xf0]  ;;  %v2006_v7 = vld [vmem:[#allocation2 + $0x2a8] sm:$0xf]  ;;  %v2135_v8 = vld [vmem:[#allocation2 + $0x2bc] sm:$0xf0]  ;;  %v1815_v14 = vor.u32 %v2087_v3, %v1814_v2  ;;  %v313_v22 = vmul.f32 %v2500_v15, %v299_v9 }
  0x38   : > { %971 = vmatpush.bf16.msra.mxu2 %v1691_v29  ;;  %v301_v10 = vld [vmem:[%s2490_s11 + $0x30] sm:$0x7f]  ;;  %v2522_v11 = vpack.c.bf16 %v334_v61, %v332_v60  ;;  %v916_v12 = vsel %vm908_vm0, %v807_v62, 0  ;;  %v919_v13 = vsel %vm908_vm0, %v808_v63, 0  ;;  %v2132_v17 = vld [vmem:[#allocation2 + $0x2ac] sm:$0xf]  ;;  %v1819_v19 = vor.u32 %v2084_v5, %v1816_v6 }
  0x39   : > { %v2008_v18 = vld [vmem:[#allocation2 + $0x2c0] sm:$0xf0]  ;;  %v1790_v20 = vld [vmem:[#allocation2 + $0xf8] sm:$0xf]  ;;  %v2081_v21 = vld [vmem:[#allocation2 + $0x10c] sm:$0xf0]  ;;  %v315_v23 = vmul.f32 %v2500_v15, %v301_v10  ;;  %v2007_v29 = vor.u32 %v2135_v8, %v2006_v7 }
  0x3a   : > { %934 = vmatpush.bf16.msra.mxu0 %v1663_v52  ;;  %v300_v24 = vld [vmem:[%s2490_s11 + $0x28] sm:$0xff]  ;;  %v2078_v25 = vld [vmem:[#allocation2 + $0xfc] sm:$0xf]  ;;  %v1792_v26 = vld [vmem:[#allocation2 + $0x110] sm:$0xf0]  ;;  %v2011_v30 = vor.u32 %v2132_v17, %v2008_v18  ;;  %v1791_v33 = vor.u32 %v2081_v21, %v1790_v20  ;;  %vm1227_vm4 = vcmask 523264  }
  0x3b   : > { %952 = vmatpush.bf16.msra.mxu1 %v1879_v41  ;;  %990 = vmatpush.bf16.msra.mxu3 %v1883_v42  ;;  %v302_v28 = vld [vmem:[%s2490_s11 + $0x38] sm:$0x7f]  ;;  %v2129_v34 = vld [vmem:[#allocation2 + $0x28c] sm:$0xf0]  ;;  %v1984_v15 = vld [vmem:[#allocation2 + $0x290] sm:$0xf0]  ;;  %v314_v36 = vmul.f32 %v2507_v27, %v300_v24  ;;  %v1795_v38 = vor.u32 %v2078_v25, %v1792_v26  ;;  %v327_v41 = vadd.f32 %v2502_v16, %v313_v22 }
  0x3c   : > { %972 = vmatpush.bf16.msra.mxu2 %v1667_v53  ;;  %v1982_v31 = vld [vmem:[#allocation2 + $0x278] sm:$0xf]  ;;  %v2126_v35 = vld [vmem:[#allocation2 + $0x27c] sm:$0xf]  ;;  %v316_v37 = vmul.f32 %v2507_v27, %v302_v28  ;;  %v1766_v39 = vld [vmem:[#allocation2 + $0xc8] sm:$0xf]  ;;  %v329_v42 = vadd.f32 %v2502_v16, %v315_v23 }
  0x3d   : > { %935 = vmatmul.bf16.vlgmr.msra.gmra.mxu0 %v2518_v0  ;;  %v2075_v40 = vld [vmem:[#allocation2 + $0xdc] sm:$0xf0]  ;;  %v2072_v43 = vld [vmem:[#allocation2 + $0xcc] sm:$0xf]  ;;  %v1768_v44 = vld [vmem:[#allocation2 + $0xe0] sm:$0xf0]  ;;  %v1983_v45 = vor.u32 %v2129_v34, %v1982_v31  ;;  %v1987_v46 = vor.u32 %v2126_v35, %v1984_v15  ;;  %v328_v51 = vadd.f32 %v2510_v32, %v314_v36 }
  0x3e   : > { %1003 = vmatpush.bf16.msrb.mxu0 %v1839_v58  ;;  %v1958_v47 = vld [vmem:[#allocation2 + $0x248] sm:$0xf]  ;;  %v1767_v27 = vor.u32 %v2075_v40, %v1766_v39  ;;  %v2123_v48 = vld [vmem:[#allocation2 + $0x25c] sm:$0xf0]  ;;  %v2120_v49 = vld [vmem:[#allocation2 + $0x24c] sm:$0xf]  ;;  %v330_v52 = vadd.f32 %v2510_v32, %v316_v37  ;;  %v1771_v53 = vor.u32 %v2072_v43, %v1768_v44 }
  0x3f   : > { %953 = vmatpush.bf16.msra.mxu1 %v1855_v1  ;;  %973 = vmatmul.bf16.vlgmr.msra.gmra.mxu2 %v2518_v0  ;;  %v1960_v50 = vld [vmem:[#allocation2 + $0x260] sm:$0xf0]  ;;  %v335_v54 = vmax.f32 %v327_v41, 0.0  ;;  %v337_v16 = vmax.f32 %v329_v42, 0.0  ;;  %v1742_v55 = vld [vmem:[#allocation2 + $0x98] sm:$0xf] }
  0x40   : > { %1041 = vmatpush.bf16.msrb.mxu2 %v1843_v59  ;;  %991 = vmatpush.bf16.msra.mxu3 %v1859_v4  ;;  %v2069_v56 = vld [vmem:[#allocation2 + $0xac] sm:$0xf0]  ;;  %v2066_v57 = vld [vmem:[#allocation2 + $0x9c] sm:$0xf]  ;;  %v1744_v58 = vld [vmem:[#allocation2 + $0xb0] sm:$0xf0]  ;;  %v1959_v59 = vor.u32 %v2123_v48, %v1958_v47  ;;  %v1963_v60 = vor.u32 %v2120_v49, %v1960_v50 }
  0x41   : > { %v1934_v61 = vld [vmem:[#allocation2 + $0x218] sm:$0xf]  ;;  %v2117_v62 = vld [vmem:[#allocation2 + $0x22c] sm:$0xf0]  ;;  %v1743_v63 = vor.u32 %v2069_v56, %v1742_v55  ;;  %v336_v1 = vmax.f32 %v328_v51, 0.0  ;;  %v338_v2 = vmax.f32 %v330_v52, 0.0  ;;  %v2542_v4 = vpack.c.bf16 %v337_v16, %v335_v54 }
  0x42   : > { %2020 = vmatmul.msk.bf16.vlgmr.msra.gmra.mxu1 %vm901_vm1, %v2522_v11  ;;  %1004 = vmatpush.bf16.msrb.mxu0 %v1815_v14  ;;  %v2114_v3 = vld [vmem:[#allocation2 + $0x21c] sm:$0xf]  ;;  %v1936_v32 = vld [vmem:[#allocation2 + $0x230] sm:$0xf0]  ;;  %v1747_v5 = vor.u32 %v2066_v57, %v1744_v58  ;;  %v1718_v6 = vld [vmem:[#allocation2 + $0x68] sm:$0xf]  ;;  %v1935_v10 = vor.u32 %v2117_v62, %v1934_v61 }
  0x43   : > { %1022 = vmatpush.bf16.msrb.mxu1 %v916_v12  ;;  %2022 = vmatmul.msk.bf16.vlgmr.msra.gmra.mxu3 %vm901_vm1, %v2522_v11  ;;  %v2063_v7 = vld [vmem:[#allocation2 + $0x7c] sm:$0xf0]  ;;  %v2060_v8 = vld [vmem:[#allocation2 + $0x6c] sm:$0xf]  ;;  %v1720_v9 = vld [vmem:[#allocation2 + $0x80] sm:$0xf0]  ;;  %v1939_v12 = vor.u32 %v2114_v3, %v1936_v32  ;;  %v2544_v14 = vpack.c.bf16 %v338_v2, %v336_v1 }
  0x44   : > { %1060 = vmatpush.bf16.msrb.mxu3 %v919_v13  ;;  %1042 = vmatpush.bf16.msrb.mxu2 %v1819_v19  ;;  %v1910_v13 = vld [vmem:[#allocation2 + $0x1e8] sm:$0xf]  ;;  %v1719_v17 = vor.u32 %v2063_v7, %v1718_v6  ;;  %v2111_v18 = vld [vmem:[#allocation2 + $0x1fc] sm:$0xf0]  ;;  %v2108_v19 = vld [vmem:[#allocation2 + $0x1ec] sm:$0xf]  ;;  %v1723_v21 = vor.u32 %v2060_v8, %v1720_v9 }
  0x45   : > { %v1912_v20 = vld [vmem:[#allocation2 + $0x200] sm:$0xf0]  ;;  %v1694_v22 = vld [vmem:[#allocation2 + $0x38] sm:$0xf]  ;;  %v2057_v23 = vld [vmem:[#allocation2 + $0x4c] sm:$0xf0]  ;;  %v1911_v28 = vor.u32 %v2111_v18, %v1910_v13 }
  0x46   : > { %1005 = vmatpush.bf16.msrb.mxu0 %v1791_v33  ;;  %v2054_v24 = vld [vmem:[#allocation2 + $0x3c] sm:$0xf]  ;;  %v1696_v25 = vld [vmem:[#allocation2 + $0x50] sm:$0xf0]  ;;  %v435_v26 = vld [vmem:[#allocation2 + $0x2e0] sm:$0xff]  ;;  %v1695_v31 = vor.u32 %v2057_v23, %v1694_v22  ;;  %vm1394_vm5 = vcmask 1048064  }
  0x47   : > { %1023 = vmatpush.bf16.msrb.mxu1 %v2007_v29  ;;  %v1915_v29 = vor.u32 %v2108_v19, %v1912_v20  ;;  %v2105_v33 = vld [vmem:[#allocation2 + $0x1cc] sm:$0xf0]  ;;  %v2102_v34 = vld [vmem:[#allocation2 + $0x1bc] sm:$0xf]  ;;  %v1888_v35 = vld [vmem:[#allocation2 + $0x1d0] sm:$0xf0]  ;;  %v1699_v15 = vor.u32 %v2054_v24, %v1696_v25  ;;  %v713_v39 = vunpack.c.l.b16 %v435_v26  ;;  %v714_v40 = vunpack.c.h.b16 %v435_v26 }
  0x48   : > { %1061 = vmatpush.bf16.msrb.mxu3 %v2011_v30  ;;  %1043 = vmatpush.bf16.msrb.mxu2 %v1795_v38  ;;  %v1886_v30 = vld [vmem:[#allocation2 + $0x1b8] sm:$0xf]  ;;  %v1670_v36 = vld [vmem:[#allocation2 + $0x8] sm:$0xf]  ;;  %v2051_v37 = vld [vmem:[#allocation2 + $0x1c] sm:$0xf0] }
  0x49   : > { %v2048_v38 = vld [vmem:[#allocation2 + $0xc] sm:$0xf]  ;;  %v1672_v41 = vld [vmem:[#allocation2 + $0x20] sm:$0xf0]  ;;  %v1846_v42 = vld [vmem:[#allocation2 + $0x160] sm:$0xf]  ;;  %v1887_v44 = vor.u32 %v2105_v33, %v1886_v30  ;;  %v1671_v48 = vor.u32 %v2051_v37, %v1670_v36  ;;  %v809_v54 = vpack.c.b16 %v713_v39, %v713_v39  ;;  %v810_v16 = vpack.c.b16 %v714_v40, %v714_v40 }
  0x4a   : > { %1006 = vmatpush.bf16.msrb.mxu0 %v1767_v27  ;;  %v2094_v43 = vld [vmem:[#allocation2 + $0x174] sm:$0xf0]  ;;  %v2091_v47 = vld [vmem:[#allocation2 + $0x164] sm:$0xf]  ;;  %v1848_v27 = vld [vmem:[#allocation2 + $0x178] sm:$0xf0]  ;;  %v1675_v52 = vor.u32 %v2048_v38, %v1672_v41 }
  0x4b   : > { %1024 = vmatpush.bf16.msrb.mxu1 %v1983_v45  ;;  %v1891_v45 = vor.u32 %v2102_v34, %v1888_v35  ;;  %v2099_v49 = vld [vmem:[#allocation2 + $0x19c] sm:$0xf0]  ;;  %v2096_v50 = vld [vmem:[#allocation2 + $0x18c] sm:$0xf]  ;;  %v1864_v51 = vld [vmem:[#allocation2 + $0x1a0] sm:$0xf0]  ;;  %v1851_v55 = vor.u32 %v2091_v47, %v1848_v27 }
  0x4c   : > { %1062 = vmatpush.bf16.msrb.mxu3 %v1987_v46  ;;  %1044 = vmatpush.bf16.msrb.mxu2 %v1771_v53  ;;  %v1862_v46 = vld [vmem:[#allocation2 + $0x188] sm:$0xf]  ;;  %v1847_v53 = vor.u32 %v2094_v43, %v1846_v42  ;;  %v1867_v57 = vor.u32 %v2096_v50, %v1864_v51  ;;  %v1822_v58 = vld [vmem:[#allocation2 + $0x130] sm:$0xf]  ;;  %v1824_v61 = vld [vmem:[#allocation2 + $0x148] sm:$0xf0] }
  0x4d   : > { %940 = vmatmul.bf16.gmra.mxu0 %v2542_v4  ;;  %v1863_v56 = vor.u32 %v2099_v49, %v1862_v46  ;;  %v922_v62 = vsel %vm908_vm0, %v809_v54, 0  ;;  %v2133_v1 = vld [vmem:[#allocation2 + $0x2b4] sm:$0xf]  ;;  %v2016_v2 = vld [vmem:[#allocation2 + $0x2c8] sm:$0xf0]  ;;  %s2764_s28 = sshll.u32 %s282_s26, 2 }
  0x4e   : > { %1007 = vmatpush.bf16.msrb.mxu0 %v1743_v63  ;;  %v925_v63 = vsel %vm908_vm0, %v810_v16, 0  ;;  %v2014_v32 = vld [vmem:[#allocation2 + $0x2b0] sm:$0xf]  ;;  %v1798_v7 = vld [vmem:[#allocation2 + $0x100] sm:$0xf]  ;;  %v2019_v9 = vor.u32 %v2133_v1, %v2016_v2  ;;  %s2137_s29 = sshll.u32 %s2426_s25, 2 }
  0x4f   : > { %1025 = vmatpush.bf16.msrb.mxu1 %v1959_v59  ;;  %978 = vmatmul.bf16.gmra.mxu2 %v2542_v4  ;;  %v2088_v59 = vld [vmem:[#allocation2 + $0x144] sm:$0xf0]  ;;  %v2082_v8 = vld [vmem:[#allocation2 + $0x114] sm:$0xf0]  ;;  %v1992_v18 = vld [vmem:[#allocation2 + $0x298] sm:$0xf0]  ;;  %s1536_s11 = scalar_lea.hbm %s2817_s6, %s2137_s29 }
  0x50   : > { %1063 = vmatpush.bf16.msrb.mxu3 %v1963_v60  ;;  %1045 = vmatpush.bf16.msrb.mxu2 %v1747_v5  ;;  %v2085_v60 = vld [vmem:[#allocation2 + $0x134] sm:$0xf]  ;;  %v1823_v3 = vor.u32 %v2088_v59, %v1822_v58  ;;  %v2136_v5 = vld [vmem:[#allocation2 + $0x2c4] sm:$0xf0]  ;;  %v1799_v19 = vor.u32 %v2082_v8, %v1798_v7  ;;  %v1990_v20 = vld [vmem:[#allocation2 + $0x280] sm:$0xf] }
  0x51   : > { %v1827_v6 = vor.u32 %v2085_v60, %v1824_v61  ;;  %v2015_v13 = vor.u32 %v2136_v5, %v2014_v32  ;;  %v1774_v23 = vld [vmem:[#allocation2 + $0xd0] sm:$0xf]  ;;  %v2076_v24 = vld [vmem:[#allocation2 + $0xe4] sm:$0xf0]  ;;  %v2073_v26 = vld [vmem:[#allocation2 + $0xd4] sm:$0xf] }
  0x52   : > { %2021 = vmatmul.msk.bf16.gmra.mxu1 %vm901_vm1, %v2544_v14  ;;  %1008 = vmatpush.bf16.msrb.mxu0 %v1719_v17  ;;  %v2127_v17 = vld [vmem:[#allocation2 + $0x284] sm:$0xf]  ;;  %v2121_v30 = vld [vmem:[#allocation2 + $0x254] sm:$0xf]  ;;  %v1775_v33 = vor.u32 %v2076_v24, %v1774_v23  ;;  %v1966_v34 = vld [vmem:[#allocation2 + $0x250] sm:$0xf] }
  0x53   : > { %1026 = vmatpush.bf16.msrb.mxu1 %v1935_v10  ;;  %2023 = vmatmul.msk.bf16.gmra.mxu3 %vm901_vm1, %v2544_v14  ;;  %v2079_v10 = vld [vmem:[#allocation2 + $0x104] sm:$0xf]  ;;  %v1995_v25 = vor.u32 %v2127_v17, %v1992_v18  ;;  %v2124_v35 = vld [vmem:[#allocation2 + $0x264] sm:$0xf0]  ;;  %v1750_v36 = vld [vmem:[#allocation2 + $0xa0] sm:$0xf] }
  0x54   : > { %1064 = vmatpush.bf16.msrb.mxu3 %v1939_v12  ;;  %1046 = vmatpush.bf16.msrb.mxu2 %v1723_v21  ;;  %v1800_v12 = vld [vmem:[#allocation2 + $0x118] sm:$0xf0]  ;;  %v2130_v21 = vld [vmem:[#allocation2 + $0x294] sm:$0xf0]  ;;  %v2067_v39 = vld [vmem:[#allocation2 + $0xa4] sm:$0xf]  ;;  %v1967_v41 = vor.u32 %v2124_v35, %v1966_v34 }
  0x55   : > { %v1803_v22 = vor.u32 %v2079_v10, %v1800_v12  ;;  %v2070_v37 = vld [vmem:[#allocation2 + $0xb4] sm:$0xf0]  ;;  %v1752_v40 = vld [vmem:[#allocation2 + $0xb8] sm:$0xf0]  ;;  %v2115_v42 = vld [vmem:[#allocation2 + $0x224] sm:$0xf] }
  0x56   : > { %1009 = vmatpush.bf16.msrb.mxu0 %v1695_v31  ;;  %v1968_v31 = vld [vmem:[#allocation2 + $0x268] sm:$0xf0]  ;;  %v1944_v43 = vld [vmem:[#allocation2 + $0x238] sm:$0xf0]  ;;  %v2118_v46 = vld [vmem:[#allocation2 + $0x234] sm:$0xf0]  ;;  %v1755_v47 = vor.u32 %v2067_v39, %v1752_v40 }
  0x57   : > { %1027 = vmatpush.bf16.msrb.mxu1 %v1911_v28  ;;  %v1776_v28 = vld [vmem:[#allocation2 + $0xe8] sm:$0xf0]  ;;  %v1971_v38 = vor.u32 %v2121_v30, %v1968_v31  ;;  %v1726_v27 = vld [vmem:[#allocation2 + $0x70] sm:$0xf]  ;;  %v1947_v49 = vor.u32 %v2115_v42, %v1944_v43  ;;  %v2061_v50 = vld [vmem:[#allocation2 + $0x74] sm:$0xf] }
  0x58   : > { %1065 = vmatpush.bf16.msrb.mxu3 %v1915_v29  ;;  %1047 = vmatpush.bf16.msrb.mxu2 %v1699_v15  ;;  %v1991_v29 = vor.u32 %v2130_v21, %v1990_v20  ;;  %v1779_v15 = vor.u32 %v2073_v26, %v1776_v28  ;;  %v1728_v51 = vld [vmem:[#allocation2 + $0x88] sm:$0xf0]  ;;  %v1702_v58 = vld [vmem:[#allocation2 + $0x40] sm:$0xf]  ;;  %v2058_v59 = vld [vmem:[#allocation2 + $0x54] sm:$0xf0] }
  0x59   : > { %v1920_v54 = vld [vmem:[#allocation2 + $0x208] sm:$0xf0]  ;;  %v2055_v61 = vld [vmem:[#allocation2 + $0x44] sm:$0xf]  ;;  %v1896_v2 = vld [vmem:[#allocation2 + $0x1d8] sm:$0xf0] }
  0x5a   : > { %1010 = vmatpush.bf16.msrb.mxu0 %v1671_v48  ;;  %v2064_v48 = vld [vmem:[#allocation2 + $0x84] sm:$0xf0]  ;;  %v2103_v1 = vld [vmem:[#allocation2 + $0x1c4] sm:$0xf]  ;;  %v1894_v32 = vld [vmem:[#allocation2 + $0x1c0] sm:$0xf] }
  0x5b   : > { %1028 = vmatpush.bf16.msrb.mxu1 %v1887_v44  ;;  %v1751_v44 = vor.u32 %v2070_v37, %v1750_v36  ;;  %v1727_v16 = vor.u32 %v2064_v48, %v1726_v27  ;;  %v2106_v5 = vld [vmem:[#allocation2 + $0x1d4] sm:$0xf0]  ;;  %v1678_v7 = vld [vmem:[#allocation2 + $0x10] sm:$0xf]  ;;  %v2052_v8 = vld [vmem:[#allocation2 + $0x24] sm:$0xf0] }
  0x5c   : > { %1066 = vmatpush.bf16.msrb.mxu3 %v1891_v45  ;;  %1048 = vmatpush.bf16.msrb.mxu2 %v1675_v52  ;;  %v1942_v45 = vld [vmem:[#allocation2 + $0x220] sm:$0xf]  ;;  %v2049_v10 = vld [vmem:[#allocation2 + $0x14] sm:$0xf]  ;;  %v1680_v12 = vld [vmem:[#allocation2 + $0x28] sm:$0xf0] }
  0x5d   : > { %1011 = vmatmul.bf16.vlgmr.msrb.gmra.mxu0 %v2518_v0  ;;  %v1943_v52 = vor.u32 %v2118_v46, %v1942_v45  ;;  %v2097_v17 = vld [vmem:[#allocation2 + $0x194] sm:$0xf]  ;;  %v1872_v18 = vld [vmem:[#allocation2 + $0x1a8] sm:$0xf0]  ;;  %v1870_v20 = vld [vmem:[#allocation2 + $0x190] sm:$0xf] }
  0x5e   : > { %1079 = vmatpush.bf16.msra.mxu0 %v1847_v53  ;;  %v2109_v53 = vld [vmem:[#allocation2 + $0x1f4] sm:$0xf]  ;;  %v2100_v21 = vld [vmem:[#allocation2 + $0x1a4] sm:$0xf0]  ;;  %v1875_v23 = vor.u32 %v2097_v17, %v1872_v18  ;;  %vm1510_vm6 = vcmask 1041408   ;;  %vm1513_vm7 = vcmask 519170  }
  0x5f   : > { %1029 = vmatpush.bf16.msrb.mxu1 %v1863_v56  ;;  %1049 = vmatmul.bf16.vlgmr.msrb.gmra.mxu2 %v2518_v0  ;;  %v2112_v56 = vld [vmem:[#allocation2 + $0x204] sm:$0xf0]  ;;  %v1923_v60 = vor.u32 %v2109_v53, %v1920_v54  ;;  %v1871_v24 = vor.u32 %v2100_v21, %v1870_v20  ;;  %s284_s25 = scalar_lea.vmem [#allocation7], %s2764_s28  ;;  %s1540_s13 = sshll.u32 %s1536_s11, 4  ;;  %vm1514_vm8 = vmor %vm1513_vm7, %vm1510_vm6  ;;  %s1541_s13 = int_to_ptr.hbm [resolvable:$true] %s1540_s13 }
  0x60   : > { %1117 = vmatpush.bf16.msra.mxu2 %v1851_v55  ;;  %1067 = vmatpush.bf16.msrb.mxu3 %v1867_v57  ;;  %v1918_v55 = vld [vmem:[#allocation2 + $0x1f0] sm:$0xf]  ;;  %v1731_v57 = vor.u32 %v2061_v50, %v1728_v51  ;;  %v1274_v45 = vld [vmem:[#allocation5] sm:$0x3]  ;;  %s1538_s12 = sshll.u32 %s284_s25, 4  ;;  %s1522_s14 = scalar_lea.sflag [#allocation4], %s282_s26  ;;  %s1539_s12 = int_to_ptr.vmem [resolvable:$true] %s1538_s12 }
  0x61   : > { %s2307_s15 = sshra.s32 %s1541_s13, 4  ;;  %s2308_s15 = int_to_ptr.hbm [resolvable:$true] %s2307_s15 }
  0x62   : > { %1080 = vmatpush.bf16.msra.mxu0 %v1823_v3  ;;  %2024 = vmatmul.msk.bf16.vlgmr.msrb.gmra.mxu1 %vm901_vm1, %v2522_v11  ;;  %v1703_v3 = vor.u32 %v2058_v59, %v1702_v58  ;;  %s2309_s16 = scalar_lea.hbm %s2308_s15, 4  ;;  %p2314_p3 = scmp.lt.s32.totalorder %s2308_s15, %s2817_s6 }
  0x63   : > { %1098 = vmatpush.bf16.msra.mxu1 %v922_v62  ;;  %2026 = vmatmul.msk.bf16.vlgmr.msrb.gmra.mxu3 %vm901_vm1, %v2522_v11  ;;  %v1704_v62 = vld [vmem:[#allocation2 + $0x58] sm:$0xf0]  ;;  %p2310_p0 = scmp.ne.s32.totalorder %s2308_s15, %s2309_s16 }
  0x64   : > { %1136 = vmatpush.bf16.msra.mxu3 %v925_v63  ;;  %1118 = vmatpush.bf16.msra.mxu2 %v1827_v6  ;;  %v1919_v63 = vor.u32 %v2112_v56, %v1918_v55  ;;  %v1707_v6 = vor.u32 %v2055_v61, %v1704_v62 }
  0x65   : > { %p2311_p1 = pnand %p2310_p0, %p2443_p5 }
  0x66   : > { %1081 = vmatpush.bf16.msra.mxu0 %v1799_v19  ;;  %v1679_v19 = vor.u32 %v2052_v8, %v1678_v7 }
  0x67   : > { %1099 = vmatpush.bf16.msra.mxu1 %v2015_v13  ;;  %v1895_v13 = vor.u32 %v2106_v5, %v1894_v32  ;;  %p2312_p2 = pneg %p2311_p1 }
  0x68   : > { %1137 = vmatpush.bf16.msra.mxu3 %v2019_v9  ;;  %1119 = vmatpush.bf16.msra.mxu2 %v1803_v22  ;;  %v1899_v9 = vor.u32 %v2103_v1, %v1896_v2  ;;  %v1683_v22 = vor.u32 %v2049_v10, %v1680_v12 }
  0x6a   : > { %1082 = vmatpush.bf16.msra.mxu0 %v1775_v33 }
  0x6b   : > { %1100 = vmatpush.bf16.msra.mxu1 %v1991_v29 }
  0x6c   : > { %1138 = vmatpush.bf16.msra.mxu3 %v1995_v25  ;;  %1120 = vmatpush.bf16.msra.mxu2 %v1779_v15 }
  0x6d   : > { %1016 = vmatmul.bf16.gmra.mxu0 %v2542_v4 }
  0x6e   : > { %1083 = vmatpush.bf16.msra.mxu0 %v1751_v44 }
  0x6f   : > { %1101 = vmatpush.bf16.msra.mxu1 %v1967_v41  ;;  %1054 = vmatmul.bf16.gmra.mxu2 %v2542_v4 }
  0x70   : > { %1139 = vmatpush.bf16.msra.mxu3 %v1971_v38  ;;  %1121 = vmatpush.bf16.msra.mxu2 %v1755_v47 }
  0x72   : > { %1084 = vmatpush.bf16.msra.mxu0 %v1727_v16  ;;  %2025 = vmatmul.msk.bf16.gmra.mxu1 %vm901_vm1, %v2544_v14 }
  0x73   : > { %1102 = vmatpush.bf16.msra.mxu1 %v1943_v52  ;;  %2027 = vmatmul.msk.bf16.gmra.mxu3 %vm901_vm1, %v2544_v14 }
  0x74   : > { %1140 = vmatpush.bf16.msra.mxu3 %v1947_v49  ;;  %1122 = vmatpush.bf16.msra.mxu2 %v1731_v57  ;;  %v2598_v49 = vperm.slane %v1274_v45, 0 }
  0x76   : > { %1085 = vmatpush.bf16.msra.mxu0 %v1703_v3 }
  0x77   : > { %1103 = vmatpush.bf16.msra.mxu1 %v1919_v63 }
  0x78   : > { %1141 = vmatpush.bf16.msra.mxu3 %v1923_v60  ;;  %1123 = vmatpush.bf16.msra.mxu2 %v1707_v6 }
  0x7a   : > { %1086 = vmatpush.bf16.msra.mxu0 %v1679_v19 }
  0x7b   : > { %1104 = vmatpush.bf16.msra.mxu1 %v1895_v13 }
  0x7c   : > { %1142 = vmatpush.bf16.msra.mxu3 %v1899_v9  ;;  %1124 = vmatpush.bf16.msra.mxu2 %v1683_v22 }
  0x7d   : > { %1087 = vmatmul.bf16.vlgmr.msra.gmra.mxu0 %v2518_v0 }
  0x7f   : > { %1105 = vmatpush.bf16.msra.mxu1 %v1871_v24  ;;  %1125 = vmatmul.bf16.vlgmr.msra.gmra.mxu2 %v2518_v0 }
  0x80   : > { %1143 = vmatpush.bf16.msra.mxu3 %v1875_v23 }
  0x82   : > { %2028 = vmatmul.msk.bf16.vlgmr.msra.gmra.mxu1 %vm901_vm1, %v2522_v11 }
  0x83   : > { %2030 = vmatmul.msk.bf16.vlgmr.msra.gmra.mxu3 %vm901_vm1, %v2522_v11 }
  0x8d   : > { %1092 = vmatmul.bf16.gmra.mxu0 %v2542_v4 }
  0x8f   : > { %1130 = vmatmul.bf16.gmra.mxu2 %v2542_v4 }
  0x92   : > { %2029 = vmatmul.msk.bf16.gmra.mxu1 %vm901_vm1, %v2544_v14 }
  0x93   : > { %2031 = vmatmul.msk.bf16.gmra.mxu3 %vm901_vm1, %v2544_v14 }
  0xba   : > { %v936_v25 = vpop.f32.mrf.mxu0 }
  0xbf   : > { %v955_v26 = vpop.f32.mrf.mxu1 }
  0xc0   : > { %v956_v48 = vadd.f32 %v955_v26, %v936_v25 }
  0xc2   : > { %v2578_v28 = vpop.f32.mrf.mxu2  ;;  %v938_v0 = vpop.f32.mrf.mxu0 }
  0xc6   : > { %v2580_v29 = vpop.f32.mrf.mxu3 }
  0xc7   : > { %v957_v30 = vpop.f32.mrf.mxu1 }
  0xc8   : > { %v958_v59 = vadd.f32 %v957_v30, %v938_v0 }
  0xca   : > { %v2582_v31 = vpop.f32.mrf.mxu2  ;;  %v941_v11 = vpop.f32.mrf.mxu0 }
  0xce   : > { %v2584_v33 = vpop.f32.mrf.mxu3 }
  0xcf   : > { %v960_v4 = vpop.f32.mrf.mxu1 }
  0xd0   : > { %v961_v8 = vadd.f32 %v960_v4, %v941_v11 }
  0xd2   : > { %v2586_v34 = vpop.f32.mrf.mxu2  ;;  %v943_v35 = vpop.f32.mrf.mxu0 }
  0xd6   : > { %v2588_v15 = vpop.f32.mrf.mxu3 }
  0xd7   : > { %v962_v14 = vpop.f32.mrf.mxu1 }
  0xd8   : > { %v963_v19 = vadd.f32 %v962_v14, %v943_v35 }
  0xda   : > { %v2590_v36 = vpop.f32.mrf.mxu2  ;;  %v1012_v37 = vpop.f32.mrf.mxu0  ;;  %v1156_v35 = vsel %vm1155_vm3, %v963_v19, 0.0 }
  0xde   : > { %v2592_v38 = vpop.f32.mrf.mxu3 }
  0xdf   : > { %v1031_v39 = vpop.f32.mrf.mxu1 }
  0xe0   : > { %v2594_v40 = vadd.f32 %v1031_v39, %v1012_v37  ;;  %v2621_v37 = vadd.f32 %v2580_v29, %v2578_v28  ;;  %v2625_v39 = vperm.slane %v1274_v45, 1 }
  0xe2   : > { %v1050_v41 = vpop.f32.mrf.mxu2  ;;  %v1014_v42 = vpop.f32.mrf.mxu0 }
  0xe6   : > { %v1069_v43 = vpop.f32.mrf.mxu3 }
  0xe7   : > { %v1070_v44 = vadd.f32 %v1069_v43, %v1050_v41  ;;  %v1033_v46 = vpop.f32.mrf.mxu1 }
  0xe8   : > { %v2596_v47 = vadd.f32 %v1033_v46, %v1014_v42 }
  0xe9   : > { %v1167_v27 = vrot.slane %v1070_v44, 7 }
  0xea   : > { %v1052_v51 = vpop.f32.mrf.mxu2  ;;  %v1017_v53 = vpop.f32.mrf.mxu0 }
  0xeb   : > { %v1189_v50 = vsel %vm1166_vm2, 0.0, %v1167_v27 }
  0xec   : > { %v1191_v52 = vadd.f32 %v1189_v50, %v956_v48 }
  0xee   : > { %v1280_v54 = vadd.f32 %v2598_v49, %v1191_v52  ;;  %v1071_v16 = vpop.f32.mrf.mxu3 }
  0xef   : > { %v1072_v55 = vadd.f32 %v1071_v16, %v1052_v51  ;;  %v1036_v56 = vpop.f32.mrf.mxu1 }
  0xf0   : > { %2201 = vtanh.f32 %v1280_v54  ;;  %v2602_v57 = vadd.f32 %v1036_v56, %v1017_v53  ;;  %v2635_v56 = vadd.f32 %v2584_v33, %v2582_v31 }
  0xf1   : > { %v1169_v58 = vrot.slane %v1072_v55, 7 }
  0xf2   : > { %v1055_v61 = vpop.f32.mrf.mxu2  ;;  %v1019_v63 = vpop.f32.mrf.mxu0 }
  0xf3   : > { %v1170_v60 = vsel %vm1166_vm2, %v1167_v27, %v1169_v58 }
  0xf4   : > { %v1193_v62 = vadd.f32 %v1170_v60, %v958_v59 }
  0xf6   : > { %v2202_v1 = vpop.eup %2201  ;;  %v1282_v2 = vadd.f32 %v2598_v49, %v1193_v62  ;;  %v1074_v3 = vpop.f32.mrf.mxu3 }
  0xf7   : > { %1319 = vst [vmem:[%s2609_s19] sm:$0xff] %v2202_v1  ;;  %v1075_v32 = vadd.f32 %v1074_v3, %v1055_v61  ;;  %v1038_v5 = vpop.f32.mrf.mxu1  ;;  %v1428_v25 = vmul.f32 %v2202_v1, %v2202_v1 }
  0xf8   : > { %2203 = vtanh.f32 %v1282_v2  ;;  %v1039_v6 = vadd.f32 %v1038_v5, %v1019_v63 }
  0xf9   : > { %v1173_v7 = vrot.slane %v1075_v32, 7 }
  0xfa   : > { %v2614_v9 = vsel %vm1155_vm3, %v1039_v6, 0.0  ;;  %v1057_v12 = vpop.f32.mrf.mxu2  ;;  %v1088_v17 = vpop.f32.mrf.mxu0 }
  0xfb   : > { %v1174_v10 = vsel %vm1166_vm2, %v1169_v58, %v1173_v7 }
  0xfc   : > { %v1195_v13 = vadd.f32 %v1174_v10, %v961_v8  ;;  %v2651_v10 = vadd.f32 %v2588_v15, %v2586_v34 }
  0xfe   : > { %v2204_v18 = vpop.eup %2203  ;;  %v1284_v20 = vadd.f32 %v2598_v49, %v1195_v13  ;;  %v1076_v21 = vpop.f32.mrf.mxu3 }
  0xff   : > { %1321 = vst [vmem:[%s2609_s19 + $0x10] sm:$0xff] %v2204_v18  ;;  %v1077_v22 = vadd.f32 %v1076_v21, %v1057_v12  ;;  %v1107_v23 = vpop.f32.mrf.mxu1  ;;  %v1372_v24 = vadd.f32 %v2204_v18, %v2202_v1  ;;  %v1430_v26 = vmul.f32 %v2204_v18, %v2204_v18 }
 0x100   : > { %2205 = vtanh.f32 %v1284_v20  ;;  %v1108_v0 = vadd.f32 %v1107_v23, %v1088_v17  ;;  %v1001_v23 = vadd.f32 %v2592_v38, %v2590_v36 }
 0x101   : > { %v1177_v30 = vrot.slane %v1077_v22, 7  ;;  %v1436_v11 = vadd.f32 %v1430_v26, %v1428_v25 }
 0x102   : > { %v1168_v4 = vrot.slane %v1108_v0, 7  ;;  %v1126_v41 = vpop.f32.mrf.mxu2  ;;  %v1090_v44 = vpop.f32.mrf.mxu0 }
 0x103   : > { %v1178_v14 = vsel %vm1166_vm2, %v1173_v7, %v1177_v30 }
 0x104   : > { %v1197_v42 = vadd.f32 %v1178_v14, %v1156_v35  ;;  %v1190_v43 = vsel %vm1166_vm2, 0.0, %v1168_v4  ;;  %1211 = vrot.lane.b32.xlu0 %v1168_v4, %s2369_s20 }
 0x105   : > { %v1192_v46 = vadd.f32 %v1190_v43, %v2621_v37 }
 0x106   : > { %v2206_v27 = vpop.eup %2205  ;;  %v1286_v28 = vadd.f32 %v2598_v49, %v1197_v42  ;;  %v1145_v29 = vpop.f32.mrf.mxu3 }
 0x107   : > { %1323 = vst [vmem:[%s2609_s19 + $0x20] sm:$0xff] %v2206_v27  ;;  %v1281_v48 = vadd.f32 %v2625_v39, %v1192_v46  ;;  %v1146_v50 = vadd.f32 %v1145_v29, %v1126_v41  ;;  %v1109_v45 = vpop.f32.mrf.mxu1  ;;  %v1373_v51 = vadd.f32 %v2206_v27, %v1372_v24  ;;  %v1432_v52 = vmul.f32 %v2206_v27, %v2206_v27 }
 0x108   : > { %2207 = vtanh.f32 %v1286_v28  ;;  %v1110_v53 = vadd.f32 %v1109_v45, %v1090_v44  ;;  %v2668_v41 = vsel %vm1155_vm3, %v1001_v23, 0.0 }
 0x109   : > { %2209 = vtanh.f32 %v1281_v48  ;;  %v1204_v54 = vrot.slane %v1146_v50, 7  ;;  %v1437_v16 = vadd.f32 %v1436_v11, %v1432_v52 }
 0x10a   : > { %v1171_v55 = vrot.slane %v1110_v53, 7  ;;  %v1128_v58 = vpop.f32.mrf.mxu2  ;;  %v1093_v60 = vpop.f32.mrf.mxu0 }
 0x10c   : > { %1213 = vrot.lane.b32.xlu0 %v1204_v54, %s2369_s20  ;;  %v1172_v59 = vsel %vm1166_vm2, %v1168_v4, %v1171_v55 }
 0x10d   : > { %1215 = vrot.lane.b32.xlu1 %v1172_v59, %s2369_s20  ;;  %v1194_v61 = vadd.f32 %v1172_v59, %v2635_v56 }
 0x10e   : > { %v2208_v62 = vpop.eup %2207  ;;  %v1147_v63 = vpop.f32.mrf.mxu3 }
 0x10f   : > { %v2210_v1 = vpop.eup %2209  ;;  %1325 = vst [vmem:[%s2609_s19 + $0x30] sm:$0xff] %v2208_v62  ;;  %v1148_v2 = vadd.f32 %v1147_v63, %v1128_v58  ;;  %v1283_v31 = vadd.f32 %v2625_v39, %v1194_v61  ;;  %v1112_v33 = vpop.f32.mrf.mxu1  ;;  %v2643_v3 = vadd.f32 %v2208_v62, %v1373_v51  ;;  %v1434_v32 = vmul.f32 %v2208_v62, %v2208_v62 }
 0x110   : > { %1320 = vst.msk [vmem:[%s2609_s19 + $0x8] sm:$0xff] %vm1227_vm4, %v2210_v1  ;;  %v1113_v5 = vadd.f32 %v1112_v33, %v1093_v60  ;;  %v1429_v21 = vmul.f32 %v2210_v1, %v2210_v1  ;;  %v1381_v26 = vsel %vm1227_vm4, %v2210_v1, 0.0 }
 0x111   : > { %v1205_v6 = vrot.slane %v1148_v2, 7  ;;  %2211 = vtanh.f32 %v1283_v31  ;;  %v2647_v7 = vadd.f32 %v1437_v16, %v1434_v32 }
 0x112   : > { %v1175_v8 = vrot.slane %v1113_v5, 7  ;;  %v1131_v12 = vpop.f32.mrf.mxu2  ;;  %v1095_v19 = vpop.f32.mrf.mxu0  ;;  %v1445_v14 = vsel %vm1227_vm4, %v1429_v21, 0.0 }
 0x113   : > { %v1206_v13 = vsel %vm1166_vm2, %v1204_v54, %v1205_v6 }
 0x114   : > { %v1176_v17 = vsel %vm1166_vm2, %v1171_v55, %v1175_v8 }
 0x115   : > { %1217 = vrot.lane.b32.xlu1 %v1206_v13, %s2369_s20  ;;  %1219 = vrot.lane.b32.xlu2 %v1176_v17, %s2369_s20  ;;  %v1196_v18 = vadd.f32 %v1176_v17, %v2651_v10 }
 0x116   : > { %v1150_v20 = vpop.f32.mrf.mxu3 }
 0x117   : > { %v2212_v22 = vpop.eup %2211  ;;  %v1151_v34 = vadd.f32 %v1150_v20, %v1131_v12  ;;  %v1285_v15 = vadd.f32 %v2625_v39, %v1196_v18  ;;  %v1114_v24 = vpop.f32.mrf.mxu1 }
 0x118   : > { %1322 = vst.msk [vmem:[%s2609_s19 + $0x18] sm:$0xff] %vm1227_vm4, %v2212_v22  ;;  %v1115_v25 = vadd.f32 %v1114_v24, %v1095_v19  ;;  %v1382_v0 = vsel %vm1227_vm4, %v2212_v22, 0.0  ;;  %v1431_v30 = vmul.f32 %v2212_v22, %v2212_v22 }
 0x119   : > { %v1207_v11 = vrot.slane %v1151_v34, 7  ;;  %2213 = vtanh.f32 %v1285_v15  ;;  %v1383_v4 = vadd.f32 %v1382_v0, %v1381_v26 }
 0x11a   : > { %v1179_v35 = vrot.slane %v1115_v25, 7  ;;  %v1446_v36 = vsel %vm1227_vm4, %v1431_v30, 0.0  ;;  %v1133_v46 = vpop.f32.mrf.mxu2 }
 0x11b   : > { %v1447_v38 = vadd.f32 %v1446_v36, %v1445_v14  ;;  %v1208_v42 = vsel %vm1166_vm2, %v1205_v6, %v1207_v11 }
 0x11c   : > { %v1180_v43 = vsel %vm1166_vm2, %v1175_v8, %v1179_v35 }
 0x11d   : > { %1221 = vrot.lane.b32.xlu2 %v1208_v42, %s2369_s20  ;;  %1223 = vrot.lane.b32.xlu0 %v1180_v43, %s2369_s20  ;;  %v1198_v44 = vadd.f32 %v1180_v43, %v2668_v41 }
 0x11e   : > { %v1152_v27 = vpop.f32.mrf.mxu3 }
 0x11f   : > { %v2214_v28 = vpop.eup %2213  ;;  %v1153_v29 = vadd.f32 %v1152_v27, %v1133_v46  ;;  %v1287_v48 = vadd.f32 %v2625_v39, %v1198_v44 }
 0x120   : > { %1324 = vst.msk [vmem:[%s2609_s19 + $0x28] sm:$0xff] %vm1227_vm4, %v2214_v28  ;;  %v1384_v50 = vsel %vm1227_vm4, %v2214_v28, 0.0  ;;  %v1433_v45 = vmul.f32 %v2214_v28, %v2214_v28 }
 0x121   : > { %v1209_v51 = vrot.slane %v1153_v29, 7  ;;  %2215 = vtanh.f32 %v1287_v48  ;;  %v1385_v52 = vadd.f32 %v1384_v50, %v1383_v4 }
 0x122   : > { %v1448_v53 = vsel %vm1227_vm4, %v1433_v45, 0.0 }
 0x123   : > { %v1210_v54 = vsel %vm1166_vm2, %v1207_v11, %v1209_v51  ;;  %v1449_v16 = vadd.f32 %v1448_v53, %v1447_v38 }
 0x124   : > { %1225 = vrot.lane.b32.xlu1 %v1210_v54, %s2369_s20 }
 0x125   : > { %1288 = vrot.lane.b32.xlu2 %v2598_v49, %s2369_s20 }
 0x127   : > { %v2216_v55 = vpop.eup %2215 }
 0x128   : > { %1326 = vst.msk [vmem:[%s2609_s19 + $0x38] sm:$0xff] %vm1227_vm4, %v2216_v55  ;;  %v1386_v58 = vsel %vm1227_vm4, %v2216_v55, 0.0  ;;  %v1435_v59 = vmul.f32 %v2216_v55, %v2216_v55 }
 0x129   : > { %v2687_v60 = vadd.f32 %v1386_v58, %v1385_v52 }
 0x12a   : > { %v1450_v61 = vsel %vm1227_vm4, %v1435_v59, 0.0 }
 0x12b   : > { %v2690_v62 = vadd.f32 %v1450_v61, %v1449_v16 }
 0x16f   : > { %v1220_v1 = vpop.permute.xlu2 %1219 }
 0x176   : > { %v1212_v63 = vpop.permute.xlu0 %1211 }
 0x177   : > { %v1222_v5 = vpop.permute.xlu2 %1221 }
 0x178   : > { %v1230_v8 = vsel %vm1227_vm4, %v1220_v1, %v1222_v5 }
 0x17e   : > { %v1214_v2 = vpop.permute.xlu0 %1213 }
 0x17f   : > { %v1228_v31 = vsel %vm1227_vm4, %v1212_v63, %v1214_v2  ;;  %v1216_v33 = vpop.permute.xlu1 %1215  ;;  %v1235_v49 = vsel %vm1166_vm2, 0.0, %v1214_v2  ;;  %v1289_v19 = vpop.permute.xlu2 %1288 }
 0x180   : > { %1240 = vrot.lane.b32.xlu0 %v1235_v49, %s2369_s20  ;;  %v1234_v32 = vsel %vm1166_vm2, 0.0, %v1228_v31 }
 0x181   : > { %1238 = vrot.lane.b32.xlu2 %v1234_v32, %s2369_s20 }
 0x187   : > { %v1218_v6 = vpop.permute.xlu1 %1217 }
 0x188   : > { %1246 = vrot.lane.b32.xlu0 %v1230_v8, %s2369_s20  ;;  %v1229_v12 = vsel %vm1227_vm4, %v1216_v33, %v1218_v6 }
 0x189   : > { %1242 = vrot.lane.b32.xlu1 %v1229_v12, %s2369_s20  ;;  %1244 = vrot.lane.b32.xlu2 %v1218_v6, %s2369_s20 }
 0x18f   : > { %v1224_v17 = vpop.permute.xlu0 %1223 }
 0x190   : > { %1290 = vrot.lane.b32.xlu0 %v2625_v39, %s2369_s20 }
 0x191   : > { %1248 = vrot.lane.b32.xlu1 %v1222_v5, %s2369_s20 }
 0x196   : > { %v1226_v13 = vpop.permute.xlu1 %1225 }
 0x197   : > { %1252 = vrot.lane.b32.xlu2 %v1226_v13, %s2369_s20  ;;  %v1231_v18 = vsel %vm1227_vm4, %v1224_v17, %v1226_v13 }
 0x199   : > { %1250 = vrot.lane.b32.xlu1 %v1231_v18, %s2369_s20 }
 0x1db   : > { %v1239_v20 = vpop.permute.xlu2 %1238 }
 0x1dc   : > { %v1266_v21 = vadd.f32 %v1239_v20, %v2621_v37 }
 0x1de   : > { %v1295_v22 = vadd.f32 %v1289_v19, %v1266_v21 }
 0x1e0   : > { %2217 = vtanh.f32 %v1295_v22 }
 0x1e3   : > { %v1245_v25 = vpop.permute.xlu2 %1244 }
 0x1e6   : > { %v2218_v23 = vpop.eup %2217 }
 0x1e7   : > { %1335 = vrot.lane.b32.xlu1 %v2218_v23, %s2369_s20  ;;  %v1458_v58 = vmul.f32 %v2218_v23, %v2218_v23  ;;  %v1395_v63 = vsel %vm1394_vm5, %v2218_v23, 0.0 }
 0x1e9   : > { %v1466_v49 = vsel %vm1394_vm5, %v1458_v58, 0.0  ;;  %v1439_v58 = vrot.slane %v2647_v7, 4 }
 0x1f2   : > { %v1241_v39 = vpop.permute.xlu0 %1240 }
 0x1f3   : > { %v1254_v0 = vsel %vm1227_vm4, %v1239_v20, %v1241_v39 }
 0x1f4   : > { %v1267_v11 = vadd.f32 %v1254_v0, %v2594_v40  ;;  %v1253_v40 = vpop.permute.xlu2 %1252 }
 0x1fa   : > { %v1247_v34 = vpop.permute.xlu0 %1246 }
 0x1fb   : > { %v1243_v15 = vpop.permute.xlu1 %1242  ;;  %v1270_v37 = vadd.f32 %v1247_v34, %v2651_v10 }
 0x1fc   : > { %v1268_v24 = vadd.f32 %v1243_v15, %v2635_v56  ;;  %v1255_v30 = vsel %vm1227_vm4, %v1243_v15, %v1245_v25 }
 0x1fd   : > { %v1269_v4 = vadd.f32 %v1255_v30, %v2596_v47  ;;  %v1299_v46 = vadd.f32 %v1289_v19, %v1270_v37 }
 0x1fe   : > { %v1297_v26 = vadd.f32 %v1289_v19, %v1268_v24 }
 0x200   : > { %2219 = vtanh.f32 %v1297_v26 }
 0x202   : > { %v1291_v35 = vpop.permute.xlu0 %1290 }
 0x203   : > { %v1292_v14 = vsel %vm1227_vm4, %v1289_v19, %v1291_v35  ;;  %v1249_v36 = vpop.permute.xlu1 %1248 }
 0x204   : > { %v1296_v38 = vadd.f32 %v1292_v14, %v1267_v11  ;;  %v1298_v42 = vadd.f32 %v1292_v14, %v1269_v4  ;;  %v1256_v56 = vsel %vm1227_vm4, %v1247_v34, %v1249_v36 }
 0x205   : > { %v1271_v43 = vadd.f32 %v1256_v56, %v2602_v57 }
 0x206   : > { %v2220_v44 = vpop.eup %2219  ;;  %2221 = vtanh.f32 %v1296_v38 }
 0x207   : > { %2223 = vtanh.f32 %v1298_v42  ;;  %v1300_v27 = vadd.f32 %v1292_v14, %v1271_v43  ;;  %1339 = vrot.lane.b32.xlu0 %v2220_v44, %s2369_s20  ;;  %v1460_v57 = vmul.f32 %v2220_v44, %v2220_v44  ;;  %v1396_v55 = vsel %vm1394_vm5, %v2220_v44, 0.0 }
 0x208   : > { %v1397_v2 = vadd.f32 %v1396_v55, %v1395_v63 }
 0x209   : > { %2225 = vtanh.f32 %v1300_v27  ;;  %v1467_v1 = vsel %vm1394_vm5, %v1460_v57, 0.0 }
 0x20a   : > { %2227 = vtanh.f32 %v1299_v46  ;;  %v1468_v32 = vadd.f32 %v1467_v1, %v1466_v49 }
 0x20b   : > { %v1251_v47 = vpop.permute.xlu1 %1250 }
 0x20c   : > { %v2222_v10 = vpop.eup %2221  ;;  %v1257_v28 = vsel %vm1227_vm4, %v1251_v47, %v1253_v40  ;;  %v1272_v29 = vadd.f32 %v1251_v47, %v2668_v41 }
 0x20d   : > { %v2224_v48 = vpop.eup %2223  ;;  %v1273_v50 = vadd.f32 %v1257_v28, %v2614_v9  ;;  %1337 = vrot.lane.b32.xlu2 %v2222_v10, %s2369_s20  ;;  %v1459_v45 = vmul.f32 %v2222_v10, %v2222_v10 }
 0x20e   : > { %v1301_v51 = vadd.f32 %v1289_v19, %v1272_v29  ;;  %1341 = vrot.lane.b32.xlu1 %v2224_v48, %s2369_s20  ;;  %v1408_v52 = vadd.f32 %v2224_v48, %v2222_v10  ;;  %v1461_v53 = vmul.f32 %v2224_v48, %v2224_v48 }
 0x20f   : > { %v2226_v54 = vpop.eup %2225  ;;  %v1302_v16 = vadd.f32 %v1292_v14, %v1273_v50 }
 0x210   : > { %v2228_v59 = vpop.eup %2227  ;;  %2229 = vtanh.f32 %v1301_v51  ;;  %v1409_v41 = vadd.f32 %v2226_v54, %v1408_v52  ;;  %v1463_v61 = vmul.f32 %v2226_v54, %v2226_v54  ;;  %v1479_v9 = vadd.f32 %v1461_v53, %v1459_v45 }
 0x211   : > { %2231 = vtanh.f32 %v1302_v16  ;;  %v1462_v33 = vmul.f32 %v2228_v59, %v2228_v59  ;;  %v1398_v5 = vsel %vm1394_vm5, %v2228_v59, 0.0 }
 0x212   : > { %v1480_v31 = vadd.f32 %v1479_v9, %v1463_v61  ;;  %v1399_v8 = vadd.f32 %v1398_v5, %v1397_v2  ;;  %v1440_v9 = vadd.f32 %v1439_v58, %v2647_v7 }
 0x213   : > { %v1469_v18 = vsel %vm1394_vm5, %v1462_v33, 0.0 }
 0x214   : > { %v1470_v21 = vadd.f32 %v1469_v18, %v1468_v32 }
 0x215   : > { %1343 = vrot.lane.b32.xlu2 %v2228_v59, %s2369_s20  ;;  %v1388_v59 = vrot.slane %v2687_v60, 4 }
 0x216   : > { %v2230_v6 = vpop.eup %2229 }
 0x217   : > { %v2232_v12 = vpop.eup %2231  ;;  %v1400_v13 = vsel %vm1394_vm5, %v2230_v6, 0.0  ;;  %v1464_v17 = vmul.f32 %v2230_v6, %v2230_v6  ;;  %v1389_v63 = vadd.f32 %v1388_v59, %v2687_v60 }
 0x218   : > { %v1401_v19 = vadd.f32 %v1400_v13, %v1399_v8  ;;  %v1410_v20 = vadd.f32 %v2232_v12, %v1409_v41  ;;  %v1465_v22 = vmul.f32 %v2232_v12, %v2232_v12  ;;  %v1375_v41 = vrot.slane %v2643_v3, 4 }
 0x219   : > { %v1471_v23 = vsel %vm1394_vm5, %v1464_v17, 0.0  ;;  %v1390_v33 = vrot.slane %v1389_v63, 2 }
 0x21a   : > { %v1402_v39 = vrot.slane %v1401_v19, 4  ;;  %v1411_v34 = vrot.slane %v1410_v20, 4  ;;  %v1472_v15 = vadd.f32 %v1471_v23, %v1470_v21  ;;  %v1481_v24 = vadd.f32 %v1480_v31, %v1465_v22 }
 0x21b   : > { %v1376_v1 = vadd.f32 %v1375_v41, %v2643_v3  ;;  %v1441_v31 = vrot.slane %v1440_v9, 2  ;;  %v1391_v8 = vadd.f32 %v1390_v33, %v1389_v63 }
 0x21c   : > { %v1403_v25 = vadd.f32 %v1402_v39, %v1401_v19  ;;  %v1412_v26 = vadd.f32 %v1411_v34, %v1410_v20  ;;  %v1473_v0 = vrot.slane %v1472_v15, 4  ;;  %v1482_v30 = vrot.slane %v1481_v24, 4 }
 0x21d   : > { %v1377_v49 = vrot.slane %v1376_v1, 2  ;;  %v1392_v7 = vrot.slane %v1391_v8, 1 }
 0x21e   : > { %v1404_v11 = vrot.slane %v1403_v25, 2  ;;  %v1413_v37 = vrot.slane %v1412_v26, 2  ;;  %v1474_v4 = vadd.f32 %v1473_v0, %v1472_v15  ;;  %v1483_v35 = vadd.f32 %v1482_v30, %v1481_v24 }
 0x21f   : > { %v1393_v20 = vadd.f32 %v1392_v7, %v1391_v8 }
 0x220   : > { %v1405_v14 = vadd.f32 %v1404_v11, %v1403_v25  ;;  %v1414_v36 = vadd.f32 %v1413_v37, %v1412_v26  ;;  %v1475_v38 = vrot.slane %v1474_v4, 2  ;;  %v1484_v42 = vrot.slane %v1483_v35, 2 }
 0x222   : > { %v1406_v56 = vrot.slane %v1405_v14, 1  ;;  %v1415_v43 = vrot.slane %v1414_v36, 1  ;;  %v1476_v44 = vadd.f32 %v1475_v38, %v1474_v4  ;;  %v1485_v47 = vadd.f32 %v1484_v42, %v1483_v35 }
 0x224   : > { %v1407_v46 = vadd.f32 %v1406_v56, %v1405_v14  ;;  %v1416_v27 = vadd.f32 %v1415_v43, %v1414_v36  ;;  %v1477_v40 = vrot.slane %v1476_v44, 1  ;;  %v1486_v28 = vrot.slane %v1485_v47, 1 }
 0x226   : > { %1419 = vrot.lane.b32.xlu0 %v1407_v46, %s2369_s20  ;;  %1421 = vrot.lane.b32.xlu2 %v1416_v27, %s2369_s20  ;;  %v1478_v10 = vadd.f32 %v1477_v40, %v1476_v44  ;;  %v1487_v29 = vadd.f32 %v1486_v28, %v1485_v47 }
 0x228   : > { %1490 = vrot.lane.b32.xlu1 %v1478_v10, %s2369_s20 }
 0x22e   : > { %1492 = vrot.lane.b32.xlu0 %v1487_v29, %s2369_s20  ;;  %1349 = vrot.lane.b32.xlu2 %v2232_v12, %s2369_s20  ;;  %v1378_v12 = vadd.f32 %v1377_v49, %v1376_v1 }
 0x230   : > { %1347 = vrot.lane.b32.xlu1 %v2230_v6, %s2369_s20  ;;  %v1442_v6 = vadd.f32 %v1441_v31, %v1440_v9  ;;  %v1379_v18 = vrot.slane %v1378_v12, 1 }
 0x232   : > { %v1443_v17 = vrot.slane %v1442_v6, 1  ;;  %v1380_v39 = vadd.f32 %v1379_v18, %v1378_v12 }
 0x234   : > { %v1444_v3 = vadd.f32 %v1443_v17, %v1442_v6 }
 0x236   : > { %1345 = vrot.lane.b32.xlu0 %v2226_v54, %s2369_s20  ;;  %v1452_v54 = vrot.slane %v2690_v62, 4  ;;  %s2313_s20 = scalar_lea.hbm %s2817_s6, 8 }
 0x237   : > { %p2315_p4 = scmp.lt.s32.totalorder %s2313_s20, %s2309_s16 }
 0x238   : > { %v1453_v61 = vadd.f32 %v1452_v54, %v2690_v62 }
 0x239   : > { %p2316_p7 = por %p2315_p4, %p2314_p3 }
 0x23a   : > { %v1454_v2 = vrot.slane %v1453_v61, 2 }
 0x23b   : > { %p2317_p8 = pnand %p2316_p7, %p2312_p2 }
 0x23c   : > { %v1455_v32 = vadd.f32 %v1454_v2, %v1453_v61 }
 0x23e   : > { %v1456_v62 = vrot.slane %v1455_v32, 1 }
 0x240   : > { %v1457_v60 = vadd.f32 %v1456_v62, %v1455_v32 }
 0x259   : > { %v1336_v48 = vpop.permute.xlu1 %1335 }
 0x267   : > { %v1338_v50 = vpop.permute.xlu2 %1337 }
 0x268   : > { %v1351_v57 = vsel %vm1227_vm4, %v1336_v48, %v1338_v50  ;;  %2033 = vst.msk [vmem:[%s2609_s19 + $0x48] sm:$0xff] %vm1227_vm4, %v1338_v50 }
 0x269   : > { %2032 = vst [vmem:[%s2609_s19 + $0x40] sm:$0xff] %v1351_v57 }
 0x26f   : > { %v2745_v45 = vpop.permute.xlu2 %1343 }
 0x279   : > { %v1340_v51 = vpop.permute.xlu0 %1339 }
 0x280   : > { %v1342_v52 = vpop.permute.xlu1 %1341  ;;  %v1422_v53 = vpop.permute.xlu2 %1421 }
 0x281   : > { %v1352_v16 = vsel %vm1227_vm4, %v1340_v51, %v1342_v52  ;;  %2035 = vst.msk [vmem:[%s2609_s19 + $0x58] sm:$0xff] %vm1227_vm4, %v1342_v52  ;;  %v1427_v24 = vadd.f32 %v1422_v53, %v1393_v20 }
 0x282   : > { %2034 = vst [vmem:[%s2609_s19 + $0x50] sm:$0xff] %v1352_v16 }
 0x288   : > { %v1350_v55 = vpop.permute.xlu2 %1349 }
 0x289   : > { %2039 = vst.msk [vmem:[%s2609_s19 + $0x78] sm:$0xff] %vm1227_vm4, %v1350_v55 }
 0x298   : > { %v1420_v5 = vpop.permute.xlu0 %1419 }
 0x299   : > { %v1423_v21 = vsel %vm1227_vm4, %v1420_v5, %v1422_v53 }
 0x29a   : > { %v1491_v13 = vpop.permute.xlu1 %1490  ;;  %v1426_v0 = vadd.f32 %v1423_v21, %v1380_v39 }
 0x2a0   : > { %v1493_v19 = vpop.permute.xlu0 %1492 }
 0x2a1   : > { %v1494_v22 = vsel %vm1227_vm4, %v1491_v13, %v1493_v19  ;;  %v1498_v23 = vadd.f32 %v1493_v19, %v1457_v60 }
 0x2a2   : > { %v1497_v34 = vadd.f32 %v1494_v22, %v1444_v3  ;;  %v1348_v15 = vpop.permute.xlu1 %1347 }
 0x2a3   : > { %v1502_v25 = vrot.slane %v1498_v23, 7  ;;  %v1354_v26 = vsel %vm1227_vm4, %v1348_v15, %v1350_v55 }
 0x2a4   : > { %v1501_v30 = vrot.slane %v1497_v34, 7  ;;  %2038 = vst [vmem:[%s2609_s19 + $0x70] sm:$0xff] %v1354_v26 }
 0x2a5   : > { %v1506_v11 = vsel %vm1166_vm2, %v1427_v24, %v1502_v25 }
 0x2a6   : > { %v1505_v37 = vsel %vm1166_vm2, %v1426_v0, %v1501_v30  ;;  %v1509_v4 = vrot.slane %v1506_v11, 6 }
 0x2a8   : > { %v1346_v35 = vpop.permute.xlu0 %1345  ;;  %v1511_v14 = vsel %vm1510_vm6, %v1505_v37, %v1509_v4 }
 0x2a9   : > { %v1353_v36 = vsel %vm1227_vm4, %v2745_v45, %v1346_v35  ;;  %2037 = vst.msk [vmem:[%s2609_s19 + $0x68] sm:$0xff] %vm1227_vm4, %v1346_v35 }
 0x2aa   : > { %2036 = vst [vmem:[%s2609_s19 + $0x60] sm:$0xff] %v1353_v36 }
 0x2ab   : > { %1515 = vst.msk [vmem:[%s284_s25] sm:$0xf] %vm1514_vm8, %v1511_v14 }
 0x2ac   : > { %2320 = shalt.err (!%p2317_p8)
}
 0x2ad   : > { %2146 = dma.vmem_to_hbm [thread:$0]  (%p2443_p5), %s1539_s12, 64, %s1541_s13, %s1522_s14  }
 0x2ae PF: > { %p2163_p9 = scmp.ge.s32.totalorder %s2363_s24, 2  ;;  %s1560_s19 = sand.u32 1, %s2351_s21  }
 0x2af   : > { %s1561_s26 = scalar_lea.sflag [#allocation4], %s1560_s19 }
 0x2b0   : > { %p2156_p10 = pnand %p2163_p9, %p2447_p6 }
 0x2b2   : > { %p2157_p11 = pneg %p2156_p10 }
 0x2b4   : > { %2346 = dma.done.wait (%p2157_p11), %s1561_s26, 64  }
 0x2b5   : > { %2348 = vsyncadd (%p2157_p11), %s1561_s26, 4294967232  ;;  %p19_p12 = scmp.ge.s32.totalorder %s2430_s27, 4   ;;  %s2821_s21 = smov %s2355_s22 }
 0x2b6   : > { %s2822_s22 = smov %s2359_s23  ;;  %s2823_s23 = smov %s2441_s30 }
 0x2b7   : > { %s2824_s24 = smov %s2430_s27  ;;  %21 = sbr.rel (!%p19_p12) target bundleno = 5 (0x5), region = 97 }
 0x2bc   :  { %1567 = vsyncpa [#allocation3], 1 }
 0x2bd   :  { %1569 = vsyncpa [#allocation3 + $0x1], 1 }
 0x2be   :  { %1570 = vsyncpa [#allocation6], 1 }
 0x2bf   :  { %1571 = vsyncpa [#allocation4], 1 }
 0x2c0   :  { %1573 = vsyncpa [#allocation4 + $0x1], 1 }

// kernel: _lambda_.8
= control target key start
LH: loop header
LB: loop body
LE: loop exit
PB: predicated region body
PF: predicated region fallthrough
CT: control target
= control target key end

     0   :  { %12 = vsyncpa [#allocation3], 0  ;;  %s1959_s21 = smov 0   ;;  %s2157_s0 = inlined_call_operand.vmem [shape: f32[2,15,240], index: 0, kind: input, shape index: {}]   ;;  %s2158_s1 = inlined_call_operand.vmem [shape: f32[1,240], index: 1, kind: input, shape index: {}]   ;;  %s2159_s2 = inlined_call_operand.vmem [shape: f32[1,240], index: 2, kind: input, shape index: {}]   ;;  %s2160_s3 = inlined_call_operand.hbm [shape: bf16[240,744], index: 3, kind: input, shape index: {}]   ;;  %s2161_s4 = inlined_call_operand.vmem [shape: f32[1,248], index: 4, kind: input, shape index: {}]   ;;  %s2162_s5 = inlined_call_operand.vmem [shape: f32[2,2,16,248], index: 5, kind: output, shape index: {0}]   ;;  %s2163_s6 = inlined_call_operand.vmem [shape: f32[2,2,248], index: 6, kind: output, shape index: {1}]  }
   0x1 LB: > { %s202_s24 = sshll.u32 %s2160_s3, 4  ;;  %s1968_s25 = sadd.s32 4294967295, %s1916_s21   ;;  %s1916_s21 = sphi %s1959_s21, %s18_s21   ;;  %s203_s24 = int_to_ptr.hbm [resolvable:$true] %s202_s24 }
   0x2   : > { %p1376_p0 = scmp.ge.s32.totalorder %s1916_s21, 1  ;;  %p185_p1 = scmp.lt.s32.totalorder %s1916_s21, 3 }
   0x3   : > { %p1860_p2 = scmp.eq.s32.totalorder %s1968_s25, 0  ;;  %s1918_s26 = smov [#allocation2]  }
   0x4   : > { %p186_p3 = pnand %p1376_p0, %p185_p1  ;;  %s204_s27 = sshll.u32 %s1918_s26, 4  ;;  %s205_s27 = int_to_ptr.vmem [resolvable:$true] %s204_s27 }
   0x5   : > { %s1919_s28 = smov 384   ;;  %s1920_s29 = smov 24  }
   0x6   : > { %p1856_p4 = pneg %p186_p3  ;;  %231 = sbr.rel (%p186_p3) target bundleno = 397 (0x18d), region = 40 }
   0x8   : > { %p1857_p5 = pnand %p1860_p2, %p1856_p4 }
   0xa   : > { %1859 = dma.hbm_to_vmem [thread:$0]  (!%p1857_p5), %s203_s24, 11520, %s205_s27, [#allocation3], %s1919_s28, %s1919_s28, %s1920_s29  }
   0xb   : > { %1911 = dma.done.wait (%p1860_p2), [#allocation3], 11520  }
   0xc   : > { %1913 = vsyncadd (%p1860_p2), [#allocation3], 4294955776  ;;  %p267_p6 = scmp.lt.s32.totalorder %s1968_s25, 1  ;;  %v1725_v0 = vld [vmem:[#allocation2 + $0x2a0] sm:$0xf]  ;;  %vm853_vm0 = vcmask 916480  }
   0xd   : > { %v1849_v1 = vld [vmem:[#allocation2 + $0x2b4] sm:$0xf0]  ;;  %v1804_v2 = vld [vmem:[#allocation2 + $0x154] sm:$0xf]  ;;  %v1559_v4 = vld [vmem:[#allocation2 + $0x168] sm:$0xf0] }
   0xe   : > { %v1726_v3 = vor.u32 %v1849_v1, %v1725_v0  ;;  %v1846_v5 = vld [vmem:[#allocation2 + $0x2a4] sm:$0xf]  ;;  %v1727_v6 = vld [vmem:[#allocation2 + $0x2b8] sm:$0xf0]  ;;  %v1562_v7 = vor.u32 %v1804_v2, %v1559_v4  ;;  %v1557_v9 = vld [vmem:[#allocation2 + $0x150] sm:$0xf] }
   0xf   : > { %v1730_v8 = vor.u32 %v1846_v5, %v1727_v6  ;;  %v1807_v10 = vld [vmem:[#allocation2 + $0x164] sm:$0xf0]  ;;  %v1701_v11 = vld [vmem:[#allocation2 + $0x270] sm:$0xf]  ;;  %v1798_v14 = vld [vmem:[#allocation2 + $0x124] sm:$0xf] }
  0x10   : > { %872 = vmatpush.bf16.msra.mxu1 %v1726_v3  ;;  %v1558_v12 = vor.u32 %v1807_v10, %v1557_v9  ;;  %v1843_v13 = vld [vmem:[#allocation2 + $0x284] sm:$0xf0]  ;;  %v1535_v15 = vld [vmem:[#allocation2 + $0x138] sm:$0xf0]  ;;  %885 = vmatpush.bf16.msra.mxu2 %v1562_v7  ;;  %v1840_v18 = vld [vmem:[#allocation2 + $0x274] sm:$0xf] }
  0x11   : > { %900 = vmatpush.bf16.msra.mxu3 %v1730_v8  ;;  %v1702_v16 = vor.u32 %v1843_v13, %v1701_v11  ;;  %v1538_v17 = vor.u32 %v1798_v14, %v1535_v15  ;;  %v1703_v19 = vld [vmem:[#allocation2 + $0x288] sm:$0xf0]  ;;  %v1533_v20 = vld [vmem:[#allocation2 + $0x120] sm:$0xf]  ;;  %v1801_v22 = vld [vmem:[#allocation2 + $0x134] sm:$0xf0] }
  0x12   : > { %857 = vmatpush.bf16.msra.mxu0 %v1558_v12  ;;  %v1706_v21 = vor.u32 %v1840_v18, %v1703_v19  ;;  %v1677_v23 = vld [vmem:[#allocation2 + $0x240] sm:$0xf]  ;;  %v1837_v24 = vld [vmem:[#allocation2 + $0x254] sm:$0xf0]  ;;  %v1534_v25 = vor.u32 %v1801_v22, %v1533_v20  ;;  %v1792_v26 = vld [vmem:[#allocation2 + $0xf4] sm:$0xf] }
  0x13   : > { %v1511_v27 = vld [vmem:[#allocation2 + $0x108] sm:$0xf0]  ;;  %v1834_v28 = vld [vmem:[#allocation2 + $0x244] sm:$0xf]  ;;  %v1678_v29 = vor.u32 %v1837_v24, %v1677_v23  ;;  %v1679_v30 = vld [vmem:[#allocation2 + $0x258] sm:$0xf0] }
  0x14   : > { %873 = vmatpush.bf16.msra.mxu1 %v1702_v16  ;;  %v1509_v31 = vld [vmem:[#allocation2 + $0xf0] sm:$0xf]  ;;  %v1795_v32 = vld [vmem:[#allocation2 + $0x104] sm:$0xf0]  ;;  %886 = vmatpush.bf16.msra.mxu2 %v1538_v17  ;;  %v1514_v33 = vor.u32 %v1792_v26, %v1511_v27  ;;  %v1682_v34 = vor.u32 %v1834_v28, %v1679_v30  ;;  %v1786_v37 = vld [vmem:[#allocation2 + $0xc4] sm:$0xf] }
  0x15   : > { %901 = vmatpush.bf16.msra.mxu3 %v1706_v21  ;;  %v1653_v35 = vld [vmem:[#allocation2 + $0x210] sm:$0xf]  ;;  %v1831_v36 = vld [vmem:[#allocation2 + $0x224] sm:$0xf0]  ;;  %v1510_v38 = vor.u32 %v1795_v32, %v1509_v31  ;;  %v1487_v39 = vld [vmem:[#allocation2 + $0xd8] sm:$0xf0] }
  0x16   : > { %858 = vmatpush.bf16.msra.mxu0 %v1534_v25  ;;  %v1828_v40 = vld [vmem:[#allocation2 + $0x214] sm:$0xf]  ;;  %v1655_v41 = vld [vmem:[#allocation2 + $0x228] sm:$0xf0]  ;;  %v1485_v42 = vld [vmem:[#allocation2 + $0xc0] sm:$0xf]  ;;  %v1654_v44 = vor.u32 %v1831_v36, %v1653_v35  ;;  %v1490_v45 = vor.u32 %v1786_v37, %v1487_v39 }
  0x17   : > { %v1789_v43 = vld [vmem:[#allocation2 + $0xd4] sm:$0xf0]  ;;  %s2165_s25 = smov (!%p267_p6, %s1968_s25), 1  ;;  %v1658_v46 = vor.u32 %v1828_v40, %v1655_v41  ;;  %v1629_v47 = vld [vmem:[#allocation2 + $0x1e0] sm:$0xf]  ;;  %s1921_s16 = smov 120  }
  0x18   : > { %874 = vmatpush.bf16.msra.mxu1 %v1678_v29  ;;  %887 = vmatpush.bf16.msra.mxu2 %v1514_v33  ;;  %v1825_v48 = vld [vmem:[#allocation2 + $0x1f4] sm:$0xf0]  ;;  %v1780_v49 = vld [vmem:[#allocation2 + $0x94] sm:$0xf]  ;;  %v1486_v50 = vor.u32 %v1789_v43, %v1485_v42  ;;  %v1463_v51 = vld [vmem:[#allocation2 + $0xa8] sm:$0xf0] }
  0x19   : > { %902 = vmatpush.bf16.msra.mxu3 %v1682_v34  ;;  %v1822_v52 = vld [vmem:[#allocation2 + $0x1e4] sm:$0xf]  ;;  %v1631_v53 = vld [vmem:[#allocation2 + $0x1f8] sm:$0xf0]  ;;  %v1461_v54 = vld [vmem:[#allocation2 + $0x90] sm:$0xf]  ;;  %v1630_v56 = vor.u32 %v1825_v48, %v1629_v47  ;;  %v1466_v57 = vor.u32 %v1780_v49, %v1463_v51 }
  0x1a   : > { %859 = vmatpush.bf16.msra.mxu0 %v1510_v38  ;;  %v1783_v55 = vld [vmem:[#allocation2 + $0xa4] sm:$0xf0]  ;;  %s1759_s30 = sshll.u32 %s2165_s25, 5  ;;  %v1634_v58 = vor.u32 %v1822_v52, %v1631_v53  ;;  %v1605_v59 = vld [vmem:[#allocation2 + $0x1b0] sm:$0xf]  ;;  %vm1025_vm1 = vcmask 1046528  }
  0x1b   : > { %v1819_v60 = vld [vmem:[#allocation2 + $0x1c4] sm:$0xf0]  ;;  %v1774_v61 = vld [vmem:[#allocation2 + $0x64] sm:$0xf]  ;;  %v1462_v62 = vor.u32 %v1783_v55, %v1461_v54  ;;  %v1439_v63 = vld [vmem:[#allocation2 + $0x78] sm:$0xf0]  ;;  %s271_s9 = scalar_lea.vmem %s2157_s0, %s1759_s30 }
  0x1c   : > { %875 = vmatpush.bf16.msra.mxu1 %v1654_v44  ;;  %888 = vmatpush.bf16.msra.mxu2 %v1490_v45  ;;  %v1816_v0 = vld [vmem:[#allocation2 + $0x1b4] sm:$0xf]  ;;  %v1607_v1 = vld [vmem:[#allocation2 + $0x1c8] sm:$0xf0]  ;;  %v1437_v2 = vld [vmem:[#allocation2 + $0x60] sm:$0xf]  ;;  %v1606_v5 = vor.u32 %v1819_v60, %v1605_v59  ;;  %v1442_v9 = vor.u32 %v1774_v61, %v1439_v63 }
  0x1d   : > { %903 = vmatpush.bf16.msra.mxu3 %v1658_v46  ;;  %v1777_v3 = vld [vmem:[#allocation2 + $0x74] sm:$0xf0]  ;;  %v1581_v4 = vld [vmem:[#allocation2 + $0x180] sm:$0xf]  ;;  %v1768_v7 = vld [vmem:[#allocation2 + $0x34] sm:$0xf]  ;;  %v1610_v10 = vor.u32 %v1816_v0, %v1607_v1 }
  0x1e   : > { %860 = vmatpush.bf16.msra.mxu0 %v1486_v50  ;;  %v1813_v6 = vld [vmem:[#allocation2 + $0x194] sm:$0xf0]  ;;  %v1415_v8 = vld [vmem:[#allocation2 + $0x48] sm:$0xf0]  ;;  %v1810_v11 = vld [vmem:[#allocation2 + $0x184] sm:$0xf]  ;;  %v1438_v14 = vor.u32 %v1777_v3, %v1437_v2 }
  0x1f   : > { %v1583_v12 = vld [vmem:[#allocation2 + $0x198] sm:$0xf0]  ;;  %v1565_v13 = vld [vmem:[#allocation2 + $0x158] sm:$0xf]  ;;  %v1808_v15 = vld [vmem:[#allocation2 + $0x16c] sm:$0xf0]  ;;  %v1582_v21 = vor.u32 %v1813_v6, %v1581_v4  ;;  %v1418_v25 = vor.u32 %v1768_v7, %v1415_v8 }
  0x20   : > { %876 = vmatpush.bf16.msra.mxu1 %v1630_v56  ;;  %889 = vmatpush.bf16.msra.mxu2 %v1466_v57  ;;  %v1733_v16 = vld [vmem:[#allocation2 + $0x2a8] sm:$0xf]  ;;  %v1850_v17 = vld [vmem:[#allocation2 + $0x2bc] sm:$0xf0]  ;;  %v1413_v18 = vld [vmem:[#allocation2 + $0x30] sm:$0xf]  ;;  %v1586_v26 = vor.u32 %v1810_v11, %v1583_v12  ;;  %v1566_v32 = vor.u32 %v1808_v15, %v1565_v13 }
  0x21   : > { %904 = vmatpush.bf16.msra.mxu3 %v1634_v58  ;;  %v1771_v19 = vld [vmem:[#allocation2 + $0x44] sm:$0xf0]  ;;  %v1762_v20 = vld [vmem:[#allocation2 + $0x4] sm:$0xf]  ;;  %v1391_v22 = vld [vmem:[#allocation2 + $0x18] sm:$0xf0]  ;;  %v1734_v33 = vor.u32 %v1850_v17, %v1733_v16 }
  0x22   : > { %861 = vmatpush.bf16.msra.mxu0 %v1462_v62  ;;  %v1541_v23 = vld [vmem:[#allocation2 + $0x128] sm:$0xf]  ;;  %v1802_v24 = vld [vmem:[#allocation2 + $0x13c] sm:$0xf0]  ;;  %v1709_v27 = vld [vmem:[#allocation2 + $0x278] sm:$0xf]  ;;  %v1414_v38 = vor.u32 %v1771_v19, %v1413_v18  ;;  %v1394_v43 = vor.u32 %v1762_v20, %v1391_v22 }
  0x23   : > { %v1844_v28 = vld [vmem:[#allocation2 + $0x28c] sm:$0xf0]  ;;  %v283_v29 = vld [vmem:[%s271_s9] sm:$0xff]  ;;  %v284_v36 = vld [vmem:[%s271_s9 + $0x8] sm:$0xff]  ;;  %v1542_v49 = vor.u32 %v1802_v24, %v1541_v23  ;;  %vm1150_vm2 = vcmask 1048512   ;;  %s1922_s17 = smov 16  }
  0x24   : > { %877 = vmatpush.bf16.msra.mxu1 %v1606_v5  ;;  %890 = vmatpush.bf16.msra.mxu2 %v1442_v9  ;;  %v285_v30 = vld [vmem:[%s271_s9 + $0x10] sm:$0x7f]  ;;  %v287_v31 = vld [vmem:[%s2158_s1] sm:$0x3]  ;;  %v286_v37 = vld [vmem:[%s271_s9 + $0x18] sm:$0x7f]  ;;  %v1710_v54 = vor.u32 %v1844_v28, %v1709_v27 }
  0x25   : > { %905 = vmatpush.bf16.msra.mxu3 %v1610_v10  ;;  %v289_v34 = vperm.slane %v287_v31, 0  ;;  %v297_v35 = vld [vmem:[%s2159_s2] sm:$0x3]  ;;  %v1847_v39 = vld [vmem:[#allocation2 + $0x2ac] sm:$0xf]  ;;  %v290_v41 = vperm.slane %v287_v31, 1 }
  0x26   : > { %862 = vmatpush.bf16.msra.mxu0 %v1438_v14  ;;  %v299_v40 = vperm.slane %v297_v35, 0  ;;  %v300_v42 = vperm.slane %v297_v35, 1  ;;  %v1735_v44 = vld [vmem:[#allocation2 + $0x2c0] sm:$0xf0]  ;;  %v1389_v45 = vld [vmem:[#allocation2] sm:$0xf] }
  0x27   : > { %v1765_v46 = vld [vmem:[#allocation2 + $0x14] sm:$0xf0]  ;;  %v293_v47 = vmul.f32 %v289_v34, %v283_v29  ;;  %v295_v48 = vmul.f32 %v289_v34, %v285_v30  ;;  %v1805_v50 = vld [vmem:[#allocation2 + $0x15c] sm:$0xf]  ;;  %v1567_v51 = vld [vmem:[#allocation2 + $0x170] sm:$0xf0]  ;;  %v294_v52 = vmul.f32 %v290_v41, %v284_v36  ;;  %v296_v53 = vmul.f32 %v290_v41, %v286_v37 }
  0x28   : > { %878 = vmatpush.bf16.msra.mxu1 %v1582_v21  ;;  %891 = vmatpush.bf16.msra.mxu2 %v1418_v25  ;;  %v1517_v57 = vld [vmem:[#allocation2 + $0xf8] sm:$0xf]  ;;  %v1738_v58 = vor.u32 %v1847_v39, %v1735_v44  ;;  %v1390_v59 = vor.u32 %v1765_v46, %v1389_v45  ;;  %v1796_v62 = vld [vmem:[#allocation2 + $0x10c] sm:$0xf0]  ;;  %v1685_v63 = vld [vmem:[#allocation2 + $0x248] sm:$0xf]  ;;  %v1570_v1 = vor.u32 %v1805_v50, %v1567_v51 }
  0x29   : > { %906 = vmatpush.bf16.msra.mxu3 %v1586_v26  ;;  %v303_v55 = vadd.f32 %v299_v40, %v293_v47  ;;  %v305_v56 = vadd.f32 %v299_v40, %v295_v48  ;;  %v304_v60 = vadd.f32 %v300_v42, %v294_v52  ;;  %v306_v61 = vadd.f32 %v300_v42, %v296_v53  ;;  %v1838_v0 = vld [vmem:[#allocation2 + $0x25c] sm:$0xf0]  ;;  %v1841_v4 = vld [vmem:[#allocation2 + $0x27c] sm:$0xf]  ;;  %v1711_v5 = vld [vmem:[#allocation2 + $0x290] sm:$0xf0] }
  0x2a   : > { %863 = vmatpush.bf16.msra.mxu0 %v1414_v38  ;;  %v1799_v8 = vld [vmem:[#allocation2 + $0x12c] sm:$0xf]  ;;  %v1543_v9 = vld [vmem:[#allocation2 + $0x140] sm:$0xf0]  ;;  %v1518_v11 = vor.u32 %v1796_v62, %v1517_v57  ;;  %v1686_v12 = vor.u32 %v1838_v0, %v1685_v63  ;;  %v1493_v13 = vld [vmem:[#allocation2 + $0xc8] sm:$0xf]  ;;  %v1714_v15 = vor.u32 %v1841_v4, %v1711_v5 }
  0x2b   : > { %v307_v2 = vmax.f32 %v303_v55, 0.0  ;;  %v309_v3 = vmax.f32 %v305_v56, 0.0  ;;  %v308_v6 = vmax.f32 %v304_v60, 0.0  ;;  %v310_v7 = vmax.f32 %v306_v61, 0.0  ;;  %v1790_v16 = vld [vmem:[#allocation2 + $0xdc] sm:$0xf0] }
  0x2c   : > { %913 = vmatpush.bf16.msrb.mxu1 %v1566_v32  ;;  %892 = vmatpush.bf16.msra.mxu2 %v1394_v43  ;;  %v1661_v17 = vld [vmem:[#allocation2 + $0x218] sm:$0xf]  ;;  %v1832_v18 = vld [vmem:[#allocation2 + $0x22c] sm:$0xf0]  ;;  %v1546_v19 = vor.u32 %v1799_v8, %v1543_v9  ;;  %v1835_v20 = vld [vmem:[#allocation2 + $0x24c] sm:$0xf]  ;;  %v1494_v24 = vor.u32 %v1790_v16, %v1493_v13 }
  0x2d   : > { %928 = vmatpush.bf16.msrb.mxu3 %v1734_v33  ;;  %v1991_v10 = vpack.c.bf16 %v309_v3, %v307_v2  ;;  %v1993_v14 = vpack.c.bf16 %v310_v7, %v308_v6  ;;  %v1687_v21 = vld [vmem:[#allocation2 + $0x260] sm:$0xf0]  ;;  %v1793_v22 = vld [vmem:[#allocation2 + $0xfc] sm:$0xf]  ;;  %v1519_v23 = vld [vmem:[#allocation2 + $0x110] sm:$0xf0]  ;;  %v1662_v25 = vor.u32 %v1832_v18, %v1661_v17 }
  0x2e   : > { %864 = vmatpush.bf16.msra.mxu0 %v1390_v59  ;;  %v1469_v26 = vld [vmem:[#allocation2 + $0x98] sm:$0xf]  ;;  %v1690_v27 = vor.u32 %v1835_v20, %v1687_v21  ;;  %v1784_v28 = vld [vmem:[#allocation2 + $0xac] sm:$0xf0]  ;;  %v1637_v29 = vld [vmem:[#allocation2 + $0x1e8] sm:$0xf]  ;;  %v1522_v31 = vor.u32 %v1793_v22, %v1519_v23 }
  0x2f   : > { %893 = vmatmul.bf16.vlgmr.msra.gmra.mxu2 %v1991_v10  ;;  %1748 = vmatmul.msk.bf16.vlgmr.msra.gmra.mxu3 %vm853_vm0, %v1993_v14  ;;  %v1826_v30 = vld [vmem:[#allocation2 + $0x1fc] sm:$0xf0]  ;;  %v1829_v32 = vld [vmem:[#allocation2 + $0x21c] sm:$0xf]  ;;  %v1663_v33 = vld [vmem:[#allocation2 + $0x230] sm:$0xf0]  ;;  %v1470_v36 = vor.u32 %v1784_v28, %v1469_v26 }
  0x30   : > { %914 = vmatpush.bf16.msrb.mxu1 %v1542_v49  ;;  %956 = vmatpush.bf16.msrb.mxu2 %v1738_v58  ;;  %v1787_v34 = vld [vmem:[#allocation2 + $0xcc] sm:$0xf]  ;;  %v1495_v35 = vld [vmem:[#allocation2 + $0xe0] sm:$0xf0]  ;;  %v1638_v37 = vor.u32 %v1826_v30, %v1637_v29  ;;  %v1445_v38 = vld [vmem:[#allocation2 + $0x68] sm:$0xf]  ;;  %v1666_v39 = vor.u32 %v1829_v32, %v1663_v33 }
  0x31   : > { %929 = vmatpush.bf16.msrb.mxu3 %v1710_v54  ;;  %1747 = vmatmul.msk.bf16.vlgmr.msra.gmra.mxu1 %vm853_vm0, %v1993_v14  ;;  %v1778_v40 = vld [vmem:[#allocation2 + $0x7c] sm:$0xf0]  ;;  %v1613_v41 = vld [vmem:[#allocation2 + $0x1b8] sm:$0xf]  ;;  %v1820_v42 = vld [vmem:[#allocation2 + $0x1cc] sm:$0xf0]  ;;  %v1498_v43 = vor.u32 %v1787_v34, %v1495_v35 }
  0x32   : > { %941 = vmatpush.bf16.msrb.mxu0 %v1570_v1  ;;  %v1823_v44 = vld [vmem:[#allocation2 + $0x1ec] sm:$0xf]  ;;  %v1639_v45 = vld [vmem:[#allocation2 + $0x200] sm:$0xf0]  ;;  %v1781_v46 = vld [vmem:[#allocation2 + $0x9c] sm:$0xf]  ;;  %v1446_v48 = vor.u32 %v1778_v40, %v1445_v38  ;;  %v1614_v49 = vor.u32 %v1820_v42, %v1613_v41 }
  0x33   : > { %865 = vmatmul.bf16.vlgmr.msra.gmra.mxu0 %v1991_v10  ;;  %v1471_v47 = vld [vmem:[#allocation2 + $0xb0] sm:$0xf0]  ;;  %v1421_v50 = vld [vmem:[#allocation2 + $0x38] sm:$0xf]  ;;  %v1772_v51 = vld [vmem:[#allocation2 + $0x4c] sm:$0xf0]  ;;  %v1642_v52 = vor.u32 %v1823_v44, %v1639_v45 }
  0x34   : > { %915 = vmatpush.bf16.msrb.mxu1 %v1518_v11  ;;  %957 = vmatpush.bf16.msrb.mxu2 %v1714_v15  ;;  %v1589_v53 = vld [vmem:[#allocation2 + $0x188] sm:$0xf]  ;;  %v1814_v54 = vld [vmem:[#allocation2 + $0x19c] sm:$0xf0]  ;;  %v1817_v55 = vld [vmem:[#allocation2 + $0x1bc] sm:$0xf]  ;;  %v1474_v56 = vor.u32 %v1781_v46, %v1471_v47  ;;  %v1422_v63 = vor.u32 %v1772_v51, %v1421_v50 }
  0x35   : > { %930 = vmatpush.bf16.msrb.mxu3 %v1686_v12  ;;  %v1615_v57 = vld [vmem:[#allocation2 + $0x1d0] sm:$0xf0]  ;;  %v1573_v58 = vld [vmem:[#allocation2 + $0x160] sm:$0xf]  ;;  %v1809_v59 = vld [vmem:[#allocation2 + $0x174] sm:$0xf0]  ;;  %v1590_v0 = vor.u32 %v1814_v54, %v1589_v53 }
  0x36   : > { %942 = vmatpush.bf16.msrb.mxu0 %v1546_v19  ;;  %v1775_v60 = vld [vmem:[#allocation2 + $0x6c] sm:$0xf]  ;;  %v1447_v61 = vld [vmem:[#allocation2 + $0x80] sm:$0xf0]  ;;  %v2004_v62 = vld [vmem:[%s2161_s4] sm:$0x3]  ;;  %v1618_v3 = vor.u32 %v1817_v55, %v1615_v57  ;;  %v1574_v4 = vor.u32 %v1809_v59, %v1573_v58 }
  0x37   : > { %v1397_v1 = vld [vmem:[#allocation2 + $0x8] sm:$0xf]  ;;  %v2007_v2 = vperm.slane %v2004_v62, 0  ;;  %v1766_v5 = vld [vmem:[#allocation2 + $0x1c] sm:$0xf0]  ;;  %v1450_v8 = vor.u32 %v1775_v60, %v1447_v61  ;;  %vm1087_vm3 = vcmask 982016  }
  0x38   : > { %916 = vmatpush.bf16.msrb.mxu1 %v1494_v24  ;;  %958 = vmatpush.bf16.msrb.mxu2 %v1690_v27  ;;  %v1811_v6 = vld [vmem:[#allocation2 + $0x18c] sm:$0xf]  ;;  %v1591_v7 = vld [vmem:[#allocation2 + $0x1a0] sm:$0xf0]  ;;  %v1549_v9 = vld [vmem:[#allocation2 + $0x130] sm:$0xf]  ;;  %v1398_v17 = vor.u32 %v1766_v5, %v1397_v1 }
  0x39   : > { %931 = vmatpush.bf16.msrb.mxu3 %v1662_v25  ;;  %v1803_v11 = vld [vmem:[#allocation2 + $0x144] sm:$0xf0]  ;;  %v1741_v12 = vld [vmem:[#allocation2 + $0x2b0] sm:$0xf]  ;;  %1083 = vrot.lane.b32.xlu0 %v2007_v2, %s1921_s16  ;;  %v1806_v15 = vld [vmem:[#allocation2 + $0x164] sm:$0xf]  ;;  %v1594_v20 = vor.u32 %v1811_v6, %v1591_v7 }
  0x3a   : > { %943 = vmatpush.bf16.msrb.mxu0 %v1522_v31  ;;  %v1851_v13 = vld [vmem:[#allocation2 + $0x2c4] sm:$0xf0]  ;;  %v1575_v16 = vld [vmem:[#allocation2 + $0x178] sm:$0xf0]  ;;  %v1423_v19 = vld [vmem:[#allocation2 + $0x50] sm:$0xf0]  ;;  %v1550_v21 = vor.u32 %v1803_v11, %v1549_v9 }
  0x3b   : > { %v1769_v18 = vld [vmem:[#allocation2 + $0x3c] sm:$0xf]  ;;  %v1742_v22 = vor.u32 %v1851_v13, %v1741_v12  ;;  %v1578_v23 = vor.u32 %v1806_v15, %v1575_v16  ;;  %v1525_v24 = vld [vmem:[#allocation2 + $0x100] sm:$0xf]  ;;  %v1797_v25 = vld [vmem:[#allocation2 + $0x114] sm:$0xf0] }
  0x3c   : > { %917 = vmatpush.bf16.msrb.mxu1 %v1470_v36  ;;  %959 = vmatpush.bf16.msrb.mxu2 %v1666_v39  ;;  %v1717_v26 = vld [vmem:[#allocation2 + $0x280] sm:$0xf]  ;;  %v1426_v27 = vor.u32 %v1769_v18, %v1423_v19  ;;  %v1845_v28 = vld [vmem:[#allocation2 + $0x294] sm:$0xf0]  ;;  %v1800_v29 = vld [vmem:[#allocation2 + $0x134] sm:$0xf]  ;;  %v1526_v33 = vor.u32 %v1797_v25, %v1525_v24 }
  0x3d   : > { %932 = vmatpush.bf16.msrb.mxu3 %v1638_v37  ;;  %v1551_v30 = vld [vmem:[#allocation2 + $0x148] sm:$0xf0]  ;;  %v1399_v32 = vld [vmem:[#allocation2 + $0x20] sm:$0xf0]  ;;  %v1848_v34 = vld [vmem:[#allocation2 + $0x2b4] sm:$0xf]  ;;  %v1718_v36 = vor.u32 %v1845_v28, %v1717_v26 }
  0x3e   : > { %944 = vmatpush.bf16.msrb.mxu0 %v1498_v43  ;;  %v1763_v31 = vld [vmem:[#allocation2 + $0xc] sm:$0xf]  ;;  %v1554_v37 = vor.u32 %v1800_v29, %v1551_v30  ;;  %v1501_v38 = vld [vmem:[#allocation2 + $0xd0] sm:$0xf]  ;;  %v1791_v39 = vld [vmem:[#allocation2 + $0xe4] sm:$0xf0] }
  0x3f   : > { %v1743_v35 = vld [vmem:[#allocation2 + $0x2c8] sm:$0xf0]  ;;  %v1402_v40 = vor.u32 %v1763_v31, %v1399_v32  ;;  %v1693_v41 = vld [vmem:[#allocation2 + $0x250] sm:$0xf]  ;;  %v1839_v42 = vld [vmem:[#allocation2 + $0x264] sm:$0xf0]  ;;  %v1502_v46 = vor.u32 %v1791_v39, %v1501_v38 }
  0x40   : > { %918 = vmatpush.bf16.msrb.mxu1 %v1446_v48  ;;  %960 = vmatpush.bf16.msrb.mxu2 %v1642_v52  ;;  %v1746_v43 = vor.u32 %v1848_v34, %v1743_v35  ;;  %v1794_v44 = vld [vmem:[#allocation2 + $0x104] sm:$0xf]  ;;  %v1527_v45 = vld [vmem:[#allocation2 + $0x118] sm:$0xf0]  ;;  %v1694_v50 = vor.u32 %v1839_v42, %v1693_v41  ;;  %v1477_v51 = vld [vmem:[#allocation2 + $0xa0] sm:$0xf] }
  0x41   : > { %933 = vmatpush.bf16.msrb.mxu3 %v1614_v49  ;;  %v1842_v47 = vld [vmem:[#allocation2 + $0x284] sm:$0xf]  ;;  %v1719_v48 = vld [vmem:[#allocation2 + $0x298] sm:$0xf0]  ;;  %v2017_v49 = vperm.slane %v2004_v62, 1  ;;  %v1530_v53 = vor.u32 %v1794_v44, %v1527_v45  ;;  %vm1034_vm4 = vcmask 1040384  }
  0x42   : > { %945 = vmatpush.bf16.msrb.mxu0 %v1474_v56  ;;  %v1785_v52 = vld [vmem:[#allocation2 + $0xb4] sm:$0xf0]  ;;  %v1669_v54 = vld [vmem:[#allocation2 + $0x220] sm:$0xf]  ;;  %v1722_v56 = vor.u32 %v1842_v47, %v1719_v48  ;;  %v1788_v57 = vld [vmem:[#allocation2 + $0xd4] sm:$0xf] }
  0x43   : > { %v1833_v55 = vld [vmem:[#allocation2 + $0x234] sm:$0xf0]  ;;  %1085 = vrot.lane.b32.xlu0 %v2017_v49, %s1921_s16  ;;  %v1503_v58 = vld [vmem:[#allocation2 + $0xe8] sm:$0xf0]  ;;  %v1478_v59 = vor.u32 %v1785_v52, %v1477_v51  ;;  %v1836_v60 = vld [vmem:[#allocation2 + $0x254] sm:$0xf] }
  0x44   : > { %919 = vmatpush.bf16.msrb.mxu1 %v1422_v63  ;;  %961 = vmatpush.bf16.msrb.mxu2 %v1618_v3  ;;  %v1695_v61 = vld [vmem:[#allocation2 + $0x268] sm:$0xf0]  ;;  %v1670_v62 = vor.u32 %v1833_v55, %v1669_v54  ;;  %v1453_v63 = vld [vmem:[#allocation2 + $0x70] sm:$0xf]  ;;  %v1506_v1 = vor.u32 %v1788_v57, %v1503_v58  ;;  %v1782_v6 = vld [vmem:[#allocation2 + $0xa4] sm:$0xf] }
  0x45   : > { %934 = vmatpush.bf16.msrb.mxu3 %v1590_v0  ;;  %v1779_v0 = vld [vmem:[#allocation2 + $0x84] sm:$0xf0]  ;;  %v1645_v3 = vld [vmem:[#allocation2 + $0x1f0] sm:$0xf]  ;;  %v1698_v5 = vor.u32 %v1836_v60, %v1695_v61  ;;  %v1479_v7 = vld [vmem:[#allocation2 + $0xb8] sm:$0xf0] }
  0x46   : > { %946 = vmatpush.bf16.msrb.mxu0 %v1450_v8  ;;  %v1454_v8 = vor.u32 %v1779_v0, %v1453_v63  ;;  %v1830_v9 = vld [vmem:[#allocation2 + $0x224] sm:$0xf]  ;;  %v1671_v11 = vld [vmem:[#allocation2 + $0x238] sm:$0xf0]  ;;  %v1429_v13 = vld [vmem:[#allocation2 + $0x40] sm:$0xf]  ;;  %v1482_v16 = vor.u32 %v1782_v6, %v1479_v7 }
  0x47   : > { %v1773_v15 = vld [vmem:[#allocation2 + $0x54] sm:$0xf0]  ;;  %v1674_v19 = vor.u32 %v1830_v9, %v1671_v11  ;;  %v1647_v24 = vld [vmem:[#allocation2 + $0x208] sm:$0xf0]  ;;  %v1405_v26 = vld [vmem:[#allocation2 + $0x10] sm:$0xf] }
  0x48   : > { %1749 = vmatmul.msk.bf16.vlgmr.msrb.gmra.mxu3 %vm853_vm0, %v1993_v14  ;;  %920 = vmatpush.bf16.msrb.mxu1 %v1398_v17  ;;  %v1621_v17 = vld [vmem:[#allocation2 + $0x1c0] sm:$0xf]  ;;  %v1821_v18 = vld [vmem:[#allocation2 + $0x1d4] sm:$0xf0]  ;;  %v1597_v29 = vld [vmem:[#allocation2 + $0x190] sm:$0xf] }
  0x49   : > { %969 = vmatpush.bf16.msra.mxu3 %v1574_v4  ;;  %962 = vmatpush.bf16.msrb.mxu2 %v1594_v20  ;;  %v1827_v4 = vld [vmem:[#allocation2 + $0x204] sm:$0xf0]  ;;  %v1776_v20 = vld [vmem:[#allocation2 + $0x74] sm:$0xf]  ;;  %v1622_v25 = vor.u32 %v1821_v18, %v1621_v17  ;;  %v1770_v32 = vld [vmem:[#allocation2 + $0x44] sm:$0xf] }
  0x4a   : > { %947 = vmatpush.bf16.msrb.mxu0 %v1426_v27  ;;  %v1646_v12 = vor.u32 %v1827_v4, %v1645_v3  ;;  %v1767_v27 = vld [vmem:[#allocation2 + $0x24] sm:$0xf0]  ;;  %v1818_v35 = vld [vmem:[#allocation2 + $0x1c4] sm:$0xf]  ;;  %v1407_v41 = vld [vmem:[#allocation2 + $0x28] sm:$0xf0] }
  0x4b   : > { %921 = vmatmul.bf16.vlgmr.msrb.gmra.mxu1 %v1991_v10  ;;  %v1815_v30 = vld [vmem:[#allocation2 + $0x1a4] sm:$0xf0]  ;;  %v1406_v34 = vor.u32 %v1767_v27, %v1405_v26  ;;  %v1812_v42 = vld [vmem:[#allocation2 + $0x194] sm:$0xf]  ;;  %s1923_s18 = smov 8   ;;  %vm1056_vm5 = vcmask 130048  }
  0x4c   : > { %984 = vmatpush.bf16.msra.mxu1 %v1742_v22  ;;  %1750 = vmatmul.msk.bf16.vlgmr.msrb.gmra.mxu2 %vm853_vm0, %v1993_v14  ;;  %v1430_v22 = vor.u32 %v1773_v15, %v1429_v13  ;;  %s1760_s19 = sshll.u32 %s2165_s25, 6  ;;  %vm1120_vm6 = vcmask 64512   ;;  %s1761_s24 = sshll.u32 %s2165_s25, 2  ;;  %vm1268_vm7 = vcmask 1041408   ;;  %vm1271_vm8 = vcmask 977922  }
  0x4d   : > { %970 = vmatpush.bf16.msra.mxu3 %v1550_v21  ;;  %997 = vmatpush.bf16.msra.mxu2 %v1578_v23  ;;  %v1455_v21 = vld [vmem:[#allocation2 + $0x88] sm:$0xf0]  ;;  %v1824_v23 = vld [vmem:[#allocation2 + $0x1f4] sm:$0xf]  ;;  %s2102_s23 = scalar_lea.vmem %s2162_s5, %s1760_s19  ;;  %s281_s28 = scalar_lea.vmem %s2163_s6, %s1761_s24  ;;  %vm1272_vm9 = vmor %vm1271_vm8, %vm1268_vm7 }
  0x4e   : > { %948 = vmatpush.bf16.msrb.mxu0 %v1402_v40  ;;  %v1458_v28 = vor.u32 %v1776_v20, %v1455_v21  ;;  %v1650_v31 = vor.u32 %v1824_v23, %v1647_v24  ;;  %v1764_v40 = vld [vmem:[#allocation2 + $0x14] sm:$0xf] }
  0x4f   : > { %v1410_v44 = vor.u32 %v1764_v40, %v1407_v41 }
  0x50   : > { %985 = vmatpush.bf16.msra.mxu1 %v1718_v36  ;;  %v1623_v36 = vld [vmem:[#allocation2 + $0x1d8] sm:$0xf0] }
  0x51   : > { %971 = vmatpush.bf16.msra.mxu3 %v1526_v33  ;;  %998 = vmatpush.bf16.msra.mxu2 %v1554_v37  ;;  %v1431_v33 = vld [vmem:[#allocation2 + $0x58] sm:$0xf0]  ;;  %v1598_v37 = vor.u32 %v1815_v30, %v1597_v29  ;;  %v1626_v39 = vor.u32 %v1818_v35, %v1623_v36 }
  0x52   : > { %1012 = vmatpush.bf16.msra.mxu0 %v1746_v43  ;;  %v1434_v38 = vor.u32 %v1770_v32, %v1431_v33  ;;  %v1599_v43 = vld [vmem:[#allocation2 + $0x1a8] sm:$0xf0] }
  0x53   : > { %949 = vmatmul.bf16.vlgmr.msrb.gmra.mxu0 %v1991_v10  ;;  %v1602_v45 = vor.u32 %v1812_v42, %v1599_v43 }
  0x54   : > { %986 = vmatpush.bf16.msra.mxu1 %v1694_v50 }
  0x55   : > { %972 = vmatpush.bf16.msra.mxu3 %v1502_v46  ;;  %999 = vmatpush.bf16.msra.mxu2 %v1530_v53 }
  0x56   : > { %1013 = vmatpush.bf16.msra.mxu0 %v1722_v56 }
  0x58   : > { %987 = vmatpush.bf16.msra.mxu1 %v1670_v62 }
  0x59   : > { %973 = vmatpush.bf16.msra.mxu3 %v1478_v59  ;;  %1000 = vmatpush.bf16.msra.mxu2 %v1506_v1 }
  0x5a   : > { %1014 = vmatpush.bf16.msra.mxu0 %v1698_v5 }
  0x5c   : > { %988 = vmatpush.bf16.msra.mxu1 %v1646_v12 }
  0x5d   : > { %974 = vmatpush.bf16.msra.mxu3 %v1454_v8  ;;  %1001 = vmatpush.bf16.msra.mxu2 %v1482_v16 }
  0x5e   : > { %1015 = vmatpush.bf16.msra.mxu0 %v1674_v19 }
  0x60   : > { %989 = vmatpush.bf16.msra.mxu1 %v1622_v25 }
  0x61   : > { %975 = vmatpush.bf16.msra.mxu3 %v1430_v22  ;;  %1002 = vmatpush.bf16.msra.mxu2 %v1458_v28 }
  0x62   : > { %1016 = vmatpush.bf16.msra.mxu0 %v1650_v31 }
  0x64   : > { %990 = vmatpush.bf16.msra.mxu1 %v1598_v37 }
  0x65   : > { %976 = vmatpush.bf16.msra.mxu3 %v1406_v34  ;;  %1003 = vmatpush.bf16.msra.mxu2 %v1434_v38 }
  0x66   : > { %1017 = vmatpush.bf16.msra.mxu0 %v1626_v39 }
  0x67   : > { %1751 = vmatmul.msk.bf16.vlgmr.msra.gmra.mxu1 %vm853_vm0, %v1993_v14 }
  0x68   : > { %977 = vmatmul.bf16.vlgmr.msra.gmra.mxu3 %v1991_v10 }
  0x69   : > { %1004 = vmatpush.bf16.msra.mxu2 %v1410_v44 }
  0x6a   : > { %1018 = vmatpush.bf16.msra.mxu0 %v1602_v45 }
  0x6c   : > { %1005 = vmatmul.bf16.vlgmr.msra.gmra.mxu2 %v1991_v10 }
  0x6d   : > { %1752 = vmatmul.msk.bf16.vlgmr.msra.gmra.mxu0 %vm853_vm0, %v1993_v14 }
  0xab   : > { %v1084_v53 = vpop.permute.xlu0 %1083 }
  0xae   : > { %v880_v46 = vpop.f32.mrf.mxu1 }
  0xb0   : > { %v866_v47 = vpop.f32.mrf.mxu0 }
  0xb1   : > { %v2028_v48 = vadd.f32 %v880_v46, %v866_v47 }
  0xb2   : > { %v894_v50 = vpop.f32.mrf.mxu2  ;;  %v908_v51 = vpop.f32.mrf.mxu3 }
  0xb3   : > { %v2030_v52 = vadd.f32 %v908_v51, %v894_v50 }
  0xb5   : > { %v2033_v57 = vadd.f32 %v1084_v53, %v2030_v52  ;;  %v1086_v16 = vpop.permute.xlu0 %1085 }
  0xb6   : > { %v882_v54 = vpop.f32.mrf.mxu1  ;;  %v1088_v31 = vsel %vm1087_vm3, %v1084_v53, %v1086_v16 }
  0xb7   : > { %v1211_v60 = vmul.f32 %v2033_v57, %v2033_v57  ;;  %v1151_v46 = vsel %vm1150_vm2, %v2033_v57, 0.0 }
  0xb8   : > { %v868_v55 = vpop.f32.mrf.mxu0 }
  0xb9   : > { %v883_v56 = vadd.f32 %v882_v54, %v868_v55  ;;  %v1217_v0 = vsel %vm1150_vm2, %v1211_v60, 0.0 }
  0xba   : > { %v896_v10 = vpop.f32.mrf.mxu2  ;;  %v910_v14 = vpop.f32.mrf.mxu3 }
  0xbb   : > { %v2036_v58 = vsel %vm1025_vm1, %v883_v56, 0.0  ;;  %v911_v59 = vadd.f32 %v910_v14, %v896_v10 }
  0xbd   : > { %v2041_v61 = vsel %vm1025_vm1, %v911_v59, 0.0 }
  0xbe   : > { %v2044_v62 = vadd.f32 %v1084_v53, %v2041_v61 }
  0xc0   : > { %v1214_v63 = vmul.f32 %v2044_v62, %v2044_v62  ;;  %v1152_v47 = vsel %vm1150_vm2, %v2044_v62, 0.0 }
  0xc1   : > { %v1153_v56 = vadd.f32 %v1152_v47, %v1151_v46 }
  0xc2   : > { %v1218_v1 = vsel %vm1150_vm2, %v1214_v63, 0.0 }
  0xc3   : > { %v1219_v3 = vadd.f32 %v1218_v1, %v1217_v0 }
  0xc5   : > { %v1220_v4 = vrot.slane %v1219_v3, 4 }
  0xc7   : > { %v1221_v7 = vadd.f32 %v1220_v4, %v1219_v3 }
  0xc8   : > { %v922_v5 = vpop.f32.mrf.mxu1 }
  0xc9   : > { %v1222_v8 = vrot.slane %v1221_v7, 2 }
  0xcb   : > { %v936_v6 = vpop.f32.mrf.mxu3  ;;  %v1223_v15 = vadd.f32 %v1222_v8, %v1221_v7 }
  0xcc   : > { %v937_v26 = vadd.f32 %v936_v6, %v922_v5  ;;  %v1154_v5 = vrot.slane %v1153_v56, 4 }
  0xcd   : > { %v1224_v20 = vrot.slane %v1223_v15, 1 }
  0xce   : > { %v1093_v36 = vadd.f32 %v1088_v31, %v937_v26 }
  0xcf   : > { %v964_v11 = vpop.f32.mrf.mxu2  ;;  %v1225_v29 = vadd.f32 %v1224_v20, %v1223_v15 }
  0xd0   : > { %v950_v9 = vpop.f32.mrf.mxu0  ;;  %v924_v17 = vpop.f32.mrf.mxu1  ;;  %v1212_v50 = vmul.f32 %v1093_v36, %v1093_v36 }
  0xd1   : > { %v965_v12 = vadd.f32 %v964_v11, %v950_v9 }
  0xd3   : > { %v1035_v13 = vrot.slane %v965_v12, 7  ;;  %v938_v18 = vpop.f32.mrf.mxu3  ;;  %v2051_v19 = vadd.f32 %v1086_v16, %v965_v12 }
  0xd4   : > { %v939_v21 = vadd.f32 %v938_v18, %v924_v17  ;;  %v1155_v17 = vadd.f32 %v1154_v5, %v1153_v56 }
  0xd5   : > { %1044 = vrot.lane.b32.xlu0 %v1035_v13, %s1922_s17  ;;  %v1213_v25 = vmul.f32 %v2051_v19, %v2051_v19  ;;  %v1167_v9 = vsel %vm853_vm0, %v2051_v19, 0.0 }
  0xd6   : > { %v1071_v30 = vsel %vm1025_vm1, %v939_v21, 0.0  ;;  %v1156_v26 = vrot.slane %v1155_v17, 2 }
  0xd7   : > { %v966_v23 = vpop.f32.mrf.mxu2  ;;  %v1233_v34 = vsel %vm853_vm0, %v1213_v25, 0.0  ;;  %v1096_v37 = vadd.f32 %v1088_v31, %v1071_v30 }
  0xd8   : > { %v952_v22 = vpop.f32.mrf.mxu0  ;;  %v1157_v31 = vadd.f32 %v1156_v26, %v1155_v17 }
  0xd9   : > { %v967_v24 = vadd.f32 %v966_v23, %v952_v22  ;;  %v1160_v41 = vadd.f32 %v1096_v37, %v1093_v36  ;;  %v1215_v53 = vmul.f32 %v1096_v37, %v1096_v37 }
  0xdb   : > { %v1038_v27 = vrot.slane %v967_v24, 7  ;;  %v1072_v28 = vsel %vm1025_vm1, %v967_v24, 0.0  ;;  %v1161_v45 = vrot.slane %v1160_v41, 4  ;;  %v1226_v63 = vadd.f32 %v1215_v53, %v1212_v50 }
  0xdc   : > { %v2058_v32 = vadd.f32 %v1086_v16, %v1072_v28 }
  0xdd   : > { %1245 = vrot.lane.b32.xlu0 %v1225_v29, %s1923_s18  ;;  %v1039_v33 = vsel %vm1034_vm4, %v1035_v13, %v1038_v27  ;;  %v1162_v59 = vadd.f32 %v1161_v45, %v1160_v41  ;;  %v1227_v8 = vrot.slane %v1226_v63, 4 }
  0xde   : > { %v1216_v35 = vmul.f32 %v2058_v32, %v2058_v32  ;;  %1050 = vrot.lane.b32.xlu1 %v1039_v33, %s1922_s17  ;;  %v1168_v11 = vsel %vm853_vm0, %v2058_v32, 0.0 }
  0xdf   : > { %v1163_v4 = vrot.slane %v1162_v59, 2  ;;  %v1169_v18 = vadd.f32 %v1168_v11, %v1167_v9  ;;  %v1228_v20 = vadd.f32 %v1227_v8, %v1226_v63 }
  0xe0   : > { %v1234_v38 = vsel %vm853_vm0, %v1216_v35, 0.0 }
  0xe1   : > { %v1235_v39 = vadd.f32 %v1234_v38, %v1233_v34  ;;  %v1164_v16 = vadd.f32 %v1163_v4, %v1162_v59  ;;  %v1229_v27 = vrot.slane %v1228_v20, 2  ;;  %v1170_v28 = vrot.slane %v1169_v18, 4 }
  0xe3   : > { %v1236_v40 = vrot.slane %v1235_v39, 4  ;;  %v1165_v25 = vrot.slane %v1164_v16, 1  ;;  %v1230_v33 = vadd.f32 %v1229_v27, %v1228_v20  ;;  %v1171_v34 = vadd.f32 %v1170_v28, %v1169_v18 }
  0xe4   : > { %v992_v43 = vpop.f32.mrf.mxu1 }
  0xe5   : > { %1110 = vrot.lane.b32.xlu0 %v1093_v36, %s1923_s18  ;;  %v1237_v42 = vadd.f32 %v1236_v40, %v1235_v39  ;;  %v1166_v30 = vadd.f32 %v1165_v25, %v1164_v16  ;;  %v1158_v36 = vrot.slane %v1157_v31, 1  ;;  %v1231_v38 = vrot.slane %v1230_v33, 1 }
  0xe6   : > { %v1172_v39 = vrot.slane %v1171_v34, 2 }
  0xe7   : > { %v1238_v44 = vrot.slane %v1237_v42, 2  ;;  %v1232_v40 = vadd.f32 %v1231_v38, %v1230_v33 }
  0xe8   : > { %v1173_v41 = vadd.f32 %v1172_v39, %v1171_v34 }
  0xe9   : > { %v1239_v55 = vadd.f32 %v1238_v44, %v1237_v42 }
  0xea   : > { %v1020_v60 = vpop.f32.mrf.mxu0  ;;  %v1174_v42 = vrot.slane %v1173_v41, 1 }
  0xeb   : > { %v978_v51 = vpop.f32.mrf.mxu3  ;;  %v1240_v14 = vrot.slane %v1239_v55, 1 }
  0xec   : > { %v993_v54 = vadd.f32 %v992_v43, %v978_v51  ;;  %v994_v6 = vpop.f32.mrf.mxu1  ;;  %v1175_v43 = vadd.f32 %v1174_v42, %v1173_v41 }
  0xed   : > { %v1241_v0 = vadd.f32 %v1240_v14, %v1239_v55 }
  0xee   : > { %v1036_v10 = vrot.slane %v993_v54, 7 }
  0xef   : > { %v1006_v1 = vpop.f32.mrf.mxu2  ;;  %1249 = vrot.lane.b32.xlu0 %v1241_v0, %s1923_s18 }
  0xf0   : > { %1046 = vrot.lane.b32.xlu1 %v1036_v10, %s1922_s17  ;;  %v1021_v3 = vadd.f32 %v1020_v60, %v1006_v1 }
  0xf2   : > { %v1037_v12 = vrot.slane %v1021_v3, 7  ;;  %v1022_v22 = vpop.f32.mrf.mxu0 }
  0xf3   : > { %v980_v7 = vpop.f32.mrf.mxu3 }
  0xf4   : > { %v995_v13 = vadd.f32 %v994_v6, %v980_v7 }
  0xf6   : > { %v1040_v15 = vrot.slane %v995_v13, 7 }
  0xf7   : > { %v1008_v23 = vpop.f32.mrf.mxu2  ;;  %1116 = vrot.lane.b32.xlu0 %v1096_v37, %s1923_s18  ;;  %v1159_v37 = vadd.f32 %v1158_v36, %v1157_v31 }
  0xf8   : > { %1048 = vrot.lane.b32.xlu1 %v1037_v12, %s1922_s17  ;;  %v1041_v21 = vsel %vm1034_vm4, %v1036_v10, %v1040_v15  ;;  %v1023_v24 = vadd.f32 %v1022_v22, %v1008_v23 }
  0xf9   : > { %1052 = vrot.lane.b32.xlu2 %v1041_v21, %s1922_s17 }
  0xfa   : > { %v1042_v29 = vrot.slane %v1023_v24, 7 }
  0xfc   : > { %v1043_v35 = vsel %vm1034_vm4, %v1037_v12, %v1042_v29 }
 0x100   : > { %1181 = vrot.lane.b32.xlu1 %v1166_v30, %s1923_s18 }
 0x101   : > { %1054 = vrot.lane.b32.xlu2 %v1043_v35, %s1922_s17 }
 0x108   : > { %1179 = vrot.lane.b32.xlu1 %v1159_v37, %s1923_s18 }
 0x109   : > { %1247 = vrot.lane.b32.xlu2 %v1232_v40, %s1923_s18 }
 0x110   : > { %1112 = vrot.lane.b32.xlu1 %v2051_v19, %s1923_s18 }
 0x111   : > { %1183 = vrot.lane.b32.xlu2 %v1175_v43, %s1923_s18 }
 0x118   : > { %1118 = vrot.lane.b32.xlu1 %v2058_v32, %s1923_s18 }
 0x119   : > { %1108 = vrot.lane.b32.xlu2 %v2033_v57, %s1923_s18 }
 0x121   : > { %1114 = vrot.lane.b32.xlu2 %v2044_v62, %s1923_s18 }
 0x147   : > { %v1045_v47 = vpop.permute.xlu0 %1044 }
 0x14f   : > { %v1246_v51 = vpop.permute.xlu0 %1245 }
 0x150   : > { %v1051_v44 = vpop.permute.xlu1 %1050 }
 0x153   : > { %v1053_v45 = vpop.permute.xlu2 %1052 }
 0x154   : > { %v1059_v46 = vsel %vm1056_vm5, %v1051_v44, %v1053_v45 }
 0x155   : > { %v1069_v19 = vadd.f32 %v1059_v46, %v2036_v58 }
 0x157   : > { %v1081_v57 = vadd.f32 %v2007_v2, %v1069_v19  ;;  %v2117_v60 = vpop.permute.xlu0 %1110 }
 0x159   : > { %1100 = vst [vmem:[%s2102_s23 + $0x10] sm:$0xff] %v1081_v57  ;;  %v1193_v59 = vmul.f32 %v1081_v57, %v1081_v57 }
 0x15b   : > { %v1055_v62 = vpop.permute.xlu2 %1054 }
 0x15c   : > { %v1060_v32 = vsel %vm1056_vm5, %v1053_v45, %v1055_v62 }
 0x15d   : > { %v1070_v50 = vadd.f32 %v1060_v32, %v2041_v61 }
 0x15f   : > { %v1082_v53 = vadd.f32 %v2017_v49, %v1070_v50 }
 0x161   : > { %1101 = vst.msk [vmem:[%s2102_s23 + $0x18] sm:$0xff] %vm1087_vm3, %v1082_v53  ;;  %v1142_v13 = vsel %vm1087_vm3, %v1082_v53, 0.0  ;;  %v1250_v16 = vpop.permute.xlu0 %1249 }
 0x162   : > { %v1047_v58 = vpop.permute.xlu1 %1046 }
 0x163   : > { %v1057_v54 = vsel %vm1056_vm5, %v1045_v47, %v1047_v58  ;;  %v2112_v55 = vpop.permute.xlu2 %1247 }
 0x164   : > { %v1065_v56 = vsel %vm1034_vm4, 0.0, %v1057_v54  ;;  %v1251_v34 = vsel %vm1120_vm6, %v1246_v51, %v2112_v55 }
 0x165   : > { %v1067_v10 = vadd.f32 %v1065_v56, %v2028_v48 }
 0x167   : > { %v1079_v14 = vadd.f32 %v2007_v2, %v1067_v10  ;;  %v1194_v2 = vmul.f32 %v1082_v53, %v1082_v53  ;;  %v1252_v53 = vsel %vm1120_vm6, %v2112_v55, %v1250_v16 }
 0x169   : > { %1098 = vst [vmem:[%s2102_s23] sm:$0xff] %v1079_v14  ;;  %v1134_v61 = vadd.f32 %v1081_v57, %v1079_v14  ;;  %v1191_v63 = vmul.f32 %v1079_v14, %v1079_v14  ;;  %v1117_v43 = vpop.permute.xlu0 %1116 }
 0x16a   : > { %v1049_v0 = vpop.permute.xlu1 %1048 }
 0x16b   : > { %v1195_v1 = vadd.f32 %v1193_v59, %v1191_v63  ;;  %v1058_v3 = vsel %vm1056_vm5, %v1047_v58, %v1049_v0  ;;  %v1184_v4 = vpop.permute.xlu2 %1183  ;;  %v1135_v5 = vrot.slane %v1134_v61, 4 }
 0x16c   : > { %v1066_v6 = vsel %vm1034_vm4, 0.0, %v1058_v3 }
 0x16d   : > { %v1196_v7 = vrot.slane %v1195_v1, 4  ;;  %v1068_v48 = vadd.f32 %v1066_v6, %v2030_v52  ;;  %v1136_v8 = vadd.f32 %v1135_v5, %v1134_v61  ;;  %v1203_v52 = vsel %vm1087_vm3, %v1194_v2, 0.0 }
 0x16f   : > { %v1197_v9 = vadd.f32 %v1196_v7, %v1195_v1  ;;  %v1080_v11 = vadd.f32 %v2017_v49, %v1068_v48  ;;  %v1137_v12 = vrot.slane %v1136_v8, 2 }
 0x171   : > { %v1198_v15 = vrot.slane %v1197_v9, 2  ;;  %1099 = vst.msk [vmem:[%s2102_s23 + $0x8] sm:$0xff] %vm1087_vm3, %v1080_v11  ;;  %v1141_v17 = vsel %vm1087_vm3, %v1080_v11, 0.0  ;;  %v1192_v18 = vmul.f32 %v1080_v11, %v1080_v11  ;;  %v1138_v22 = vadd.f32 %v1137_v12, %v1136_v8 }
 0x172   : > { %v1143_v20 = vadd.f32 %v1142_v13, %v1141_v17  ;;  %v1182_v21 = vpop.permute.xlu1 %1181 }
 0x173   : > { %v1199_v23 = vadd.f32 %v1198_v15, %v1197_v9  ;;  %v1202_v49 = vsel %vm1087_vm3, %v1192_v18, 0.0  ;;  %v1109_v24 = vpop.permute.xlu2 %1108  ;;  %v1139_v31 = vrot.slane %v1138_v22, 1  ;;  %v1186_v56 = vsel %vm1120_vm6, %v1182_v21, %v1184_v4 }
 0x174   : > { %v1204_v25 = vadd.f32 %v1203_v52, %v1202_v49  ;;  %v1144_v26 = vrot.slane %v1143_v20, 4  ;;  %v1121_v27 = vsel %vm1120_vm6, %v1109_v24, %v2117_v60 }
 0x175   : > { %v1200_v28 = vrot.slane %v1199_v23, 1  ;;  %1753 = vst [vmem:[%s2102_s23 + $0x20] sm:$0xff] %v1121_v27  ;;  %v1140_v41 = vadd.f32 %v1139_v31, %v1138_v22 }
 0x176   : > { %v1205_v29 = vrot.slane %v1204_v25, 4  ;;  %v1145_v30 = vadd.f32 %v1144_v26, %v1143_v20 }
 0x177   : > { %v1201_v33 = vadd.f32 %v1200_v28, %v1199_v23 }
 0x178   : > { %v1206_v35 = vadd.f32 %v1205_v29, %v1204_v25  ;;  %v1146_v36 = vrot.slane %v1145_v30, 2 }
 0x179   : > { %v1255_v38 = vadd.f32 %v1251_v34, %v1201_v33 }
 0x17a   : > { %v1207_v39 = vrot.slane %v1206_v35, 2  ;;  %v1147_v37 = vadd.f32 %v1146_v36, %v1145_v30  ;;  %v1180_v40 = vpop.permute.xlu1 %1179 }
 0x17b   : > { %v1259_v42 = vrot.slane %v1255_v38, 7  ;;  %v1185_v44 = vsel %vm1120_vm6, %v1180_v40, %v1182_v21  ;;  %v1115_v45 = vpop.permute.xlu2 %1114 }
 0x17c   : > { %v1148_v46 = vrot.slane %v1147_v37, 1  ;;  %v1208_v47 = vadd.f32 %v1207_v39, %v1206_v35  ;;  %v1189_v19 = vadd.f32 %v1185_v44, %v1140_v41  ;;  %v1123_v57 = vsel %vm1120_vm6, %v1115_v45, %v1117_v43 }
 0x17d   : > { %1755 = vst [vmem:[%s2102_s23 + $0x30] sm:$0xff] %v1123_v57 }
 0x17e   : > { %v1209_v62 = vrot.slane %v1208_v47, 1  ;;  %v1263_v32 = vsel %vm1034_vm4, %v1189_v19, %v1259_v42  ;;  %v1149_v50 = vadd.f32 %v1148_v46, %v1147_v37 }
 0x180   : > { %v1210_v51 = vadd.f32 %v1209_v62, %v1208_v47  ;;  %v1190_v59 = vadd.f32 %v1186_v56, %v1149_v50 }
 0x182   : > { %v1256_v58 = vadd.f32 %v1252_v53, %v1210_v51  ;;  %v1113_v54 = vpop.permute.xlu1 %1112 }
 0x183   : > { %v1122_v10 = vsel %vm1120_vm6, %v2117_v60, %v1113_v54 }
 0x184   : > { %v1260_v14 = vrot.slane %v1256_v58, 7  ;;  %1754 = vst.msk [vmem:[%s2102_s23 + $0x28] sm:$0xff] %vm1087_vm3, %v1122_v10 }
 0x186   : > { %v1264_v61 = vsel %vm1034_vm4, %v1190_v59, %v1260_v14 }
 0x187   : > { %v1267_v63 = vrot.slane %v1264_v61, 6 }
 0x189   : > { %v1269_v55 = vsel %vm1268_vm7, %v1263_v32, %v1267_v63 }
 0x18a   : > { %1273 = vst.msk [vmem:[%s281_s28] sm:$0xf] %vm1272_vm9, %v1269_v55  ;;  %v1119_v0 = vpop.permute.xlu1 %1118 }
 0x18b   : > { %v1124_v60 = vsel %vm1120_vm6, %v1117_v43, %v1119_v0 }
 0x18c   : > { %1756 = vst.msk [vmem:[%s2102_s23 + $0x38] sm:$0xff] %vm1087_vm3, %v1124_v60 }
 0x18d PF: > { %s18_s21 = sadd.s32 1, %s1916_s21  }
 0x18e   : > { %p15_p7 = scmp.ge.s32.totalorder %s18_s21, 4  }
 0x190   :  { %17 = sbr.rel (!%p15_p7) target bundleno = 1 (0x1), region = 88 }
 0x195   :  { %1311 = vsyncpa [#allocation3], 1 }
 0x196   :  { %1313 = vsyncpa [#allocation3 + $0x1], 1 }

</bundles_post_ra>
